<compile_context>
chip_gen: v6e
topology: v6e:2x2x1
jax: 0.10.0
libtpu: 0.0.40
codegen_flags: <defaults>
</compile_context>

<pallas_src>
import functools
import math

import jax
import jax.numpy as jnp
from jax.experimental import pallas as pl
from jax.experimental.pallas import tpu as pltpu

LEAKY_SLOPE = 0.2
BN_EPS = 1e-5
ACT_DTYPE = jnp.bfloat16          # trunk activations / weights (f32 accumulation)


def _leaky(y):
    return jnp.where(y >= 0.0, y, LEAKY_SLOPE * y)


def _pick_tile(m, cap):
    """Largest divisor of m that is <= cap and a multiple of 8 (or m itself)."""
    for t in range(min(m, cap), 0, -1):
        if m % t == 0 and (t % 8 == 0 or t == m):
            return t
    return m


# ----------------------------------------------------------------------------
# Pallas kernels
# ----------------------------------------------------------------------------
def _knn_kernel(q_ref, kt_ref, idx_ref, *, k, n):
    """Fused pairwise-score + top-k neighbor selection for one query row-tile.

    q_ref: (1, tile_i, C) queries (bf16); kt_ref: (1, C, N) pre-transposed keys;
    idx_ref: (1, tile_i, k) int32 neighbor indices.
    Score s[i,j] = 2<q_i,k_j> - |k_j|^2 (row-constant -|q_i|^2 omitted: it does
    not change per-row ordering, matching PyTorch knn()'s top-k result).
    """
    q = q_ref[0]                                   # (tile_i, C)
    kt = kt_ref[0]                                 # (C, N)
    inner = jnp.dot(q, kt, preferred_element_type=jnp.float32)   # (tile_i, N)
    ktf = kt.astype(jnp.float32)
    sqk = jnp.sum(ktf * ktf, axis=0, keepdims=True)              # (1, N)
    d = 2.0 * inner - sqk                                        # (tile_i, N) f32

    tile_i = d.shape[0]
    iota_i = jax.lax.broadcasted_iota(jnp.int32, (tile_i, n), 1)
    iota_f = iota_i.astype(jnp.float32)
    col = jax.lax.broadcasted_iota(jnp.int32, (tile_i, k), 1)
    out = jnp.zeros((tile_i, k), jnp.int32)
    big = jnp.float32(n)
    neg = jnp.float32(-jnp.inf)
    for j in range(k):                 # k is small & static -> unrolled selection
        m = jnp.max(d, axis=-1, keepdims=True)                       # (tile_i, 1)
        sel_f = jnp.min(jnp.where(d == m, iota_f, big),
                        axis=-1, keepdims=True)                      # min-index tie-break
        sel_i = sel_f.astype(jnp.int32)
        out = jnp.where(col == j, sel_i, out)
        d = jnp.where(iota_i == sel_i, neg, d)                       # mask selected
    idx_ref[0] = out


def _point_transform_kernel(x_ref, w_ref, o_ref):
    """Per-point matmul against the fused (C, 2*Cout) weight (BN scale folded).

    Columns [:Cout]  = X @ (Wa*s)        (neighbor-side contribution, z)
    Columns [Cout:]  = X @ ((Wb-Wa)*s)   (center-side contribution, c)
    Single dot -> lane-dense (tile_m, 2*Cout) output (>=128 lanes for all stages).
    """
    o_ref[...] = jnp.dot(x_ref[...], w_ref[...],
                         preferred_element_type=jnp.float32).astype(o_ref.dtype)


def _conv5_pool_kernel(x1_ref, x2_ref, x3_ref, x4_ref, w_ref, b_ref,
                       omax_ref, omean_ref, *, inv_n):
    """Conv1d(512->emb) (scale folded) + bias + LeakyReLU, then running
    max / mean pooling over point tiles.  x1..x4 are consumed directly against
    static column slices of w (no (B,N,512) xcat materialization)."""
    j = pl.program_id(1)
    off = 0
    y = None
    for xref in (x1_ref, x2_ref, x3_ref, x4_ref):
        c = xref.shape[-1]
        part = jnp.dot(xref[0], w_ref[off:off + c, :],
                       preferred_element_type=jnp.float32)
        y = part if y is None else y + part
        off += c
    y = _leaky(y + b_ref[...])                    # (tile_n, emb) f32
    tmax = jnp.max(y, axis=0, keepdims=True)      # (1, emb)
    tsum = jnp.sum(y, axis=0, keepdims=True)      # (1, emb)

    @pl.when(j == 0)
    def _():
        omax_ref[0] = tmax
        omean_ref[0] = tsum

    @pl.when(j > 0)
    def _():
        omax_ref[0] = jnp.maximum(omax_ref[0], tmax)
        omean_ref[0] = omean_ref[0] + tsum

    @pl.when(j == pl.num_programs(1) - 1)
    def _():
        omean_ref[0] = omean_ref[0] * inv_n


def _head_kernel(x_ref, w1_ref, b6_ref, w2_ref, b2_ref, w3_ref, b3_ref, o_ref):
    """linear1(+BN6 folded)+lrelu -> linear2(+BN7 folded)+lrelu -> linear3."""
    h = jnp.dot(x_ref[...], w1_ref[...], preferred_element_type=jnp.float32)
    h = _leaky(h + b6_ref[...])
    h = jnp.dot(h, w2_ref[...], preferred_element_type=jnp.float32)
    h = _leaky(h + b2_ref[...])
    o_ref[...] = jnp.dot(h, w3_ref[...],
                         preferred_element_type=jnp.float32) + b3_ref[...]


# ----------------------------------------------------------------------------
# Pallas wrappers
# ----------------------------------------------------------------------------
def knn_indices(feat, feat_t, k):
    """feat: (B, N, C) queries; feat_t: (B, C, N) keys -> (B, N, k) int32."""
    B, N, C = feat.shape
    tile_i = _pick_tile(N, 512)
    flops = 2 * B * N * N * C
    bytes_acc = 2 * (2 * B * N * C) + 4 * B * N * k
    return pl.pallas_call(
        functools.partial(_knn_kernel, k=k, n=N),
        out_shape=jax.ShapeDtypeStruct((B, N, k), jnp.int32),
        grid=(B, N // tile_i),
        in_specs=[
            pl.BlockSpec((1, tile_i, C), lambda b, i: (b, i, 0)),
            pl.BlockSpec((1, C, N), lambda b, i: (b, 0, 0)),
        ],
        out_specs=pl.BlockSpec((1, tile_i, k), lambda b, i: (b, i, 0)),
        compiler_params=pltpu.CompilerParams(
            dimension_semantics=("parallel", "parallel"),
            vmem_limit_bytes=48 * 1024 * 1024),   # big row tiles; safe on v7x 64 MiB
        cost_estimate=pl.CostEstimate(flops=flops, transcendentals=0,
                                      bytes_accessed=bytes_acc),
    )(feat, feat_t)


def point_transform(x2d, wzc):
    """x2d: (M, C) -> (M, 2*Cout) bf16; one big row-tiled MXU pass."""
    M, C = x2d.shape
    Cout2 = wzc.shape[1]
    tile_m = _pick_tile(M, 1024)
    flops = 2 * M * C * Cout2
    bytes_acc = 2 * (M * C + C * Cout2 + M * Cout2)
    return pl.pallas_call(
        _point_transform_kernel,
        out_shape=jax.ShapeDtypeStruct((M, Cout2), ACT_DTYPE),
        grid=(M // tile_m,),
        in_specs=[
            pl.BlockSpec((tile_m, C), lambda i: (i, 0)),
            pl.BlockSpec((C, Cout2), lambda i: (0, 0)),
        ],
        out_specs=pl.BlockSpec((tile_m, Cout2), lambda i: (i, 0)),
        compiler_params=pltpu.CompilerParams(dimension_semantics=("parallel",)),
        cost_estimate=pl.CostEstimate(flops=flops, transcendentals=0,
                                      bytes_accessed=bytes_acc),
    )(x2d, wzc)


def conv5_pool(x1, x2, x3, x4, w, b):
    """x1..x4: (B, N, 64/64/128/256) bf16 -> (max (B,1,emb), mean (B,1,emb))."""
    B, N, _ = x1.shape
    Cin, emb = w.shape
    tile_n = _pick_tile(N, 1024)
    kernel = functools.partial(_conv5_pool_kernel, inv_n=1.0 / float(N))
    flops = 2 * B * N * Cin * emb
    bytes_acc = 2 * (B * N * Cin + Cin * emb) + 4 * (emb + 2 * B * emb)

    def xspec(c):
        return pl.BlockSpec((1, tile_n, c), lambda bb, j: (bb, j, 0))

    return pl.pallas_call(
        kernel,
        out_shape=(jax.ShapeDtypeStruct((B, 1, emb), jnp.float32),
                   jax.ShapeDtypeStruct((B, 1, emb), jnp.float32)),
        grid=(B, N // tile_n),
        in_specs=[xspec(x1.shape[-1]), xspec(x2.shape[-1]),
                  xspec(x3.shape[-1]), xspec(x4.shape[-1]),
                  pl.BlockSpec((Cin, emb), lambda bb, j: (0, 0)),
                  pl.BlockSpec((1, emb), lambda bb, j: (0, 0))],
        out_specs=(pl.BlockSpec((1, 1, emb), lambda bb, j: (bb, 0, 0)),
                   pl.BlockSpec((1, 1, emb), lambda bb, j: (bb, 0, 0))),
        compiler_params=pltpu.CompilerParams(
            dimension_semantics=("parallel", "arbitrary")),
        cost_estimate=pl.CostEstimate(flops=flops, transcendentals=0,
                                      bytes_accessed=bytes_acc),
    )(x1, x2, x3, x4, w, b)


def mlp_head(x, w1, b6, w2, b2, w3, b3):
    """x: (B, 2*emb) f32 -> (B, num_classes) f32."""
    B = x.shape[0]
    ncls = w3.shape[1]

    def full(a):
        nd = a.ndim
        return pl.BlockSpec(a.shape, lambda i, nd=nd: (0,) * nd)

    return pl.pallas_call(
        _head_kernel,
        out_shape=jax.ShapeDtypeStruct((B, ncls), jnp.float32),
        grid=(1,),
        in_specs=[full(x), full(w1), full(b6), full(w2), full(b2),
                  full(w3), full(b3)],
        out_specs=pl.BlockSpec((B, ncls), lambda i: (0, 0)),
    )(x, w1, b6, w2, b2, w3, b3)


# ----------------------------------------------------------------------------
# Edge-conv stage (algebraic form) and full forward
# ----------------------------------------------------------------------------
def edge_stage(feat, wzc, bias, k):
    """feat: (B, N, C) bf16 -> (B, N, Cout) bf16.

    Equivalent to get_graph_feature -> 1x1 Conv2d -> BN -> LeakyReLU -> max_K,
    using conv([nbr-ctr, ctr]) = nbr@(Wa*s) + ctr@((Wb-Wa)*s) and the
    monotonicity of (positive scale, +bias, LeakyReLU) to take the K-max first.
    """
    B, N, C = feat.shape
    Cout = wzc.shape[1] // 2
    feat_t = jnp.transpose(feat, (0, 2, 1))          # (B, C, N): pre-transposed keys
    idx = knn_indices(feat, feat_t, k)               # (B, N, k) int32 — fused top-k
    zc = point_transform(feat.reshape(B * N, C), wzc).reshape(B, N, 2 * Cout)
    zb = zc[..., :Cout]                              # neighbor-side contribution
    cb = zc[..., Cout:]                              # center-side contribution
    # Neighbor row-gather + max over K.
    # TODO(synk): fuse the gather+max into a Pallas kernel once Mosaic exposes a
    #             safe dynamic sublane gather for multi-vreg VMEM operands.
    g = zb[jnp.arange(B)[:, None, None], idx]        # (B, N, k, Cout) bf16
    m = jnp.max(g, axis=2).astype(jnp.float32)       # (B, N, Cout)
    return _leaky(m + cb.astype(jnp.float32) + bias[None]).astype(ACT_DTYPE)


def dgcnn_forward(x, params, k):
    """x: (B, 3, N) PyTorch channel-first layout. Returns (B, num_classes)."""
    B, _, N = x.shape
    xt = jnp.transpose(x, (0, 2, 1)).astype(ACT_DTYPE)      # (B, N, 3)

    x1 = edge_stage(xt, *params["conv1"], k)    # (B, N, 64)
    x2 = edge_stage(x1, *params["conv2"], k)    # (B, N, 64)
    x3 = edge_stage(x2, *params["conv3"], k)    # (B, N, 128)
    x4 = edge_stage(x3, *params["conv4"], k)    # (B, N, 256)

    pmax, pmean = conv5_pool(x1, x2, x3, x4, params["conv5_w"], params["conv5_b"])
    feat = jnp.concatenate([pmax[:, 0, :], pmean[:, 0, :]], axis=-1)   # (B, 2*emb) f32

    # TODO(synk): Dropout layers are identity (eval mode).
    return mlp_head(feat, params["w1"], params["b6"], params["w2"],
                    params["b2"], params["w3"], params["b3"])


# ----------------------------------------------------------------------------
# Deterministic parameter init (BN scale folded into weights; eval-mode stats)
# ----------------------------------------------------------------------------
def _bn_scale(c):
    # BN at init (eval): gamma=1, beta=0, mean=0, var=1 -> scale=1/sqrt(1+eps) > 0
    return jnp.full((1, c), 1.0 / math.sqrt(1.0 + BN_EPS), jnp.float32)


def init_params(key, emb_dims, num_classes):
    ks = jax.random.split(key, 10)

    def w_init(kk, cin, cout):
        bound = 1.0 / math.sqrt(cin)
        return jax.random.uniform(kk, (cin, cout), jnp.float32, -bound, bound)

    def edge_params(kk, cin_point, cout):
        w = w_init(kk, 2 * cin_point, cout)      # Conv2d(2C, Cout, 1, bias=False)
        s = _bn_scale(cout)                      # positive -> max/epilogue commute OK
        wa, wb = w[:cin_point], w[cin_point:]
        wzc = jnp.concatenate([wa * s, (wb - wa) * s], axis=1).astype(ACT_DTYPE)
        b = jnp.zeros((1, cout), jnp.float32)    # folded BN bias (0 at init)
        return (wzc, b)

    p = {}
    p["conv1"] = edge_params(ks[0], 3, 64)
    p["conv2"] = edge_params(ks[1], 64, 64)
    p["conv3"] = edge_params(ks[2], 64, 128)
    p["conv4"] = edge_params(ks[3], 128, 256)

    s5 = _bn_scale(emb_dims)
    p["conv5_w"] = (w_init(ks[4], 512, emb_dims) * s5).astype(ACT_DTYPE)
    p["conv5_b"] = jnp.zeros((1, emb_dims), jnp.float32)

    s6 = _bn_scale(512)
    p["w1"] = w_init(ks[5], 2 * emb_dims, 512) * s6
    p["b6"] = jnp.zeros((1, 512), jnp.float32)

    s7 = _bn_scale(256)
    p["w2"] = w_init(ks[6], 512, 256) * s7
    b2 = jax.random.uniform(ks[7], (1, 256), jnp.float32,
                            -1.0 / math.sqrt(512), 1.0 / math.sqrt(512))
    p["b2"] = b2 * s7                            # BN7 folded: s7*(xW2+b2)+0

    p["w3"] = w_init(ks[8], 256, num_classes)
    p["b3"] = jax.random.uniform(ks[9], (1, num_classes), jnp.float32,
                                 -1.0 / math.sqrt(256), 1.0 / math.sqrt(256))
    return p


if __name__ == "__main__":
    B, N, K_NEIGH = 2, 16, 4          # small test: batch=2, 16 points, k=4
    EMB_DIMS, NUM_CLASSES = 64, 40

    key = jax.random.PRNGKey(0)
    kx, kp = jax.random.split(key)
    x = jax.random.normal(kx, (B, 3, N), jnp.float32)   # PyTorch layout (B, 3, N)
    params = init_params(kp, EMB_DIMS, NUM_CLASSES)

    fwd = jax.jit(functools.partial(dgcnn_forward, k=K_NEIGH))
    out = fwd(x, params)
    out = jax.block_until_ready(out)
    assert out.shape == (B, NUM_CLASSES)
    assert bool(jnp.all(jnp.isfinite(out)))
    print("KERNEL_OK")
</pallas_src>

<mosaic_0001>
module attributes {stable_mosaic.version = 11 : i64} {
  func.func @_point_transform_kernel(%arg0: i32, %arg1: memref<32x3xbf16, #tpu.memory_space<vmem>>, %arg2: memref<3x128xbf16, #tpu.memory_space<vmem>>, %arg3: memref<32x128xbf16, #tpu.memory_space<vmem>>) attributes {dimension_semantics = [#tpu.dimension_semantics<parallel>], iteration_bounds = array<i64: 1>, scalar_prefetch = 0 : i64, scratch_operands = 0 : i64, tpu.core_type = #tpu.core_type<tc>, window_params = [{transform_indices = @transform_0, window_bounds = array<i64: 32, 3>}, {pipeline_mode = #tpu.pipeline_mode<synchronous>, transform_indices = @transform_1, window_bounds = array<i64: 3, 128>}, {transform_indices = @transform_2, window_bounds = array<i64: 32, 128>}]} {
    %c0 = arith.constant 0 : index
    %c0_0 = arith.constant 0 : index
    %0 = vector.load %arg1[%c0, %c0_0] : memref<32x3xbf16, #tpu.memory_space<vmem>>, vector<32x3xbf16>
    %c0_1 = arith.constant 0 : index
    %c0_2 = arith.constant 0 : index
    %1 = vector.load %arg2[%c0_1, %c0_2] : memref<3x128xbf16, #tpu.memory_space<vmem>>, vector<3x128xbf16>
    %cst = arith.constant dense<0.000000e+00> : vector<32x128xf32>
    %2 = tpu.matmul %0, %1, %cst {dimension_numbers = #tpu.dot_dimension_numbers<[1], [0], [0], [1], [0, 0, 1, 1], [], []>} : vector<32x3xbf16>, vector<3x128xbf16>, vector<32x128xf32> -> vector<32x128xf32>
    %3 = arith.truncf %2 : vector<32x128xf32> to vector<32x128xbf16>
    %c0_3 = arith.constant 0 : index
    %c0_4 = arith.constant 0 : index
    %4 = vector.load %arg3[%c0_3, %c0_4] : memref<32x128xbf16, #tpu.memory_space<vmem>>, vector<32x128xbf16>
    tpu.vector_store %arg3[%c0_3, %c0_4], %3 {strides = array<i32>} : memref<32x128xbf16, #tpu.memory_space<vmem>>, vector<32x128xbf16>,
    return
  }
  func.func @transform_0(%arg0: i32) -> (i32, i32) {
    %c0_i32 = arith.constant 0 : i32
    %c0_i32_0 = arith.constant 0 : i32
    return %arg0, %c0_i32 : i32, i32
  }
  func.func @transform_1(%arg0: i32) -> (i32, i32) {
    %c0_i32 = arith.constant 0 : i32
    %c0_i32_0 = arith.constant 0 : i32
    %c0_i32_1 = arith.constant 0 : i32
    return %c0_i32, %c0_i32_0 : i32, i32
  }
  func.func @transform_2(%arg0: i32) -> (i32, i32) {
    %c0_i32 = arith.constant 0 : i32
    %c0_i32_0 = arith.constant 0 : i32
    return %arg0, %c0_i32 : i32, i32
  }
}

module attributes {stable_mosaic.version = 11 : i64} {
  func.func @_knn_kernel(%arg0: i32, %arg1: i32, %arg2: memref<1x16x3xbf16, #tpu.memory_space<vmem>>, %arg3: memref<1x3x16xbf16, #tpu.memory_space<vmem>>, %arg4: memref<1x16x4xi32, #tpu.memory_space<vmem>>) attributes {dimension_semantics = [#tpu.dimension_semantics<parallel>, #tpu.dimension_semantics<parallel>], iteration_bounds = array<i64: 2, 1>, scalar_prefetch = 0 : i64, scratch_operands = 0 : i64, tpu.core_type = #tpu.core_type<tc>, window_params = [{transform_indices = @transform_0, window_bounds = array<i64: 1, 16, 3>}, {transform_indices = @transform_1, window_bounds = array<i64: 1, 3, 16>}, {transform_indices = @transform_2, window_bounds = array<i64: 1, 16, 4>}]} {
    %c0 = arith.constant 0 : index
    %c0_0 = arith.constant 0 : index
    %c0_1 = arith.constant 0 : index
    %0 = vector.load %arg2[%c0, %c0_0, %c0_1] : memref<1x16x3xbf16, #tpu.memory_space<vmem>>, vector<1x16x3xbf16>
    %1 = vector.shape_cast %0 : vector<1x16x3xbf16> to vector<16x3xbf16>
    %c0_2 = arith.constant 0 : index
    %c0_3 = arith.constant 0 : index
    %c0_4 = arith.constant 0 : index
    %2 = vector.load %arg3[%c0_2, %c0_3, %c0_4] : memref<1x3x16xbf16, #tpu.memory_space<vmem>>, vector<1x3x16xbf16>
    %3 = vector.shape_cast %2 : vector<1x3x16xbf16> to vector<3x16xbf16>
    %cst = arith.constant dense<0.000000e+00> : vector<16x16xf32>
    %4 = tpu.matmul %1, %3, %cst {dimension_numbers = #tpu.dot_dimension_numbers<[1], [0], [0], [1], [0, 0, 1, 1], [], []>} : vector<16x3xbf16>, vector<3x16xbf16>, vector<16x16xf32> -> vector<16x16xf32>
    %5 = arith.extf %3 : vector<3x16xbf16> to vector<3x16xf32>
    %6 = arith.mulf %5, %5 : vector<3x16xf32>
    %cst_5 = arith.constant dense<0.000000e+00> : vector<16xf32>
    %7 = vector.multi_reduction <add>, %6, %cst_5 [0] : vector<3x16xf32> to vector<16xf32>
    %8 = vector.shape_cast %7 : vector<16xf32> to vector<1x16xf32>
    %cst_6 = arith.constant 2.000000e+00 : f32
    %9 = vector.broadcast %cst_6 : f32 to vector<16x16xf32>
    %10 = arith.mulf %9, %4 : vector<16x16xf32>
    %11 = vector.broadcast %8 : vector<1x16xf32> to vector<16x16xf32>
    %12 = arith.subf %10, %11 : vector<16x16xf32>
    %13 = tpu.iota {dimensions = array<i32: 1>} : vector<16x16xi32>
    %14 = arith.sitofp %13 : vector<16x16xi32> to vector<16x16xf32>
    %15 = tpu.iota {dimensions = array<i32: 1>} : vector<16x4xi32>
    %c0_i32 = arith.constant 0 : i32
    %16 = vector.broadcast %c0_i32 : i32 to vector<16x4xi32>
    %cst_7 = arith.constant dense<0xFF800000> : vector<16xf32>
    %17 = vector.multi_reduction <maximumf>, %12, %cst_7 [1] : vector<16x16xf32> to vector<16xf32>
    %18 = vector.shape_cast %17 : vector<16xf32> to vector<16x1xf32>
    %19 = vector.broadcast %18 : vector<16x1xf32> to vector<16x16xf32>
    %20 = arith.cmpf oeq, %12, %19 : vector<16x16xf32>
    %cst_8 = arith.constant 1.600000e+01 : f32
    %21 = vector.broadcast %cst_8 : f32 to vector<16x16xf32>
    %22 = arith.select %20, %14, %21 : vector<16x16xi1>, vector<16x16xf32>
    %cst_9 = arith.constant dense<0x7F800000> : vector<16xf32>
    %23 = vector.multi_reduction <minimumf>, %22, %cst_9 [1] : vector<16x16xf32> to vector<16xf32>
    %24 = vector.shape_cast %23 : vector<16xf32> to vector<16x1xf32>
    %25 = arith.fptosi %24 : vector<16x1xf32> to vector<16x1xi32>
    %c0_i32_10 = arith.constant 0 : i32
    %26 = vector.broadcast %c0_i32_10 : i32 to vector<16x4xi32>
    %27 = arith.cmpi eq, %15, %26 : vector<16x4xi32>
    %28 = vector.shape_cast %25 : vector<16x1xi32> to vector<16x1xi32>
    %29 = vector.broadcast %28 : vector<16x1xi32> to vector<16x4xi32>
    %30 = arith.select %27, %29, %16 : vector<16x4xi1>, vector<16x4xi32>
    %31 = vector.broadcast %25 : vector<16x1xi32> to vector<16x16xi32>
    %32 = arith.cmpi eq, %13, %31 : vector<16x16xi32>
    %cst_11 = arith.constant 0xFF800000 : f32
    %33 = vector.broadcast %cst_11 : f32 to vector<16x16xf32>
    %34 = arith.select %32, %33, %12 : vector<16x16xi1>, vector<16x16xf32>
    %cst_12 = arith.constant dense<0xFF800000> : vector<16xf32>
    %35 = vector.multi_reduction <maximumf>, %34, %cst_12 [1] : vector<16x16xf32> to vector<16xf32>
    %36 = vector.shape_cast %35 : vector<16xf32> to vector<16x1xf32>
    %37 = vector.broadcast %36 : vector<16x1xf32> to vector<16x16xf32>
    %38 = arith.cmpf oeq, %34, %37 : vector<16x16xf32>
    %cst_13 = arith.constant 1.600000e+01 : f32
    %39 = vector.broadcast %cst_13 : f32 to vector<16x16xf32>
    %40 = arith.select %38, %14, %39 : vector<16x16xi1>, vector<16x16xf32>
    %cst_14 = arith.constant dense<0x7F800000> : vector<16xf32>
    %41 = vector.multi_reduction <minimumf>, %40, %cst_14 [1] : vector<16x16xf32> to vector<16xf32>
    %42 = vector.shape_cast %41 : vector<16xf32> to vector<16x1xf32>
    %43 = arith.fptosi %42 : vector<16x1xf32> to vector<16x1xi32>
    %c1_i32 = arith.constant 1 : i32
    %44 = vector.broadcast %c1_i32 : i32 to vector<16x4xi32>
    %45 = arith.cmpi eq, %15, %44 : vector<16x4xi32>
    %46 = vector.shape_cast %43 : vector<16x1xi32> to vector<16x1xi32>
    %47 = vector.broadcast %46 : vector<16x1xi32> to vector<16x4xi32>
    %48 = arith.select %45, %47, %30 : vector<16x4xi1>, vector<16x4xi32>
    %49 = vector.broadcast %43 : vector<16x1xi32> to vector<16x16xi32>
    %50 = arith.cmpi eq, %13, %49 : vector<16x16xi32>
    %cst_15 = arith.constant 0xFF800000 : f32
    %51 = vector.broadcast %cst_15 : f32 to vector<16x16xf32>
    %52 = arith.select %50, %51, %34 : vector<16x16xi1>, vector<16x16xf32>
    %cst_16 = arith.constant dense<0xFF800000> : vector<16xf32>
    %53 = vector.multi_reduction <maximumf>, %52, %cst_16 [1] : vector<16x16xf32> to vector<16xf32>
    %54 = vector.shape_cast %53 : vector<16xf32> to vector<16x1xf32>
    %55 = vector.broadcast %54 : vector<16x1xf32> to vector<16x16xf32>
    %56 = arith.cmpf oeq, %52, %55 : vector<16x16xf32>
    %cst_17 = arith.constant 1.600000e+01 : f32
    %57 = vector.broadcast %cst_17 : f32 to vector<16x16xf32>
    %58 = arith.select %56, %14, %57 : vector<16x16xi1>, vector<16x16xf32>
    %cst_18 = arith.constant dense<0x7F800000> : vector<16xf32>
    %59 = vector.multi_reduction <minimumf>, %58, %cst_18 [1] : vector<16x16xf32> to vector<16xf32>
    %60 = vector.shape_cast %59 : vector<16xf32> to vector<16x1xf32>
    %61 = arith.fptosi %60 : vector<16x1xf32> to vector<16x1xi32>
    %c2_i32 = arith.constant 2 : i32
    %62 = vector.broadcast %c2_i32 : i32 to vector<16x4xi32>
    %63 = arith.cmpi eq, %15, %62 : vector<16x4xi32>
    %64 = vector.shape_cast %61 : vector<16x1xi32> to vector<16x1xi32>
    %65 = vector.broadcast %64 : vector<16x1xi32> to vector<16x4xi32>
    %66 = arith.select %63, %65, %48 : vector<16x4xi1>, vector<16x4xi32>
    %67 = vector.broadcast %61 : vector<16x1xi32> to vector<16x16xi32>
    %68 = arith.cmpi eq, %13, %67 : vector<16x16xi32>
    %cst_19 = arith.constant 0xFF800000 : f32
    %69 = vector.broadcast %cst_19 : f32 to vector<16x16xf32>
    %70 = arith.select %68, %69, %52 : vector<16x16xi1>, vector<16x16xf32>
    %cst_20 = arith.constant dense<0xFF800000> : vector<16xf32>
    %71 = vector.multi_reduction <maximumf>, %70, %cst_20 [1] : vector<16x16xf32> to vector<16xf32>
    %72 = vector.shape_cast %71 : vector<16xf32> to vector<16x1xf32>
    %73 = vector.broadcast %72 : vector<16x1xf32> to vector<16x16xf32>
    %74 = arith.cmpf oeq, %70, %73 : vector<16x16xf32>
    %cst_21 = arith.constant 1.600000e+01 : f32
    %75 = vector.broadcast %cst_21 : f32 to vector<16x16xf32>
    %76 = arith.select %74, %14, %75 : vector<16x16xi1>, vector<16x16xf32>
    %cst_22 = arith.constant dense<0x7F800000> : vector<16xf32>
    %77 = vector.multi_reduction <minimumf>, %76, %cst_22 [1] : vector<16x16xf32> to vector<16xf32>
    %78 = vector.shape_cast %77 : vector<16xf32> to vector<16x1xf32>
    %79 = arith.fptosi %78 : vector<16x1xf32> to vector<16x1xi32>
    %c3_i32 = arith.constant 3 : i32
    %80 = vector.broadcast %c3_i32 : i32 to vector<16x4xi32>
    %81 = arith.cmpi eq, %15, %80 : vector<16x4xi32>
    %82 = vector.shape_cast %79 : vector<16x1xi32> to vector<16x1xi32>
    %83 = vector.broadcast %82 : vector<16x1xi32> to vector<16x4xi32>
    %84 = arith.select %81, %83, %66 : vector<16x4xi1>, vector<16x4xi32>
    %c0_23 = arith.constant 0 : index
    %c0_24 = arith.constant 0 : index
    %c0_25 = arith.constant 0 : index
    %85 = vector.load %arg4[%c0_23, %c0_24, %c0_25] : memref<1x16x4xi32, #tpu.memory_space<vmem>>, vector<1x16x4xi32>
    %86 = vector.shape_cast %85 : vector<1x16x4xi32> to vector<16x4xi32>
    %87 = vector.shape_cast %84 : vector<16x4xi32> to vector<1x16x4xi32>
    tpu.vector_store %arg4[%c0_23, %c0_24, %c0_25], %87 {strides = array<i32>} : memref<1x16x4xi32, #tpu.memory_space<vmem>>, vector<1x16x4xi32>,
    return
  }
  func.func @transform_0(%arg0: i32, %arg1: i32) -> (i32, i32, i32) {
    %c0_i32 = arith.constant 0 : i32
    %c0_i32_0 = arith.constant 0 : i32
    return %arg0, %arg1, %c0_i32 : i32, i32, i32
  }
  func.func @transform_1(%arg0: i32, %arg1: i32) -> (i32, i32, i32) {
    %c0_i32 = arith.constant 0 : i32
    %c0_i32_0 = arith.constant 0 : i32
    %c0_i32_1 = arith.constant 0 : i32
    return %arg0, %c0_i32, %c0_i32_0 : i32, i32, i32
  }
  func.func @transform_2(%arg0: i32, %arg1: i32) -> (i32, i32, i32) {
    %c0_i32 = arith.constant 0 : i32
    %c0_i32_0 = arith.constant 0 : i32
    return %arg0, %arg1, %c0_i32 : i32, i32, i32
  }
}

module attributes {stable_mosaic.version = 11 : i64} {
  func.func @_point_transform_kernel(%arg0: i32, %arg1: memref<32x64xbf16, #tpu.memory_space<vmem>>, %arg2: memref<64x128xbf16, #tpu.memory_space<vmem>>, %arg3: memref<32x128xbf16, #tpu.memory_space<vmem>>) attributes {dimension_semantics = [#tpu.dimension_semantics<parallel>], iteration_bounds = array<i64: 1>, scalar_prefetch = 0 : i64, scratch_operands = 0 : i64, tpu.core_type = #tpu.core_type<tc>, window_params = [{transform_indices = @transform_0, window_bounds = array<i64: 32, 64>}, {pipeline_mode = #tpu.pipeline_mode<synchronous>, transform_indices = @transform_1, window_bounds = array<i64: 64, 128>}, {transform_indices = @transform_2, window_bounds = array<i64: 32, 128>}]} {
    %c0 = arith.constant 0 : index
    %c0_0 = arith.constant 0 : index
    %0 = vector.load %arg1[%c0, %c0_0] : memref<32x64xbf16, #tpu.memory_space<vmem>>, vector<32x64xbf16>
    %c0_1 = arith.constant 0 : index
    %c0_2 = arith.constant 0 : index
    %1 = vector.load %arg2[%c0_1, %c0_2] : memref<64x128xbf16, #tpu.memory_space<vmem>>, vector<64x128xbf16>
    %cst = arith.constant dense<0.000000e+00> : vector<32x128xf32>
    %2 = tpu.matmul %0, %1, %cst {dimension_numbers = #tpu.dot_dimension_numbers<[1], [0], [0], [1], [0, 0, 1, 1], [], []>} : vector<32x64xbf16>, vector<64x128xbf16>, vector<32x128xf32> -> vector<32x128xf32>
    %3 = arith.truncf %2 : vector<32x128xf32> to vector<32x128xbf16>
    %c0_3 = arith.constant 0 : index
    %c0_4 = arith.constant 0 : index
    %4 = vector.load %arg3[%c0_3, %c0_4] : memref<32x128xbf16, #tpu.memory_space<vmem>>, vector<32x128xbf16>
    tpu.vector_store %arg3[%c0_3, %c0_4], %3 {strides = array<i32>} : memref<32x128xbf16, #tpu.memory_space<vmem>>, vector<32x128xbf16>,
    return
  }
  func.func @transform_0(%arg0: i32) -> (i32, i32) {
    %c0_i32 = arith.constant 0 : i32
    %c0_i32_0 = arith.constant 0 : i32
    return %arg0, %c0_i32 : i32, i32
  }
  func.func @transform_1(%arg0: i32) -> (i32, i32) {
    %c0_i32 = arith.constant 0 : i32
    %c0_i32_0 = arith.constant 0 : i32
    %c0_i32_1 = arith.constant 0 : i32
    return %c0_i32, %c0_i32_0 : i32, i32
  }
  func.func @transform_2(%arg0: i32) -> (i32, i32) {
    %c0_i32 = arith.constant 0 : i32
    %c0_i32_0 = arith.constant 0 : i32
    return %arg0, %c0_i32 : i32, i32
  }
}

module attributes {stable_mosaic.version = 11 : i64} {
  func.func @_point_transform_kernel(%arg0: i32, %arg1: memref<32x64xbf16, #tpu.memory_space<vmem>>, %arg2: memref<64x256xbf16, #tpu.memory_space<vmem>>, %arg3: memref<32x256xbf16, #tpu.memory_space<vmem>>) attributes {dimension_semantics = [#tpu.dimension_semantics<parallel>], iteration_bounds = array<i64: 1>, scalar_prefetch = 0 : i64, scratch_operands = 0 : i64, tpu.core_type = #tpu.core_type<tc>, window_params = [{transform_indices = @transform_0, window_bounds = array<i64: 32, 64>}, {pipeline_mode = #tpu.pipeline_mode<synchronous>, transform_indices = @transform_1, window_bounds = array<i64: 64, 256>}, {transform_indices = @transform_2, window_bounds = array<i64: 32, 256>}]} {
    %c0 = arith.constant 0 : index
    %c0_0 = arith.constant 0 : index
    %0 = vector.load %arg1[%c0, %c0_0] : memref<32x64xbf16, #tpu.memory_space<vmem>>, vector<32x64xbf16>
    %c0_1 = arith.constant 0 : index
    %c0_2 = arith.constant 0 : index
    %1 = vector.load %arg2[%c0_1, %c0_2] : memref<64x256xbf16, #tpu.memory_space<vmem>>, vector<64x256xbf16>
    %cst = arith.constant dense<0.000000e+00> : vector<32x256xf32>
    %2 = tpu.matmul %0, %1, %cst {dimension_numbers = #tpu.dot_dimension_numbers<[1], [0], [0], [1], [0, 0, 1, 1], [], []>} : vector<32x64xbf16>, vector<64x256xbf16>, vector<32x256xf32> -> vector<32x256xf32>
    %3 = arith.truncf %2 : vector<32x256xf32> to vector<32x256xbf16>
    %c0_3 = arith.constant 0 : index
    %c0_4 = arith.constant 0 : index
    %4 = vector.load %arg3[%c0_3, %c0_4] : memref<32x256xbf16, #tpu.memory_space<vmem>>, vector<32x256xbf16>
    tpu.vector_store %arg3[%c0_3, %c0_4], %3 {strides = array<i32>} : memref<32x256xbf16, #tpu.memory_space<vmem>>, vector<32x256xbf16>,
    return
  }
  func.func @transform_0(%arg0: i32) -> (i32, i32) {
    %c0_i32 = arith.constant 0 : i32
    %c0_i32_0 = arith.constant 0 : i32
    return %arg0, %c0_i32 : i32, i32
  }
  func.func @transform_1(%arg0: i32) -> (i32, i32) {
    %c0_i32 = arith.constant 0 : i32
    %c0_i32_0 = arith.constant 0 : i32
    %c0_i32_1 = arith.constant 0 : i32
    return %c0_i32, %c0_i32_0 : i32, i32
  }
  func.func @transform_2(%arg0: i32) -> (i32, i32) {
    %c0_i32 = arith.constant 0 : i32
    %c0_i32_0 = arith.constant 0 : i32
    return %arg0, %c0_i32 : i32, i32
  }
}

module attributes {stable_mosaic.version = 11 : i64} {
  func.func @_knn_kernel(%arg0: i32, %arg1: i32, %arg2: memref<1x16x64xbf16, #tpu.memory_space<vmem>>, %arg3: memref<1x64x16xbf16, #tpu.memory_space<vmem>>, %arg4: memref<1x16x4xi32, #tpu.memory_space<vmem>>) attributes {dimension_semantics = [#tpu.dimension_semantics<parallel>, #tpu.dimension_semantics<parallel>], iteration_bounds = array<i64: 2, 1>, scalar_prefetch = 0 : i64, scratch_operands = 0 : i64, tpu.core_type = #tpu.core_type<tc>, window_params = [{transform_indices = @transform_0, window_bounds = array<i64: 1, 16, 64>}, {transform_indices = @transform_1, window_bounds = array<i64: 1, 64, 16>}, {transform_indices = @transform_2, window_bounds = array<i64: 1, 16, 4>}]} {
    %c0 = arith.constant 0 : index
    %c0_0 = arith.constant 0 : index
    %c0_1 = arith.constant 0 : index
    %0 = vector.load %arg2[%c0, %c0_0, %c0_1] : memref<1x16x64xbf16, #tpu.memory_space<vmem>>, vector<1x16x64xbf16>
    %1 = vector.shape_cast %0 : vector<1x16x64xbf16> to vector<16x64xbf16>
    %c0_2 = arith.constant 0 : index
    %c0_3 = arith.constant 0 : index
    %c0_4 = arith.constant 0 : index
    %2 = vector.load %arg3[%c0_2, %c0_3, %c0_4] : memref<1x64x16xbf16, #tpu.memory_space<vmem>>, vector<1x64x16xbf16>
    %3 = vector.shape_cast %2 : vector<1x64x16xbf16> to vector<64x16xbf16>
    %cst = arith.constant dense<0.000000e+00> : vector<16x16xf32>
    %4 = tpu.matmul %1, %3, %cst {dimension_numbers = #tpu.dot_dimension_numbers<[1], [0], [0], [1], [0, 0, 1, 1], [], []>} : vector<16x64xbf16>, vector<64x16xbf16>, vector<16x16xf32> -> vector<16x16xf32>
    %5 = arith.extf %3 : vector<64x16xbf16> to vector<64x16xf32>
    %6 = arith.mulf %5, %5 : vector<64x16xf32>
    %cst_5 = arith.constant dense<0.000000e+00> : vector<16xf32>
    %7 = vector.multi_reduction <add>, %6, %cst_5 [0] : vector<64x16xf32> to vector<16xf32>
    %8 = vector.shape_cast %7 : vector<16xf32> to vector<1x16xf32>
    %cst_6 = arith.constant 2.000000e+00 : f32
    %9 = vector.broadcast %cst_6 : f32 to vector<16x16xf32>
    %10 = arith.mulf %9, %4 : vector<16x16xf32>
    %11 = vector.broadcast %8 : vector<1x16xf32> to vector<16x16xf32>
    %12 = arith.subf %10, %11 : vector<16x16xf32>
    %13 = tpu.iota {dimensions = array<i32: 1>} : vector<16x16xi32>
    %14 = arith.sitofp %13 : vector<16x16xi32> to vector<16x16xf32>
    %15 = tpu.iota {dimensions = array<i32: 1>} : vector<16x4xi32>
    %c0_i32 = arith.constant 0 : i32
    %16 = vector.broadcast %c0_i32 : i32 to vector<16x4xi32>
    %cst_7 = arith.constant dense<0xFF800000> : vector<16xf32>
    %17 = vector.multi_reduction <maximumf>, %12, %cst_7 [1] : vector<16x16xf32> to vector<16xf32>
    %18 = vector.shape_cast %17 : vector<16xf32> to vector<16x1xf32>
    %19 = vector.broadcast %18 : vector<16x1xf32> to vector<16x16xf32>
    %20 = arith.cmpf oeq, %12, %19 : vector<16x16xf32>
    %cst_8 = arith.constant 1.600000e+01 : f32
    %21 = vector.broadcast %cst_8 : f32 to vector<16x16xf32>
    %22 = arith.select %20, %14, %21 : vector<16x16xi1>, vector<16x16xf32>
    %cst_9 = arith.constant dense<0x7F800000> : vector<16xf32>
    %23 = vector.multi_reduction <minimumf>, %22, %cst_9 [1] : vector<16x16xf32> to vector<16xf32>
    %24 = vector.shape_cast %23 : vector<16xf32> to vector<16x1xf32>
    %25 = arith.fptosi %24 : vector<16x1xf32> to vector<16x1xi32>
    %c0_i32_10 = arith.constant 0 : i32
    %26 = vector.broadcast %c0_i32_10 : i32 to vector<16x4xi32>
    %27 = arith.cmpi eq, %15, %26 : vector<16x4xi32>
    %28 = vector.shape_cast %25 : vector<16x1xi32> to vector<16x1xi32>
    %29 = vector.broadcast %28 : vector<16x1xi32> to vector<16x4xi32>
    %30 = arith.select %27, %29, %16 : vector<16x4xi1>, vector<16x4xi32>
    %31 = vector.broadcast %25 : vector<16x1xi32> to vector<16x16xi32>
    %32 = arith.cmpi eq, %13, %31 : vector<16x16xi32>
    %cst_11 = arith.constant 0xFF800000 : f32
    %33 = vector.broadcast %cst_11 : f32 to vector<16x16xf32>
    %34 = arith.select %32, %33, %12 : vector<16x16xi1>, vector<16x16xf32>
    %cst_12 = arith.constant dense<0xFF800000> : vector<16xf32>
    %35 = vector.multi_reduction <maximumf>, %34, %cst_12 [1] : vector<16x16xf32> to vector<16xf32>
    %36 = vector.shape_cast %35 : vector<16xf32> to vector<16x1xf32>
    %37 = vector.broadcast %36 : vector<16x1xf32> to vector<16x16xf32>
    %38 = arith.cmpf oeq, %34, %37 : vector<16x16xf32>
    %cst_13 = arith.constant 1.600000e+01 : f32
    %39 = vector.broadcast %cst_13 : f32 to vector<16x16xf32>
    %40 = arith.select %38, %14, %39 : vector<16x16xi1>, vector<16x16xf32>
    %cst_14 = arith.constant dense<0x7F800000> : vector<16xf32>
    %41 = vector.multi_reduction <minimumf>, %40, %cst_14 [1] : vector<16x16xf32> to vector<16xf32>
    %42 = vector.shape_cast %41 : vector<16xf32> to vector<16x1xf32>
    %43 = arith.fptosi %42 : vector<16x1xf32> to vector<16x1xi32>
    %c1_i32 = arith.constant 1 : i32
    %44 = vector.broadcast %c1_i32 : i32 to vector<16x4xi32>
    %45 = arith.cmpi eq, %15, %44 : vector<16x4xi32>
    %46 = vector.shape_cast %43 : vector<16x1xi32> to vector<16x1xi32>
    %47 = vector.broadcast %46 : vector<16x1xi32> to vector<16x4xi32>
    %48 = arith.select %45, %47, %30 : vector<16x4xi1>, vector<16x4xi32>
    %49 = vector.broadcast %43 : vector<16x1xi32> to vector<16x16xi32>
    %50 = arith.cmpi eq, %13, %49 : vector<16x16xi32>
    %cst_15 = arith.constant 0xFF800000 : f32
    %51 = vector.broadcast %cst_15 : f32 to vector<16x16xf32>
    %52 = arith.select %50, %51, %34 : vector<16x16xi1>, vector<16x16xf32>
    %cst_16 = arith.constant dense<0xFF800000> : vector<16xf32>
    %53 = vector.multi_reduction <maximumf>, %52, %cst_16 [1] : vector<16x16xf32> to vector<16xf32>
    %54 = vector.shape_cast %53 : vector<16xf32> to vector<16x1xf32>
    %55 = vector.broadcast %54 : vector<16x1xf32> to vector<16x16xf32>
    %56 = arith.cmpf oeq, %52, %55 : vector<16x16xf32>
    %cst_17 = arith.constant 1.600000e+01 : f32
    %57 = vector.broadcast %cst_17 : f32 to vector<16x16xf32>
    %58 = arith.select %56, %14, %57 : vector<16x16xi1>, vector<16x16xf32>
    %cst_18 = arith.constant dense<0x7F800000> : vector<16xf32>
    %59 = vector.multi_reduction <minimumf>, %58, %cst_18 [1] : vector<16x16xf32> to vector<16xf32>
    %60 = vector.shape_cast %59 : vector<16xf32> to vector<16x1xf32>
    %61 = arith.fptosi %60 : vector<16x1xf32> to vector<16x1xi32>
    %c2_i32 = arith.constant 2 : i32
    %62 = vector.broadcast %c2_i32 : i32 to vector<16x4xi32>
    %63 = arith.cmpi eq, %15, %62 : vector<16x4xi32>
    %64 = vector.shape_cast %61 : vector<16x1xi32> to vector<16x1xi32>
    %65 = vector.broadcast %64 : vector<16x1xi32> to vector<16x4xi32>
    %66 = arith.select %63, %65, %48 : vector<16x4xi1>, vector<16x4xi32>
    %67 = vector.broadcast %61 : vector<16x1xi32> to vector<16x16xi32>
    %68 = arith.cmpi eq, %13, %67 : vector<16x16xi32>
    %cst_19 = arith.constant 0xFF800000 : f32
    %69 = vector.broadcast %cst_19 : f32 to vector<16x16xf32>
    %70 = arith.select %68, %69, %52 : vector<16x16xi1>, vector<16x16xf32>
    %cst_20 = arith.constant dense<0xFF800000> : vector<16xf32>
    %71 = vector.multi_reduction <maximumf>, %70, %cst_20 [1] : vector<16x16xf32> to vector<16xf32>
    %72 = vector.shape_cast %71 : vector<16xf32> to vector<16x1xf32>
    %73 = vector.broadcast %72 : vector<16x1xf32> to vector<16x16xf32>
    %74 = arith.cmpf oeq, %70, %73 : vector<16x16xf32>
    %cst_21 = arith.constant 1.600000e+01 : f32
    %75 = vector.broadcast %cst_21 : f32 to vector<16x16xf32>
    %76 = arith.select %74, %14, %75 : vector<16x16xi1>, vector<16x16xf32>
    %cst_22 = arith.constant dense<0x7F800000> : vector<16xf32>
    %77 = vector.multi_reduction <minimumf>, %76, %cst_22 [1] : vector<16x16xf32> to vector<16xf32>
    %78 = vector.shape_cast %77 : vector<16xf32> to vector<16x1xf32>
    %79 = arith.fptosi %78 : vector<16x1xf32> to vector<16x1xi32>
    %c3_i32 = arith.constant 3 : i32
    %80 = vector.broadcast %c3_i32 : i32 to vector<16x4xi32>
    %81 = arith.cmpi eq, %15, %80 : vector<16x4xi32>
    %82 = vector.shape_cast %79 : vector<16x1xi32> to vector<16x1xi32>
    %83 = vector.broadcast %82 : vector<16x1xi32> to vector<16x4xi32>
    %84 = arith.select %81, %83, %66 : vector<16x4xi1>, vector<16x4xi32>
    %c0_23 = arith.constant 0 : index
    %c0_24 = arith.constant 0 : index
    %c0_25 = arith.constant 0 : index
    %85 = vector.load %arg4[%c0_23, %c0_24, %c0_25] : memref<1x16x4xi32, #tpu.memory_space<vmem>>, vector<1x16x4xi32>
    %86 = vector.shape_cast %85 : vector<1x16x4xi32> to vector<16x4xi32>
    %87 = vector.shape_cast %84 : vector<16x4xi32> to vector<1x16x4xi32>
    tpu.vector_store %arg4[%c0_23, %c0_24, %c0_25], %87 {strides = array<i32>} : memref<1x16x4xi32, #tpu.memory_space<vmem>>, vector<1x16x4xi32>,
    return
  }
  func.func @transform_0(%arg0: i32, %arg1: i32) -> (i32, i32, i32) {
    %c0_i32 = arith.constant 0 : i32
    %c0_i32_0 = arith.constant 0 : i32
    return %arg0, %arg1, %c0_i32 : i32, i32, i32
  }
  func.func @transform_1(%arg0: i32, %arg1: i32) -> (i32, i32, i32) {
    %c0_i32 = arith.constant 0 : i32
    %c0_i32_0 = arith.constant 0 : i32
    %c0_i32_1 = arith.constant 0 : i32
    return %arg0, %c0_i32, %c0_i32_0 : i32, i32, i32
  }
  func.func @transform_2(%arg0: i32, %arg1: i32) -> (i32, i32, i32) {
    %c0_i32 = arith.constant 0 : i32
    %c0_i32_0 = arith.constant 0 : i32
    return %arg0, %arg1, %c0_i32 : i32, i32, i32
  }
}

module attributes {stable_mosaic.version = 11 : i64} {
  func.func @_point_transform_kernel(%arg0: i32, %arg1: memref<32x128xbf16, #tpu.memory_space<vmem>>, %arg2: memref<128x512xbf16, #tpu.memory_space<vmem>>, %arg3: memref<32x512xbf16, #tpu.memory_space<vmem>>) attributes {dimension_semantics = [#tpu.dimension_semantics<parallel>], iteration_bounds = array<i64: 1>, scalar_prefetch = 0 : i64, scratch_operands = 0 : i64, tpu.core_type = #tpu.core_type<tc>, window_params = [{transform_indices = @transform_0, window_bounds = array<i64: 32, 128>}, {pipeline_mode = #tpu.pipeline_mode<synchronous>, transform_indices = @transform_1, window_bounds = array<i64: 128, 512>}, {transform_indices = @transform_2, window_bounds = array<i64: 32, 512>}]} {
    %c0 = arith.constant 0 : index
    %c0_0 = arith.constant 0 : index
    %0 = vector.load %arg1[%c0, %c0_0] : memref<32x128xbf16, #tpu.memory_space<vmem>>, vector<32x128xbf16>
    %c0_1 = arith.constant 0 : index
    %c0_2 = arith.constant 0 : index
    %1 = vector.load %arg2[%c0_1, %c0_2] : memref<128x512xbf16, #tpu.memory_space<vmem>>, vector<128x512xbf16>
    %cst = arith.constant dense<0.000000e+00> : vector<32x512xf32>
    %2 = tpu.matmul %0, %1, %cst {dimension_numbers = #tpu.dot_dimension_numbers<[1], [0], [0], [1], [0, 0, 1, 1], [], []>} : vector<32x128xbf16>, vector<128x512xbf16>, vector<32x512xf32> -> vector<32x512xf32>
    %3 = arith.truncf %2 : vector<32x512xf32> to vector<32x512xbf16>
    %c0_3 = arith.constant 0 : index
    %c0_4 = arith.constant 0 : index
    %4 = vector.load %arg3[%c0_3, %c0_4] : memref<32x512xbf16, #tpu.memory_space<vmem>>, vector<32x512xbf16>
    tpu.vector_store %arg3[%c0_3, %c0_4], %3 {strides = array<i32>} : memref<32x512xbf16, #tpu.memory_space<vmem>>, vector<32x512xbf16>,
    return
  }
  func.func @transform_0(%arg0: i32) -> (i32, i32) {
    %c0_i32 = arith.constant 0 : i32
    %c0_i32_0 = arith.constant 0 : i32
    return %arg0, %c0_i32 : i32, i32
  }
  func.func @transform_1(%arg0: i32) -> (i32, i32) {
    %c0_i32 = arith.constant 0 : i32
    %c0_i32_0 = arith.constant 0 : i32
    %c0_i32_1 = arith.constant 0 : i32
    return %c0_i32, %c0_i32_0 : i32, i32
  }
  func.func @transform_2(%arg0: i32) -> (i32, i32) {
    %c0_i32 = arith.constant 0 : i32
    %c0_i32_0 = arith.constant 0 : i32
    return %arg0, %c0_i32 : i32, i32
  }
}

module attributes {stable_mosaic.version = 11 : i64} {
  func.func @_knn_kernel(%arg0: i32, %arg1: i32, %arg2: memref<1x16x128xbf16, #tpu.memory_space<vmem>>, %arg3: memref<1x128x16xbf16, #tpu.memory_space<vmem>>, %arg4: memref<1x16x4xi32, #tpu.memory_space<vmem>>) attributes {dimension_semantics = [#tpu.dimension_semantics<parallel>, #tpu.dimension_semantics<parallel>], iteration_bounds = array<i64: 2, 1>, scalar_prefetch = 0 : i64, scratch_operands = 0 : i64, tpu.core_type = #tpu.core_type<tc>, window_params = [{transform_indices = @transform_0, window_bounds = array<i64: 1, 16, 128>}, {transform_indices = @transform_1, window_bounds = array<i64: 1, 128, 16>}, {transform_indices = @transform_2, window_bounds = array<i64: 1, 16, 4>}]} {
    %c0 = arith.constant 0 : index
    %c0_0 = arith.constant 0 : index
    %c0_1 = arith.constant 0 : index
    %0 = vector.load %arg2[%c0, %c0_0, %c0_1] : memref<1x16x128xbf16, #tpu.memory_space<vmem>>, vector<1x16x128xbf16>
    %1 = vector.shape_cast %0 : vector<1x16x128xbf16> to vector<16x128xbf16>
    %c0_2 = arith.constant 0 : index
    %c0_3 = arith.constant 0 : index
    %c0_4 = arith.constant 0 : index
    %2 = vector.load %arg3[%c0_2, %c0_3, %c0_4] : memref<1x128x16xbf16, #tpu.memory_space<vmem>>, vector<1x128x16xbf16>
    %3 = vector.shape_cast %2 : vector<1x128x16xbf16> to vector<128x16xbf16>
    %cst = arith.constant dense<0.000000e+00> : vector<16x16xf32>
    %4 = tpu.matmul %1, %3, %cst {dimension_numbers = #tpu.dot_dimension_numbers<[1], [0], [0], [1], [0, 0, 1, 1], [], []>} : vector<16x128xbf16>, vector<128x16xbf16>, vector<16x16xf32> -> vector<16x16xf32>
    %5 = arith.extf %3 : vector<128x16xbf16> to vector<128x16xf32>
    %6 = arith.mulf %5, %5 : vector<128x16xf32>
    %cst_5 = arith.constant dense<0.000000e+00> : vector<16xf32>
    %7 = vector.multi_reduction <add>, %6, %cst_5 [0] : vector<128x16xf32> to vector<16xf32>
    %8 = vector.shape_cast %7 : vector<16xf32> to vector<1x16xf32>
    %cst_6 = arith.constant 2.000000e+00 : f32
    %9 = vector.broadcast %cst_6 : f32 to vector<16x16xf32>
    %10 = arith.mulf %9, %4 : vector<16x16xf32>
    %11 = vector.broadcast %8 : vector<1x16xf32> to vector<16x16xf32>
    %12 = arith.subf %10, %11 : vector<16x16xf32>
    %13 = tpu.iota {dimensions = array<i32: 1>} : vector<16x16xi32>
    %14 = arith.sitofp %13 : vector<16x16xi32> to vector<16x16xf32>
    %15 = tpu.iota {dimensions = array<i32: 1>} : vector<16x4xi32>
    %c0_i32 = arith.constant 0 : i32
    %16 = vector.broadcast %c0_i32 : i32 to vector<16x4xi32>
    %cst_7 = arith.constant dense<0xFF800000> : vector<16xf32>
    %17 = vector.multi_reduction <maximumf>, %12, %cst_7 [1] : vector<16x16xf32> to vector<16xf32>
    %18 = vector.shape_cast %17 : vector<16xf32> to vector<16x1xf32>
    %19 = vector.broadcast %18 : vector<16x1xf32> to vector<16x16xf32>
    %20 = arith.cmpf oeq, %12, %19 : vector<16x16xf32>
    %cst_8 = arith.constant 1.600000e+01 : f32
    %21 = vector.broadcast %cst_8 : f32 to vector<16x16xf32>
    %22 = arith.select %20, %14, %21 : vector<16x16xi1>, vector<16x16xf32>
    %cst_9 = arith.constant dense<0x7F800000> : vector<16xf32>
    %23 = vector.multi_reduction <minimumf>, %22, %cst_9 [1] : vector<16x16xf32> to vector<16xf32>
    %24 = vector.shape_cast %23 : vector<16xf32> to vector<16x1xf32>
    %25 = arith.fptosi %24 : vector<16x1xf32> to vector<16x1xi32>
    %c0_i32_10 = arith.constant 0 : i32
    %26 = vector.broadcast %c0_i32_10 : i32 to vector<16x4xi32>
    %27 = arith.cmpi eq, %15, %26 : vector<16x4xi32>
    %28 = vector.shape_cast %25 : vector<16x1xi32> to vector<16x1xi32>
    %29 = vector.broadcast %28 : vector<16x1xi32> to vector<16x4xi32>
    %30 = arith.select %27, %29, %16 : vector<16x4xi1>, vector<16x4xi32>
    %31 = vector.broadcast %25 : vector<16x1xi32> to vector<16x16xi32>
    %32 = arith.cmpi eq, %13, %31 : vector<16x16xi32>
    %cst_11 = arith.constant 0xFF800000 : f32
    %33 = vector.broadcast %cst_11 : f32 to vector<16x16xf32>
    %34 = arith.select %32, %33, %12 : vector<16x16xi1>, vector<16x16xf32>
    %cst_12 = arith.constant dense<0xFF800000> : vector<16xf32>
    %35 = vector.multi_reduction <maximumf>, %34, %cst_12 [1] : vector<16x16xf32> to vector<16xf32>
    %36 = vector.shape_cast %35 : vector<16xf32> to vector<16x1xf32>
    %37 = vector.broadcast %36 : vector<16x1xf32> to vector<16x16xf32>
    %38 = arith.cmpf oeq, %34, %37 : vector<16x16xf32>
    %cst_13 = arith.constant 1.600000e+01 : f32
    %39 = vector.broadcast %cst_13 : f32 to vector<16x16xf32>
    %40 = arith.select %38, %14, %39 : vector<16x16xi1>, vector<16x16xf32>
    %cst_14 = arith.constant dense<0x7F800000> : vector<16xf32>
    %41 = vector.multi_reduction <minimumf>, %40, %cst_14 [1] : vector<16x16xf32> to vector<16xf32>
    %42 = vector.shape_cast %41 : vector<16xf32> to vector<16x1xf32>
    %43 = arith.fptosi %42 : vector<16x1xf32> to vector<16x1xi32>
    %c1_i32 = arith.constant 1 : i32
    %44 = vector.broadcast %c1_i32 : i32 to vector<16x4xi32>
    %45 = arith.cmpi eq, %15, %44 : vector<16x4xi32>
    %46 = vector.shape_cast %43 : vector<16x1xi32> to vector<16x1xi32>
    %47 = vector.broadcast %46 : vector<16x1xi32> to vector<16x4xi32>
    %48 = arith.select %45, %47, %30 : vector<16x4xi1>, vector<16x4xi32>
    %49 = vector.broadcast %43 : vector<16x1xi32> to vector<16x16xi32>
    %50 = arith.cmpi eq, %13, %49 : vector<16x16xi32>
    %cst_15 = arith.constant 0xFF800000 : f32
    %51 = vector.broadcast %cst_15 : f32 to vector<16x16xf32>
    %52 = arith.select %50, %51, %34 : vector<16x16xi1>, vector<16x16xf32>
    %cst_16 = arith.constant dense<0xFF800000> : vector<16xf32>
    %53 = vector.multi_reduction <maximumf>, %52, %cst_16 [1] : vector<16x16xf32> to vector<16xf32>
    %54 = vector.shape_cast %53 : vector<16xf32> to vector<16x1xf32>
    %55 = vector.broadcast %54 : vector<16x1xf32> to vector<16x16xf32>
    %56 = arith.cmpf oeq, %52, %55 : vector<16x16xf32>
    %cst_17 = arith.constant 1.600000e+01 : f32
    %57 = vector.broadcast %cst_17 : f32 to vector<16x16xf32>
    %58 = arith.select %56, %14, %57 : vector<16x16xi1>, vector<16x16xf32>
    %cst_18 = arith.constant dense<0x7F800000> : vector<16xf32>
    %59 = vector.multi_reduction <minimumf>, %58, %cst_18 [1] : vector<16x16xf32> to vector<16xf32>
    %60 = vector.shape_cast %59 : vector<16xf32> to vector<16x1xf32>
    %61 = arith.fptosi %60 : vector<16x1xf32> to vector<16x1xi32>
    %c2_i32 = arith.constant 2 : i32
    %62 = vector.broadcast %c2_i32 : i32 to vector<16x4xi32>
    %63 = arith.cmpi eq, %15, %62 : vector<16x4xi32>
    %64 = vector.shape_cast %61 : vector<16x1xi32> to vector<16x1xi32>
    %65 = vector.broadcast %64 : vector<16x1xi32> to vector<16x4xi32>
    %66 = arith.select %63, %65, %48 : vector<16x4xi1>, vector<16x4xi32>
    %67 = vector.broadcast %61 : vector<16x1xi32> to vector<16x16xi32>
    %68 = arith.cmpi eq, %13, %67 : vector<16x16xi32>
    %cst_19 = arith.constant 0xFF800000 : f32
    %69 = vector.broadcast %cst_19 : f32 to vector<16x16xf32>
    %70 = arith.select %68, %69, %52 : vector<16x16xi1>, vector<16x16xf32>
    %cst_20 = arith.constant dense<0xFF800000> : vector<16xf32>
    %71 = vector.multi_reduction <maximumf>, %70, %cst_20 [1] : vector<16x16xf32> to vector<16xf32>
    %72 = vector.shape_cast %71 : vector<16xf32> to vector<16x1xf32>
    %73 = vector.broadcast %72 : vector<16x1xf32> to vector<16x16xf32>
    %74 = arith.cmpf oeq, %70, %73 : vector<16x16xf32>
    %cst_21 = arith.constant 1.600000e+01 : f32
    %75 = vector.broadcast %cst_21 : f32 to vector<16x16xf32>
    %76 = arith.select %74, %14, %75 : vector<16x16xi1>, vector<16x16xf32>
    %cst_22 = arith.constant dense<0x7F800000> : vector<16xf32>
    %77 = vector.multi_reduction <minimumf>, %76, %cst_22 [1] : vector<16x16xf32> to vector<16xf32>
    %78 = vector.shape_cast %77 : vector<16xf32> to vector<16x1xf32>
    %79 = arith.fptosi %78 : vector<16x1xf32> to vector<16x1xi32>
    %c3_i32 = arith.constant 3 : i32
    %80 = vector.broadcast %c3_i32 : i32 to vector<16x4xi32>
    %81 = arith.cmpi eq, %15, %80 : vector<16x4xi32>
    %82 = vector.shape_cast %79 : vector<16x1xi32> to vector<16x1xi32>
    %83 = vector.broadcast %82 : vector<16x1xi32> to vector<16x4xi32>
    %84 = arith.select %81, %83, %66 : vector<16x4xi1>, vector<16x4xi32>
    %c0_23 = arith.constant 0 : index
    %c0_24 = arith.constant 0 : index
    %c0_25 = arith.constant 0 : index
    %85 = vector.load %arg4[%c0_23, %c0_24, %c0_25] : memref<1x16x4xi32, #tpu.memory_space<vmem>>, vector<1x16x4xi32>
    %86 = vector.shape_cast %85 : vector<1x16x4xi32> to vector<16x4xi32>
    %87 = vector.shape_cast %84 : vector<16x4xi32> to vector<1x16x4xi32>
    tpu.vector_store %arg4[%c0_23, %c0_24, %c0_25], %87 {strides = array<i32>} : memref<1x16x4xi32, #tpu.memory_space<vmem>>, vector<1x16x4xi32>,
    return
  }
  func.func @transform_0(%arg0: i32, %arg1: i32) -> (i32, i32, i32) {
    %c0_i32 = arith.constant 0 : i32
    %c0_i32_0 = arith.constant 0 : i32
    return %arg0, %arg1, %c0_i32 : i32, i32, i32
  }
  func.func @transform_1(%arg0: i32, %arg1: i32) -> (i32, i32, i32) {
    %c0_i32 = arith.constant 0 : i32
    %c0_i32_0 = arith.constant 0 : i32
    %c0_i32_1 = arith.constant 0 : i32
    return %arg0, %c0_i32, %c0_i32_0 : i32, i32, i32
  }
  func.func @transform_2(%arg0: i32, %arg1: i32) -> (i32, i32, i32) {
    %c0_i32 = arith.constant 0 : i32
    %c0_i32_0 = arith.constant 0 : i32
    return %arg0, %arg1, %c0_i32 : i32, i32, i32
  }
}

module attributes {stable_mosaic.version = 11 : i64} {
  func.func @_conv5_pool_kernel(%arg0: i32, %arg1: i32, %arg2: memref<1x16x64xbf16, #tpu.memory_space<vmem>>, %arg3: memref<1x16x64xbf16, #tpu.memory_space<vmem>>, %arg4: memref<1x16x128xbf16, #tpu.memory_space<vmem>>, %arg5: memref<1x16x256xbf16, #tpu.memory_space<vmem>>, %arg6: memref<512x64xbf16, #tpu.memory_space<vmem>>, %arg7: memref<1x64xf32, #tpu.memory_space<vmem>>, %arg8: memref<1x1x64xf32, #tpu.memory_space<vmem>>, %arg9: memref<1x1x64xf32, #tpu.memory_space<vmem>>) attributes {dimension_semantics = [#tpu.dimension_semantics<parallel>, #tpu.dimension_semantics<arbitrary>], iteration_bounds = array<i64: 2, 1>, scalar_prefetch = 0 : i64, scratch_operands = 0 : i64, tpu.core_type = #tpu.core_type<tc>, window_params = [{transform_indices = @transform_0, window_bounds = array<i64: 1, 16, 64>}, {transform_indices = @transform_1, window_bounds = array<i64: 1, 16, 64>}, {transform_indices = @transform_2, window_bounds = array<i64: 1, 16, 128>}, {transform_indices = @transform_3, window_bounds = array<i64: 1, 16, 256>}, {pipeline_mode = #tpu.pipeline_mode<synchronous>, transform_indices = @transform_4, window_bounds = array<i64: 512, 64>}, {pipeline_mode = #tpu.pipeline_mode<synchronous>, transform_indices = @transform_5, window_bounds = array<i64: 1, 64>}, {transform_indices = @transform_6, window_bounds = array<i64: 1, 1, 64>}, {transform_indices = @transform_7, window_bounds = array<i64: 1, 1, 64>}]} {
    %c0 = arith.constant 0 : index
    %c0_0 = arith.constant 0 : index
    %c0_1 = arith.constant 0 : index
    %0 = vector.load %arg2[%c0, %c0_0, %c0_1] : memref<1x16x64xbf16, #tpu.memory_space<vmem>>, vector<1x16x64xbf16>
    %1 = vector.shape_cast %0 : vector<1x16x64xbf16> to vector<16x64xbf16>
    %c0_2 = arith.constant 0 : index
    %c0_3 = arith.constant 0 : index
    %2 = vector.load %arg6[%c0_2, %c0_3] : memref<512x64xbf16, #tpu.memory_space<vmem>>, vector<64x64xbf16>
    %cst = arith.constant dense<0.000000e+00> : vector<16x64xf32>
    %3 = tpu.matmul %1, %2, %cst {dimension_numbers = #tpu.dot_dimension_numbers<[1], [0], [0], [1], [0, 0, 1, 1], [], []>} : vector<16x64xbf16>, vector<64x64xbf16>, vector<16x64xf32> -> vector<16x64xf32>
    %c0_4 = arith.constant 0 : index
    %c0_5 = arith.constant 0 : index
    %c0_6 = arith.constant 0 : index
    %4 = vector.load %arg3[%c0_4, %c0_5, %c0_6] : memref<1x16x64xbf16, #tpu.memory_space<vmem>>, vector<1x16x64xbf16>
    %5 = vector.shape_cast %4 : vector<1x16x64xbf16> to vector<16x64xbf16>
    %c64 = arith.constant 64 : index
    %c0_7 = arith.constant 0 : index
    %6 = vector.load %arg6[%c64, %c0_7] : memref<512x64xbf16, #tpu.memory_space<vmem>>, vector<64x64xbf16>
    %cst_8 = arith.constant dense<0.000000e+00> : vector<16x64xf32>
    %7 = tpu.matmul %5, %6, %cst_8 {dimension_numbers = #tpu.dot_dimension_numbers<[1], [0], [0], [1], [0, 0, 1, 1], [], []>} : vector<16x64xbf16>, vector<64x64xbf16>, vector<16x64xf32> -> vector<16x64xf32>
    %8 = arith.addf %3, %7 : vector<16x64xf32>
    %c0_9 = arith.constant 0 : index
    %c0_10 = arith.constant 0 : index
    %c0_11 = arith.constant 0 : index
    %9 = vector.load %arg4[%c0_9, %c0_10, %c0_11] : memref<1x16x128xbf16, #tpu.memory_space<vmem>>, vector<1x16x128xbf16>
    %10 = vector.shape_cast %9 : vector<1x16x128xbf16> to vector<16x128xbf16>
    %c128 = arith.constant 128 : index
    %c0_12 = arith.constant 0 : index
    %11 = vector.load %arg6[%c128, %c0_12] : memref<512x64xbf16, #tpu.memory_space<vmem>>, vector<128x64xbf16>
    %cst_13 = arith.constant dense<0.000000e+00> : vector<16x64xf32>
    %12 = tpu.matmul %10, %11, %cst_13 {dimension_numbers = #tpu.dot_dimension_numbers<[1], [0], [0], [1], [0, 0, 1, 1], [], []>} : vector<16x128xbf16>, vector<128x64xbf16>, vector<16x64xf32> -> vector<16x64xf32>
    %13 = arith.addf %8, %12 : vector<16x64xf32>
    %c0_14 = arith.constant 0 : index
    %c0_15 = arith.constant 0 : index
    %c0_16 = arith.constant 0 : index
    %14 = vector.load %arg5[%c0_14, %c0_15, %c0_16] : memref<1x16x256xbf16, #tpu.memory_space<vmem>>, vector<1x16x256xbf16>
    %15 = vector.shape_cast %14 : vector<1x16x256xbf16> to vector<16x256xbf16>
    %c256 = arith.constant 256 : index
    %c0_17 = arith.constant 0 : index
    %16 = vector.load %arg6[%c256, %c0_17] : memref<512x64xbf16, #tpu.memory_space<vmem>>, vector<256x64xbf16>
    %cst_18 = arith.constant dense<0.000000e+00> : vector<16x64xf32>
    %17 = tpu.matmul %15, %16, %cst_18 {dimension_numbers = #tpu.dot_dimension_numbers<[1], [0], [0], [1], [0, 0, 1, 1], [], []>} : vector<16x256xbf16>, vector<256x64xbf16>, vector<16x64xf32> -> vector<16x64xf32>
    %18 = arith.addf %13, %17 : vector<16x64xf32>
    %c0_19 = arith.constant 0 : index
    %c0_20 = arith.constant 0 : index
    %19 = vector.load %arg7[%c0_19, %c0_20] : memref<1x64xf32, #tpu.memory_space<vmem>>, vector<1x64xf32>
    %20 = vector.broadcast %19 : vector<1x64xf32> to vector<16x64xf32>
    %21 = arith.addf %18, %20 : vector<16x64xf32>
    %cst_21 = arith.constant 0.000000e+00 : f32
    %22 = vector.broadcast %cst_21 : f32 to vector<16x64xf32>
    %23 = arith.cmpf oge, %21, %22 : vector<16x64xf32>
    %cst_22 = arith.constant 2.000000e-01 : f32
    %24 = vector.broadcast %cst_22 : f32 to vector<16x64xf32>
    %25 = arith.mulf %24, %21 : vector<16x64xf32>
    %26 = arith.select %23, %21, %25 : vector<16x64xi1>, vector<16x64xf32>
    %cst_23 = arith.constant dense<0xFF800000> : vector<64xf32>
    %27 = vector.multi_reduction <maximumf>, %26, %cst_23 [0] : vector<16x64xf32> to vector<64xf32>
    %28 = vector.shape_cast %27 : vector<64xf32> to vector<1x64xf32>
    %cst_24 = arith.constant dense<0.000000e+00> : vector<64xf32>
    %29 = vector.multi_reduction <add>, %26, %cst_24 [0] : vector<16x64xf32> to vector<64xf32>
    %30 = vector.shape_cast %29 : vector<64xf32> to vector<1x64xf32>
    %c0_i32 = arith.constant 0 : i32
    %31 = arith.cmpi eq, %arg1, %c0_i32 : i32
    %32 = arith.extui %31 : i1 to i32
    %c0_i32_25 = arith.constant 0 : i32
    %33 = arith.cmpi ne, %32, %c0_i32_25 : i32
    scf.if %33 {
      %c0_30 = arith.constant 0 : index
      %c0_31 = arith.constant 0 : index
      %c0_32 = arith.constant 0 : index
      %40 = vector.load %arg8[%c0_30, %c0_31, %c0_32] : memref<1x1x64xf32, #tpu.memory_space<vmem>>, vector<1x1x64xf32>
      %41 = vector.shape_cast %40 : vector<1x1x64xf32> to vector<1x64xf32>
      %42 = vector.shape_cast %28 : vector<1x64xf32> to vector<1x1x64xf32>
      tpu.vector_store %arg8[%c0_30, %c0_31, %c0_32], %42 {strides = array<i32>} : memref<1x1x64xf32, #tpu.memory_space<vmem>>, vector<1x1x64xf32>,
      %c0_33 = arith.constant 0 : index
      %c0_34 = arith.constant 0 : index
      %c0_35 = arith.constant 0 : index
      %43 = vector.load %arg9[%c0_33, %c0_34, %c0_35] : memref<1x1x64xf32, #tpu.memory_space<vmem>>, vector<1x1x64xf32>
      %44 = vector.shape_cast %43 : vector<1x1x64xf32> to vector<1x64xf32>
      %45 = vector.shape_cast %30 : vector<1x64xf32> to vector<1x1x64xf32>
      tpu.vector_store %arg9[%c0_33, %c0_34, %c0_35], %45 {strides = array<i32>} : memref<1x1x64xf32, #tpu.memory_space<vmem>>, vector<1x1x64xf32>,
    } else {
    }
    %c0_i32_26 = arith.constant 0 : i32
    %34 = arith.cmpi sgt, %arg1, %c0_i32_26 : i32
    %35 = arith.extui %34 : i1 to i32
    %c0_i32_27 = arith.constant 0 : i32
    %36 = arith.cmpi ne, %35, %c0_i32_27 : i32
    scf.if %36 {
      %c0_30 = arith.constant 0 : index
      %c0_31 = arith.constant 0 : index
      %c0_32 = arith.constant 0 : index
      %40 = vector.load %arg8[%c0_30, %c0_31, %c0_32] : memref<1x1x64xf32, #tpu.memory_space<vmem>>, vector<1x1x64xf32>
      %41 = vector.shape_cast %40 : vector<1x1x64xf32> to vector<1x64xf32>
      %42 = arith.maximumf %41, %28 : vector<1x64xf32>
      %c0_33 = arith.constant 0 : index
      %c0_34 = arith.constant 0 : index
      %c0_35 = arith.constant 0 : index
      %43 = vector.load %arg8[%c0_33, %c0_34, %c0_35] : memref<1x1x64xf32, #tpu.memory_space<vmem>>, vector<1x1x64xf32>
      %44 = vector.shape_cast %43 : vector<1x1x64xf32> to vector<1x64xf32>
      %45 = vector.shape_cast %42 : vector<1x64xf32> to vector<1x1x64xf32>
      tpu.vector_store %arg8[%c0_33, %c0_34, %c0_35], %45 {strides = array<i32>} : memref<1x1x64xf32, #tpu.memory_space<vmem>>, vector<1x1x64xf32>,
      %c0_36 = arith.constant 0 : index
      %c0_37 = arith.constant 0 : index
      %c0_38 = arith.constant 0 : index
      %46 = vector.load %arg9[%c0_36, %c0_37, %c0_38] : memref<1x1x64xf32, #tpu.memory_space<vmem>>, vector<1x1x64xf32>
      %47 = vector.shape_cast %46 : vector<1x1x64xf32> to vector<1x64xf32>
      %48 = arith.addf %47, %30 : vector<1x64xf32>
      %c0_39 = arith.constant 0 : index
      %c0_40 = arith.constant 0 : index
      %c0_41 = arith.constant 0 : index
      %49 = vector.load %arg9[%c0_39, %c0_40, %c0_41] : memref<1x1x64xf32, #tpu.memory_space<vmem>>, vector<1x1x64xf32>
      %50 = vector.shape_cast %49 : vector<1x1x64xf32> to vector<1x64xf32>
      %51 = vector.shape_cast %48 : vector<1x64xf32> to vector<1x1x64xf32>
      tpu.vector_store %arg9[%c0_39, %c0_40, %c0_41], %51 {strides = array<i32>} : memref<1x1x64xf32, #tpu.memory_space<vmem>>, vector<1x1x64xf32>,
    } else {
    }
    %c0_i32_28 = arith.constant 0 : i32
    %37 = arith.cmpi eq, %arg1, %c0_i32_28 : i32
    %38 = arith.extui %37 : i1 to i32
    %c0_i32_29 = arith.constant 0 : i32
    %39 = arith.cmpi ne, %38, %c0_i32_29 : i32
    scf.if %39 {
      %c0_30 = arith.constant 0 : index
      %c0_31 = arith.constant 0 : index
      %c0_32 = arith.constant 0 : index
      %40 = vector.load %arg9[%c0_30, %c0_31, %c0_32] : memref<1x1x64xf32, #tpu.memory_space<vmem>>, vector<1x1x64xf32>
      %41 = vector.shape_cast %40 : vector<1x1x64xf32> to vector<1x64xf32>
      %cst_33 = arith.constant 6.250000e-02 : f32
      %42 = vector.broadcast %cst_33 : f32 to vector<1x64xf32>
      %43 = arith.mulf %41, %42 : vector<1x64xf32>
      %c0_34 = arith.constant 0 : index
      %c0_35 = arith.constant 0 : index
      %c0_36 = arith.constant 0 : index
      %44 = vector.load %arg9[%c0_34, %c0_35, %c0_36] : memref<1x1x64xf32, #tpu.memory_space<vmem>>, vector<1x1x64xf32>
      %45 = vector.shape_cast %44 : vector<1x1x64xf32> to vector<1x64xf32>
      %46 = vector.shape_cast %43 : vector<1x64xf32> to vector<1x1x64xf32>
      tpu.vector_store %arg9[%c0_34, %c0_35, %c0_36], %46 {strides = array<i32>} : memref<1x1x64xf32, #tpu.memory_space<vmem>>, vector<1x1x64xf32>,
    } else {
    }
    return
  }
  func.func @transform_0(%arg0: i32, %arg1: i32) -> (i32, i32, i32) {
    %c0_i32 = arith.constant 0 : i32
    %c0_i32_0 = arith.constant 0 : i32
    return %arg0, %arg1, %c0_i32 : i32, i32, i32
  }
  func.func @transform_1(%arg0: i32, %arg1: i32) -> (i32, i32, i32) {
    %c0_i32 = arith.constant 0 : i32
    %c0_i32_0 = arith.constant 0 : i32
    return %arg0, %arg1, %c0_i32 : i32, i32, i32
  }
  func.func @transform_2(%arg0: i32, %arg1: i32) -> (i32, i32, i32) {
    %c0_i32 = arith.constant 0 : i32
    %c0_i32_0 = arith.constant 0 : i32
    return %arg0, %arg1, %c0_i32 : i32, i32, i32
  }
  func.func @transform_3(%arg0: i32, %arg1: i32) -> (i32, i32, i32) {
    %c0_i32 = arith.constant 0 : i32
    %c0_i32_0 = arith.constant 0 : i32
    return %arg0, %arg1, %c0_i32 : i32, i32, i32
  }
  func.func @transform_4(%arg0: i32, %arg1: i32) -> (i32, i32) {
    %c0_i32 = arith.constant 0 : i32
    %c0_i32_0 = arith.constant 0 : i32
    %c0_i32_1 = arith.constant 0 : i32
    return %c0_i32, %c0_i32_0 : i32, i32
  }
  func.func @transform_5(%arg0: i32, %arg1: i32) -> (i32, i32) {
    %c0_i32 = arith.constant 0 : i32
    %c0_i32_0 = arith.constant 0 : i32
    %c0_i32_1 = arith.constant 0 : i32
    return %c0_i32, %c0_i32_0 : i32, i32
  }
  func.func @transform_6(%arg0: i32, %arg1: i32) -> (i32, i32, i32) {
    %c0_i32 = arith.constant 0 : i32
    %c0_i32_0 = arith.constant 0 : i32
    %c0_i32_1 = arith.constant 0 : i32
    return %arg0, %c0_i32, %c0_i32_0 : i32, i32, i32
  }
  func.func @transform_7(%arg0: i32, %arg1: i32) -> (i32, i32, i32) {
    %c0_i32 = arith.constant 0 : i32
    %c0_i32_0 = arith.constant 0 : i32
    %c0_i32_1 = arith.constant 0 : i32
    return %arg0, %c0_i32, %c0_i32_0 : i32, i32, i32
  }
}

module attributes {stable_mosaic.version = 11 : i64} {
  func.func @_head_kernel(%arg0: i32, %arg1: memref<2x128xf32, #tpu.memory_space<vmem>>, %arg2: memref<128x512xf32, #tpu.memory_space<vmem>>, %arg3: memref<1x512xf32, #tpu.memory_space<vmem>>, %arg4: memref<512x256xf32, #tpu.memory_space<vmem>>, %arg5: memref<1x256xf32, #tpu.memory_space<vmem>>, %arg6: memref<256x40xf32, #tpu.memory_space<vmem>>, %arg7: memref<1x40xf32, #tpu.memory_space<vmem>>, %arg8: memref<2x40xf32, #tpu.memory_space<vmem>>) attributes {dimension_semantics = [#tpu.dimension_semantics<arbitrary>], iteration_bounds = array<i64: 1>, scalar_prefetch = 0 : i64, scratch_operands = 0 : i64, tpu.core_type = #tpu.core_type<tc>, window_params = [{pipeline_mode = #tpu.pipeline_mode<synchronous>, transform_indices = @transform_0, window_bounds = array<i64: 2, 128>}, {pipeline_mode = #tpu.pipeline_mode<synchronous>, transform_indices = @transform_1, window_bounds = array<i64: 128, 512>}, {pipeline_mode = #tpu.pipeline_mode<synchronous>, transform_indices = @transform_2, window_bounds = array<i64: 1, 512>}, {pipeline_mode = #tpu.pipeline_mode<synchronous>, transform_indices = @transform_3, window_bounds = array<i64: 512, 256>}, {pipeline_mode = #tpu.pipeline_mode<synchronous>, transform_indices = @transform_4, window_bounds = array<i64: 1, 256>}, {pipeline_mode = #tpu.pipeline_mode<synchronous>, transform_indices = @transform_5, window_bounds = array<i64: 256, 40>}, {pipeline_mode = #tpu.pipeline_mode<synchronous>, transform_indices = @transform_6, window_bounds = array<i64: 1, 40>}, {pipeline_mode = #tpu.pipeline_mode<synchronous>, transform_indices = @transform_7, window_bounds = array<i64: 2, 40>}]} {
    %c0 = arith.constant 0 : index
    %c0_0 = arith.constant 0 : index
    %0 = vector.load %arg1[%c0, %c0_0] : memref<2x128xf32, #tpu.memory_space<vmem>>, vector<2x128xf32>
    %c0_1 = arith.constant 0 : index
    %c0_2 = arith.constant 0 : index
    %1 = vector.load %arg2[%c0_1, %c0_2] : memref<128x512xf32, #tpu.memory_space<vmem>>, vector<128x512xf32>
    %cst = arith.constant dense<0.000000e+00> : vector<2x512xf32>
    %2 = tpu.matmul %0, %1, %cst {dimension_numbers = #tpu.dot_dimension_numbers<[1], [0], [0], [1], [0, 0, 1, 1], [], []>} : vector<2x128xf32>, vector<128x512xf32>, vector<2x512xf32> -> vector<2x512xf32>
    %c0_3 = arith.constant 0 : index
    %c0_4 = arith.constant 0 : index
    %3 = vector.load %arg3[%c0_3, %c0_4] : memref<1x512xf32, #tpu.memory_space<vmem>>, vector<1x512xf32>
    %4 = vector.broadcast %3 : vector<1x512xf32> to vector<2x512xf32>
    %5 = arith.addf %2, %4 : vector<2x512xf32>
    %cst_5 = arith.constant 0.000000e+00 : f32
    %6 = vector.broadcast %cst_5 : f32 to vector<2x512xf32>
    %7 = arith.cmpf oge, %5, %6 : vector<2x512xf32>
    %cst_6 = arith.constant 2.000000e-01 : f32
    %8 = vector.broadcast %cst_6 : f32 to vector<2x512xf32>
    %9 = arith.mulf %8, %5 : vector<2x512xf32>
    %10 = arith.select %7, %5, %9 : vector<2x512xi1>, vector<2x512xf32>
    %c0_7 = arith.constant 0 : index
    %c0_8 = arith.constant 0 : index
    %11 = vector.load %arg4[%c0_7, %c0_8] : memref<512x256xf32, #tpu.memory_space<vmem>>, vector<512x256xf32>
    %cst_9 = arith.constant dense<0.000000e+00> : vector<2x256xf32>
    %12 = tpu.matmul %10, %11, %cst_9 {dimension_numbers = #tpu.dot_dimension_numbers<[1], [0], [0], [1], [0, 0, 1, 1], [], []>} : vector<2x512xf32>, vector<512x256xf32>, vector<2x256xf32> -> vector<2x256xf32>
    %c0_10 = arith.constant 0 : index
    %c0_11 = arith.constant 0 : index
    %13 = vector.load %arg5[%c0_10, %c0_11] : memref<1x256xf32, #tpu.memory_space<vmem>>, vector<1x256xf32>
    %14 = vector.broadcast %13 : vector<1x256xf32> to vector<2x256xf32>
    %15 = arith.addf %12, %14 : vector<2x256xf32>
    %cst_12 = arith.constant 0.000000e+00 : f32
    %16 = vector.broadcast %cst_12 : f32 to vector<2x256xf32>
    %17 = arith.cmpf oge, %15, %16 : vector<2x256xf32>
    %cst_13 = arith.constant 2.000000e-01 : f32
    %18 = vector.broadcast %cst_13 : f32 to vector<2x256xf32>
    %19 = arith.mulf %18, %15 : vector<2x256xf32>
    %20 = arith.select %17, %15, %19 : vector<2x256xi1>, vector<2x256xf32>
    %c0_14 = arith.constant 0 : index
    %c0_15 = arith.constant 0 : index
    %21 = vector.load %arg6[%c0_14, %c0_15] : memref<256x40xf32, #tpu.memory_space<vmem>>, vector<256x40xf32>
    %cst_16 = arith.constant dense<0.000000e+00> : vector<2x40xf32>
    %22 = tpu.matmul %20, %21, %cst_16 {dimension_numbers = #tpu.dot_dimension_numbers<[1], [0], [0], [1], [0, 0, 1, 1], [], []>} : vector<2x256xf32>, vector<256x40xf32>, vector<2x40xf32> -> vector<2x40xf32>
    %c0_17 = arith.constant 0 : index
    %c0_18 = arith.constant 0 : index
    %23 = vector.load %arg7[%c0_17, %c0_18] : memref<1x40xf32, #tpu.memory_space<vmem>>, vector<1x40xf32>
    %24 = vector.broadcast %23 : vector<1x40xf32> to vector<2x40xf32>
    %25 = arith.addf %22, %24 : vector<2x40xf32>
    %c0_19 = arith.constant 0 : index
    %c0_20 = arith.constant 0 : index
    %26 = vector.load %arg8[%c0_19, %c0_20] : memref<2x40xf32, #tpu.memory_space<vmem>>, vector<2x40xf32>
    tpu.vector_store %arg8[%c0_19, %c0_20], %25 {strides = array<i32>} : memref<2x40xf32, #tpu.memory_space<vmem>>, vector<2x40xf32>,
    return
  }
  func.func @transform_0(%arg0: i32) -> (i32, i32) {
    %c0_i32 = arith.constant 0 : i32
    %c0_i32_0 = arith.constant 0 : i32
    %c0_i32_1 = arith.constant 0 : i32
    return %c0_i32, %c0_i32_0 : i32, i32
  }
  func.func @transform_1(%arg0: i32) -> (i32, i32) {
    %c0_i32 = arith.constant 0 : i32
    %c0_i32_0 = arith.constant 0 : i32
    %c0_i32_1 = arith.constant 0 : i32
    return %c0_i32, %c0_i32_0 : i32, i32
  }
  func.func @transform_2(%arg0: i32) -> (i32, i32) {
    %c0_i32 = arith.constant 0 : i32
    %c0_i32_0 = arith.constant 0 : i32
    %c0_i32_1 = arith.constant 0 : i32
    return %c0_i32, %c0_i32_0 : i32, i32
  }
  func.func @transform_3(%arg0: i32) -> (i32, i32) {
    %c0_i32 = arith.constant 0 : i32
    %c0_i32_0 = arith.constant 0 : i32
    %c0_i32_1 = arith.constant 0 : i32
    return %c0_i32, %c0_i32_0 : i32, i32
  }
  func.func @transform_4(%arg0: i32) -> (i32, i32) {
    %c0_i32 = arith.constant 0 : i32
    %c0_i32_0 = arith.constant 0 : i32
    %c0_i32_1 = arith.constant 0 : i32
    return %c0_i32, %c0_i32_0 : i32, i32
  }
  func.func @transform_5(%arg0: i32) -> (i32, i32) {
    %c0_i32 = arith.constant 0 : i32
    %c0_i32_0 = arith.constant 0 : i32
    %c0_i32_1 = arith.constant 0 : i32
    return %c0_i32, %c0_i32_0 : i32, i32
  }
  func.func @transform_6(%arg0: i32) -> (i32, i32) {
    %c0_i32 = arith.constant 0 : i32
    %c0_i32_0 = arith.constant 0 : i32
    %c0_i32_1 = arith.constant 0 : i32
    return %c0_i32, %c0_i32_0 : i32, i32
  }
  func.func @transform_7(%arg0: i32) -> (i32, i32) {
    %c0_i32 = arith.constant 0 : i32
    %c0_i32_0 = arith.constant 0 : i32
    %c0_i32_1 = arith.constant 0 : i32
    return %c0_i32, %c0_i32_0 : i32, i32
  }
}

</mosaic_0001>

<bundles_post_ra>
// kernel: dgcnn_forward.11
= control target key start
LH: loop header
LB: loop body
LE: loop exit
PB: predicated region body
PF: predicated region fallthrough
CT: control target
= control target key end

     0   :  { %vm34_vm0 = vcmask 1040384   ;;  %vm35_vm1 = vcmask 1041408   ;;  %vm27_vm2 = vcmask 23552   ;;  %v149_v1 = vmov 65535   ;;  %s180_s1 = inlined_call_operand.vmem [shape: bf16[3,128], index: 1, kind: input, shape index: {}]   ;;  %s181_s0 = inlined_call_operand.vmem [shape: bf16[32,3], index: 0, kind: input, shape index: {}]   ;;  %s182_s2 = inlined_call_operand.vmem [shape: bf16[32,128], index: 2, kind: output, shape index: {}]  }
   0x1   :  { %v16_v0 = vld [vmem:[%s180_s1] sm:$0x3]  ;;  %v36_v2 = vsel %vm34_vm0, 4294967295, %v149_v1  ;;  %v148_v6 = vld [vmem:[%s181_s0 + $0x8] sm:$0xff]  }
   0x2   :  { %v147_v3 = vld [vmem:[%s181_s0] sm:$0xff]   ;;  %v37_v4 = vsel %vm35_vm1, %v36_v2, 0 }
   0x3   :  { %v39_v5 = vand.u32 %v37_v4, %v16_v0  ;;  %142 = vmatprep.mubr.msk.bf16.mxu0 %vm27_vm2, %v147_v3 }
   0x5   :  { %140 = vmatprep.subr.bf16.mxu0 %v39_v5 }
   0x6   :  { %141 = vmatpush3.bf16.msra.mxu0 %v39_v5 }
   0x9   :  { %143 = vmatmul.mubr.msk.bf16.vlgmr.msra.gmra.mxu0 %vm27_vm2, %v148_v6 }
  0xc9   :  { %v144_v7 = vpop.f32.mrf.mxu0 }
  0xcb   :  { %v75_v8 = vpop.f32.mrf.mxu0 }
  0xcd   :  { %v145_v9 = vpop.f32.mrf.mxu0 }
  0xce   :  { %v134_v10 = vpack.c.bf16 %v145_v9, %v144_v7 }
  0xcf   :  { %v78_v11 = vpop.f32.mrf.mxu0 }
  0xd0   :  { %136 = vst [vmem:[%s182_s2 + $0x8] sm:$0xff] %v134_v10   ;;  %v129_v12 = vpack.c.bf16 %v78_v11, %v75_v8 }
  0xd2   :  { %130 = vst [vmem:[%s182_s2] sm:$0xff] %v129_v12  }

// kernel: dgcnn_forward.10
= control target key start
LH: loop header
LB: loop body
LE: loop exit
PB: predicated region body
PF: predicated region fallthrough
CT: control target
= control target key end

     0   :  { %s587_s9 = smov 0   ;;  %s589_s10 = smov 0   ;;  %s667_s0 = inlined_call_operand.vmem [shape: bf16[2,16,3], index: 0, kind: input, shape index: {}]   ;;  %s668_s1 = inlined_call_operand.vmem [shape: bf16[2,3,16], index: 1, kind: input, shape index: {}]   ;;  %s669_s2 = inlined_call_operand.vmem [shape: s32[2,16,4], index: 2, kind: output, shape index: {}]  }
   0x1   :  { %s591_s11 = smov 0  }
   0x2 LB: > { %s24_s12 = sadd.s32 1, %s563_s10  ;;  %p481_p0 = scmp.ge.s32.totalorder %s567_s11, 1  ;;  %s567_s11 = sphi %s591_s11, %s12_s11   ;;  %s563_s10 = sphi %s589_s10, %s671_s10   ;;  %s559_s9 = sphi %s587_s9, %s670_s9  }
   0x3   : > { %p26_p1 = scmp.ge.s32.totalorder %s24_s12, 2  ;;  %p142_p2 = scmp.lt.s32.totalorder %s567_s11, 3 }
   0x5   : > { %s673_s12 = smov (%p26_p1, %s24_s12), 0  ;;  %p143_p3 = pnand %p481_p0, %p142_p2 }
   0x6   : > { %p177_p4 = scmp.lt.s32.totalorder (!%p143_p3), %s559_s9, 1 }
   0x7   : > { %146 = sbr.rel (%p143_p3) target bundleno = 1366 (0x556), region = 28 }
   0xc   : > { %vm213_vm0 = vcmask 1040384   ;;  %v569_v0 = vmov 0.0   ;;  %vm214_vm1 = vcmask 1041408   ;;  %v570_v1 = vmov 65535   ;;  %s675_s9 = smov (!%p177_p4, %s559_s9), 1 }
   0xd   : > { %495 = vmatprep.subr.bf16.mxu0 %v569_v0  ;;  %v215_v2 = vsel %vm213_vm0, 4294967295, %v570_v1  ;;  %vm571_vm2 = vmmov 0   ;;  %s484_s13 = sshll.u32 %s675_s9, 1  ;;  %s491_s14 = sshll.u32 %s675_s9, 3  ;;  %vm209_vm3 = vcmask 23552   ;;  %vm263_vm4 = vcmask 124928  }
   0xe   : > { %497 = vmatprep.mubr.msk.bf16.mxu0 %vm571_vm2, %v569_v0  ;;  %v216_v3 = vsel %vm214_vm1, %v215_v2, 0  ;;  %s189_s17 = scalar_lea.vmem %s668_s1, %s484_s13  ;;  %s184_s20 = scalar_lea.vmem %s667_s0, %s491_s14  ;;  %vm278_vm5 = vcmask 130048   ;;  %v275_v26 = vlaneseq }
   0xf   : > { %v203_v4 = vld [vmem:[%s189_s17] sm:$0x3]  ;;  %s492_s21 = sshll.u32 %s675_s9, 4 }
  0x10   : > { %v218_v5 = vand.u32 %v216_v3, %v203_v4  ;;  %v544_v6 = vld [vmem:[%s184_s20] sm:$0xff]   ;;  %v261_v7 = vunpack.c.l.bf16 %v203_v4  ;;  %v617_v27 = vand.u32 127, %v275_v26  ;;  %s198_s24 = scalar_lea.vmem %s669_s2, %s492_s21 }
  0x12   : > { %496 = vmatpush3.bf16.msra.mxu0 %v218_v5  ;;  %v262_v8 = vmul.f32 %v261_v7, %v261_v7  ;;  %v620_v28 = vcvt.s32.f32 %v617_v27  ;;  %vm297_vm12 = vcmp.eq.s32.totalorder %v617_v27, 0  ;;  %vm322_vm13 = vcmp.eq.s32.totalorder %v617_v27, 1 }
  0x13   : > { %vm347_vm2 = vcmp.eq.s32.totalorder %v617_v27, 2 }
  0x14   : > { %v264_v9 = vsel %vm263_vm4, %v262_v8, 0.0 }
  0x15   : > { %498 = vmatmul.mubr.msk.bf16.vlgmr.msra.gmra.mxu0 %vm209_vm3, %v544_v6  ;;  %v265_v10 = vrot.slane %v264_v9, 4 }
  0x17   : > { %v266_v11 = vadd.f32 %v265_v10, %v264_v9 }
  0x19   : > { %v267_v12 = vrot.slane %v266_v11, 2 }
  0x1b   : > { %v268_v13 = vadd.f32 %v267_v12, %v266_v11 }
  0x1d   : > { %v269_v14 = vrot.slane %v268_v13, 1 }
  0x1f   : > { %v270_v15 = vadd.f32 %v269_v14, %v268_v13 }
  0xd5   : > { %v254_v16 = vpop.f32.mrf.mxu0 }
  0xd6   : > { %v271_v17 = vmul.f32 2.0, %v254_v16 }
  0xd7   : > { %v499_v18 = vpop.f32.mrf.mxu0 }
  0xd8   : > { %v273_v19 = vsub.f32 %v271_v17, %v270_v15 }
  0xd9   : > { %v257_v20 = vpop.f32.mrf.mxu0 }
  0xda   : > { %v272_v21 = vmul.f32 2.0, %v257_v20  ;;  %v279_v22 = vsel %vm278_vm5, %v273_v19, -inf }
  0xdb   : > { %280 = vmax.xlane.f32.xlu0 %v279_v22  ;;  %v500_v23 = vpop.f32.mrf.mxu0 }
  0xdc   : > { %v274_v24 = vsub.f32 %v272_v21, %v270_v15 }
  0xde   : > { %v282_v25 = vsel %vm278_vm5, %v274_v24, -inf }
  0xdf   : > { %283 = vmax.xlane.f32.xlu0 %v282_v25 }
 0x164   : > { %v281_v29 = vpop.xlane.xlu0 %280 }
 0x165   : > { %vm285_vm6 = vcmp.eq.f32.partialorder %v273_v19, %v281_v29 }
 0x166   : > { %v287_v30 = vsel %vm285_vm6, %v620_v28, 16.0 }
 0x167   : > { %v289_v31 = vsel %vm278_vm5, %v287_v30, inf }
 0x168   : > { %290 = vmin.xlane.f32.xlu1 %v289_v31  ;;  %v284_v32 = vpop.xlane.xlu0 %283 }
 0x169   : > { %vm286_vm7 = vcmp.eq.f32.partialorder %v274_v24, %v284_v32 }
 0x16a   : > { %v288_v33 = vsel %vm286_vm7, %v620_v28, 16.0 }
 0x16b   : > { %v292_v34 = vsel %vm278_vm5, %v288_v33, inf }
 0x16c   : > { %293 = vmin.xlane.f32.xlu1 %v292_v34 }
 0x1f1   : > { %v291_v35 = vpop.xlane.xlu1 %290 }
 0x1f2   : > { %v501_v36 = vtrunc.f32 %v291_v35 }
 0x1f4   : > { %v502_v37 = vcvt.f32.s32 %v501_v36 }
 0x1f5   : > { %v294_v38 = vpop.xlane.xlu1 %293 }
 0x1f6   : > { %vm300_vm8 = vcmp.eq.s32.totalorder %v617_v27, %v502_v37  ;;  %v503_v39 = vtrunc.f32 %v294_v38  ;;  %v298_v54 = vsel %vm297_vm12, %v502_v37, 0 }
 0x1f7   : > { %v302_v40 = vsel %vm300_vm8, -inf, %v273_v19  ;;  %vm372_vm8 = vcmp.eq.s32.totalorder %v617_v27, 3 }
 0x1f8   : > { %v504_v41 = vcvt.f32.s32 %v503_v39  ;;  %v304_v42 = vsel %vm278_vm5, %v302_v40, -inf }
 0x1f9   : > { %305 = vmax.xlane.f32.xlu0 %v304_v42 }
 0x1fa   : > { %vm301_vm9 = vcmp.eq.s32.totalorder %v617_v27, %v504_v41  ;;  %v299_v61 = vsel %vm297_vm12, %v504_v41, 0 }
 0x1fb   : > { %v303_v43 = vsel %vm301_vm9, -inf, %v274_v24  ;;  %vm375_vm9 = vcmask 31744  }
 0x1fc   : > { %v307_v44 = vsel %vm278_vm5, %v303_v43, -inf }
 0x1fd   : > { %308 = vmax.xlane.f32.xlu1 %v307_v44 }
 0x282   : > { %v306_v45 = vpop.xlane.xlu0 %305 }
 0x283   : > { %vm310_vm10 = vcmp.eq.f32.partialorder %v302_v40, %v306_v45 }
 0x284   : > { %v312_v46 = vsel %vm310_vm10, %v620_v28, 16.0 }
 0x285   : > { %v314_v47 = vsel %vm278_vm5, %v312_v46, inf }
 0x286   : > { %v309_v48 = vpop.xlane.xlu1 %308  ;;  %315 = vmin.xlane.f32.xlu0 %v314_v47 }
 0x287   : > { %vm311_vm11 = vcmp.eq.f32.partialorder %v303_v43, %v309_v48 }
 0x288   : > { %v313_v49 = vsel %vm311_vm11, %v620_v28, 16.0 }
 0x289   : > { %v317_v50 = vsel %vm278_vm5, %v313_v49, inf }
 0x28a   : > { %318 = vmin.xlane.f32.xlu1 %v317_v50 }
 0x30f   : > { %v316_v51 = vpop.xlane.xlu0 %315 }
 0x310   : > { %v505_v52 = vtrunc.f32 %v316_v51 }
 0x312   : > { %v506_v53 = vcvt.f32.s32 %v505_v52 }
 0x313   : > { %v319_v55 = vpop.xlane.xlu1 %318 }
 0x314   : > { %v323_v56 = vsel %vm322_vm13, %v506_v53, %v298_v54  ;;  %vm325_vm14 = vcmp.eq.s32.totalorder %v617_v27, %v506_v53  ;;  %v507_v57 = vtrunc.f32 %v319_v55 }
 0x315   : > { %v327_v58 = vsel %vm325_vm14, -inf, %v302_v40 }
 0x316   : > { %v508_v59 = vcvt.f32.s32 %v507_v57  ;;  %v329_v60 = vsel %vm278_vm5, %v327_v58, -inf }
 0x317   : > { %330 = vmax.xlane.f32.xlu0 %v329_v60 }
 0x318   : > { %v324_v62 = vsel %vm322_vm13, %v508_v59, %v299_v61  ;;  %vm326_vm15 = vcmp.eq.s32.totalorder %v617_v27, %v508_v59 }
 0x319   : > { %v328_v63 = vsel %vm326_vm15, -inf, %v303_v43 }
 0x31a   : > { %v332_v0 = vsel %vm278_vm5, %v328_v63, -inf }
 0x31b   : > { %333 = vmax.xlane.f32.xlu1 %v332_v0 }
 0x3a0   : > { %v331_v1 = vpop.xlane.xlu0 %330 }
 0x3a1   : > { %vm335_vm0 = vcmp.eq.f32.partialorder %v327_v58, %v331_v1 }
 0x3a2   : > { %v337_v2 = vsel %vm335_vm0, %v620_v28, 16.0 }
 0x3a3   : > { %v339_v3 = vsel %vm278_vm5, %v337_v2, inf }
 0x3a4   : > { %v334_v4 = vpop.xlane.xlu1 %333  ;;  %340 = vmin.xlane.f32.xlu0 %v339_v3 }
 0x3a5   : > { %vm336_vm1 = vcmp.eq.f32.partialorder %v328_v63, %v334_v4 }
 0x3a6   : > { %v338_v5 = vsel %vm336_vm1, %v620_v28, 16.0 }
 0x3a7   : > { %v342_v6 = vsel %vm278_vm5, %v338_v5, inf }
 0x3a8   : > { %343 = vmin.xlane.f32.xlu1 %v342_v6 }
 0x42d   : > { %v341_v7 = vpop.xlane.xlu0 %340 }
 0x42e   : > { %v509_v8 = vtrunc.f32 %v341_v7 }
 0x430   : > { %v510_v9 = vcvt.f32.s32 %v509_v8 }
 0x431   : > { %v344_v10 = vpop.xlane.xlu1 %343 }
 0x432   : > { %v348_v11 = vsel %vm347_vm2, %v510_v9, %v323_v56  ;;  %v511_v12 = vtrunc.f32 %v344_v10  ;;  %vm350_vm3 = vcmp.eq.s32.totalorder %v617_v27, %v510_v9 }
 0x433   : > { %v352_v13 = vsel %vm350_vm3, -inf, %v327_v58 }
 0x434   : > { %v512_v14 = vcvt.f32.s32 %v511_v12  ;;  %v354_v15 = vsel %vm278_vm5, %v352_v13, -inf }
 0x435   : > { %355 = vmax.xlane.f32.xlu0 %v354_v15 }
 0x436   : > { %v349_v16 = vsel %vm347_vm2, %v512_v14, %v324_v62  ;;  %vm351_vm4 = vcmp.eq.s32.totalorder %v617_v27, %v512_v14 }
 0x437   : > { %v353_v17 = vsel %vm351_vm4, -inf, %v328_v63 }
 0x438   : > { %v357_v18 = vsel %vm278_vm5, %v353_v17, -inf }
 0x439   : > { %358 = vmax.xlane.f32.xlu1 %v357_v18 }
 0x4be   : > { %v356_v19 = vpop.xlane.xlu0 %355 }
 0x4bf   : > { %vm360_vm6 = vcmp.eq.f32.partialorder %v352_v13, %v356_v19 }
 0x4c0   : > { %v362_v20 = vsel %vm360_vm6, %v620_v28, 16.0 }
 0x4c1   : > { %v364_v21 = vsel %vm278_vm5, %v362_v20, inf }
 0x4c2   : > { %v359_v22 = vpop.xlane.xlu1 %358  ;;  %365 = vmin.xlane.f32.xlu0 %v364_v21 }
 0x4c3   : > { %vm361_vm7 = vcmp.eq.f32.partialorder %v353_v17, %v359_v22 }
 0x4c4   : > { %v363_v23 = vsel %vm361_vm7, %v620_v28, 16.0 }
 0x4c5   : > { %v367_v24 = vsel %vm278_vm5, %v363_v23, inf }
 0x4c6   : > { %368 = vmin.xlane.f32.xlu1 %v367_v24 }
 0x54b   : > { %v366_v25 = vpop.xlane.xlu0 %365 }
 0x54c   : > { %v513_v26 = vtrunc.f32 %v366_v25 }
 0x54e   : > { %v514_v29 = vcvt.f32.s32 %v513_v26 }
 0x54f   : > { %v369_v30 = vpop.xlane.xlu1 %368 }
 0x550   : > { %v373_v31 = vsel %vm372_vm8, %v514_v29, %v348_v11  ;;  %v515_v32 = vtrunc.f32 %v369_v30 }
 0x551   : > { %376 = vst.msk [vmem:[%s198_s24] sm:$0xff] %vm375_vm9, %v373_v31 }
 0x552   : > { %v516_v33 = vcvt.f32.s32 %v515_v32 }
 0x554   : > { %v374_v28 = vsel %vm372_vm8, %v516_v33, %v349_v16 }
 0x555   : > { %377 = vst.msk [vmem:[%s198_s24 + $0x8] sm:$0xff] %vm375_vm9, %v374_v28 }
 0x556 PF: > { %s12_s11 = sadd.s32 1, %s567_s11   ;;  %s670_s9 = smov %s563_s10 }
 0x557   : > { %p9_p5 = scmp.ge.s32.totalorder %s12_s11, 4   ;;  %s671_s10 = smov %s673_s12 }
 0x559   :  { %11 = sbr.rel (!%p9_p5) target bundleno = 2 (0x2), region = 61 }

// kernel: dgcnn_forward.13
= control target key start
LH: loop header
LB: loop body
LE: loop exit
PB: predicated region body
PF: predicated region fallthrough
CT: control target
= control target key end

     0   :  { %vm58_vm0 = vcmask 523264   ;;  %s228_s1 = inlined_call_operand.vmem [shape: bf16[64,128], index: 1, kind: input, shape index: {}]   ;;  %s229_s0 = inlined_call_operand.vmem [shape: bf16[32,64], index: 0, kind: input, shape index: {}]   ;;  %s230_s2 = inlined_call_operand.vmem [shape: bf16[32,128], index: 2, kind: output, shape index: {}]  }
   0x1   :  { %v183_v0 = vld [vmem:[%s228_s1 + $0x18] sm:$0xff]   ;;  %v184_v1 = vld [vmem:[%s228_s1 + $0x10] sm:$0xff]   ;;  %v185_v2 = vld [vmem:[%s228_s1 + $0x8] sm:$0xff]  }
   0x2   :  { %171 = vmatprep.subr.bf16.mxu0 %v183_v0  ;;  %v187_v3 = vld [vmem:[%s229_s0] sm:$0xff]   ;;  %v188_v5 = vld [vmem:[%s229_s0 + $0x8] sm:$0xff]  }
   0x3   :  { %172 = vmatpush3.bf16.msra.mxu0 %v183_v0  ;;  %179 = vmatprep.mubr.msk.bf16.mxu0 %vm58_vm0, %v187_v3  ;;  %v186_v4 = vld [vmem:[%s228_s1] sm:$0xff]  }
   0x4   :  { %173 = vmatprep.subr.bf16.mxu0 %v184_v1 }
   0x7   :  { %174 = vmatpush3.bf16.msra.mxu0 %v184_v1 }
   0x8   :  { %175 = vmatprep.subr.bf16.mxu0 %v185_v2 }
   0xb   :  { %176 = vmatpush3.bf16.msra.mxu0 %v185_v2 }
   0xc   :  { %177 = vmatprep.subr.bf16.mxu0 %v186_v4 }
   0xf   :  { %178 = vmatpush3.bf16.msra.mxu0 %v186_v4 }
  0x12   :  { %180 = vmatmul.mubr.msk.bf16.vlgmr.msra.gmra.mxu0 %vm58_vm0, %v188_v5 }
  0xd2   :  { %v181_v6 = vpop.f32.mrf.mxu0 }
  0xd4   :  { %v99_v7 = vpop.f32.mrf.mxu0 }
  0xd6   :  { %v182_v8 = vpop.f32.mrf.mxu0 }
  0xd7   :  { %v162_v9 = vpack.c.bf16 %v182_v8, %v181_v6 }
  0xd8   :  { %v102_v10 = vpop.f32.mrf.mxu0 }
  0xd9   :  { %164 = vst [vmem:[%s230_s2 + $0x8] sm:$0xff] %v162_v9   ;;  %v157_v11 = vpack.c.bf16 %v102_v10, %v99_v7 }
  0xdb   :  { %158 = vst [vmem:[%s230_s2] sm:$0xff] %v157_v11  }

// kernel: dgcnn_forward.15
= control target key start
LH: loop header
LB: loop body
LE: loop exit
PB: predicated region body
PF: predicated region fallthrough
CT: control target
= control target key end

     0   :  { %v209_v1 = vmov 0   ;;  %vm74_vm0 = vcmask 523264   ;;  %s267_s1 = inlined_call_operand.vmem [shape: bf16[64,256], index: 1, kind: input, shape index: {}]   ;;  %s268_s0 = inlined_call_operand.vmem [shape: bf16[32,64], index: 0, kind: input, shape index: {}]   ;;  %s269_s2 = inlined_call_operand.vmem [shape: bf16[32,256], index: 2, kind: output, shape index: {}]  }
   0x1   :  { %v195_v0 = vld [vmem:[%s267_s1 + $0x34] ss:$8 sps:$4 sm:$0xff]   ;;  %113 = vmatprep.mubr.bf16.mxu0 %v209_v1  ;;  %123 = vmatprep.mubr.bf16.mxu1 %v209_v1  ;;  %v197_v2 = vld [vmem:[%s267_s1 + $0x30] ss:$8 sps:$4 sm:$0xff]   ;;  %v198_v3 = vld [vmem:[%s267_s1 + $0x24] ss:$8 sps:$4 sm:$0xff]  }
   0x2   :  { %89 = vmatprep.subr.bf16.mxu0 %v195_v0  ;;  %186 = vmatprep.subr.bf16.mxu1 %v195_v0  ;;  %v200_v4 = vld [vmem:[%s267_s1 + $0x20] ss:$8 sps:$4 sm:$0xff]   ;;  %v201_v5 = vld [vmem:[%s267_s1 + $0x14] ss:$8 sps:$4 sm:$0xff]   ;;  %v203_v6 = vld [vmem:[%s267_s1 + $0x10] ss:$8 sps:$4 sm:$0xff]  }
   0x3   :  { %90 = vmatpush1.bf16.msra.mxu0 %v197_v2  ;;  %190 = vmatpush1.bf16.msra.mxu1 %v197_v2  ;;  %v204_v7 = vld [vmem:[%s267_s1 + $0x4] ss:$8 sps:$4 sm:$0xff]   ;;  %v206_v8 = vld [vmem:[%s267_s1] ss:$8 sps:$4 sm:$0xff]  }
   0x4   :  { %91 = vmatprep.subr.bf16.mxu0 %v198_v3  ;;  %187 = vmatprep.subr.bf16.mxu1 %v198_v3  ;;  %v207_v9 = vld [vmem:[%s268_s0] sm:$0xff]   ;;  %v208_v10 = vld [vmem:[%s268_s0 + $0x8] sm:$0xff]  }
   0x7   :  { %92 = vmatpush1.bf16.msra.mxu0 %v200_v4  ;;  %191 = vmatpush1.bf16.msra.mxu1 %v200_v4 }
   0x8   :  { %93 = vmatprep.subr.bf16.mxu0 %v201_v5  ;;  %188 = vmatprep.subr.bf16.mxu1 %v201_v5 }
   0xb   :  { %94 = vmatpush1.bf16.msra.mxu0 %v203_v6  ;;  %192 = vmatpush1.bf16.msra.mxu1 %v203_v6 }
   0xc   :  { %95 = vmatprep.subr.bf16.mxu0 %v204_v7  ;;  %189 = vmatprep.subr.bf16.mxu1 %v204_v7 }
   0xf   :  { %96 = vmatpush1.bf16.msra.mxu0 %v206_v8  ;;  %193 = vmatpush1.bf16.msra.mxu1 %v206_v8 }
  0x12   :  { %176 = vmatmul.mubr.msk.bf16.vlgmr.msra.gmra.mxu0 %vm74_vm0, %v207_v9  ;;  %177 = vmatmul.mubr.msk.bf16.vlgmr.msra.gmra.mxu1 %vm74_vm0, %v208_v10 }
  0xd2   :  { %v115_v11 = vpop.f32.mrf.mxu0  ;;  %v125_v12 = vpop.f32.mrf.mxu1 }
  0xd4   :  { %v117_v13 = vpop.f32.mrf.mxu0  ;;  %v127_v14 = vpop.f32.mrf.mxu1 }
  0xd5   :  { %v182_v15 = vpack.c.bf16 %v117_v13, %v115_v11  ;;  %v184_v16 = vpack.c.bf16 %v127_v14, %v125_v12 }
  0xd6   :  { %v119_v17 = vpop.f32.mrf.mxu0  ;;  %v129_v18 = vpop.f32.mrf.mxu1 }
  0xd7   :  { %158 = vst [vmem:[%s269_s2] sm:$0xff] %v182_v15  ;;  %160 = vst [vmem:[%s269_s2 + $0x10] sm:$0xff] %v184_v16 }
  0xd8   :  { %v121_v19 = vpop.f32.mrf.mxu0  ;;  %v131_v20 = vpop.f32.mrf.mxu1 }
  0xd9   :  { %v183_v21 = vpack.c.bf16 %v121_v19, %v119_v17  ;;  %v185_v22 = vpack.c.bf16 %v131_v20, %v129_v18 }
  0xdb   :  { %159 = vst [vmem:[%s269_s2 + $0x8] sm:$0xff] %v183_v21  ;;  %161 = vst [vmem:[%s269_s2 + $0x18] sm:$0xff] %v185_v22 }

// kernel: dgcnn_forward.12
= control target key start
LH: loop header
LB: loop body
LE: loop exit
PB: predicated region body
PF: predicated region fallthrough
CT: control target
= control target key end

     0   :  { %s662_s9 = smov 0   ;;  %s664_s10 = smov 0   ;;  %s750_s0 = inlined_call_operand.vmem [shape: bf16[2,16,64], index: 0, kind: input, shape index: {}]   ;;  %s751_s1 = inlined_call_operand.vmem [shape: bf16[2,64,16], index: 1, kind: input, shape index: {}]   ;;  %s752_s2 = inlined_call_operand.vmem [shape: s32[2,16,4], index: 2, kind: output, shape index: {}]  }
   0x1   :  { %s666_s11 = smov 0  }
   0x2 LB: > { %s24_s12 = sadd.s32 1, %s639_s10  ;;  %p535_p0 = scmp.ge.s32.totalorder %s643_s11, 1  ;;  %s643_s11 = sphi %s666_s11, %s12_s11   ;;  %s639_s10 = sphi %s664_s10, %s754_s10   ;;  %s635_s9 = sphi %s662_s9, %s753_s9  }
   0x3   : > { %p26_p1 = scmp.ge.s32.totalorder %s24_s12, 2  ;;  %p143_p2 = scmp.lt.s32.totalorder %s643_s11, 3 }
   0x5   : > { %s756_s12 = smov (%p26_p1, %s24_s12), 0  ;;  %p144_p3 = pnand %p535_p0, %p143_p2 }
   0x6   : > { %p179_p4 = scmp.lt.s32.totalorder (!%p144_p3), %s635_s9, 1 }
   0x7   : > { %147 = sbr.rel (%p144_p3) target bundleno = 1376 (0x560), region = 28 }
   0xc   : > { %v645_v0 = vmov 0.0   ;;  %vm646_vm0 = vmmov 0   ;;  %s758_s9 = smov (!%p179_p4, %s635_s9), 1  ;;  %vm304_vm1 = vcmask 130048   ;;  %vm243_vm2 = vcmask 523264  }
   0xd   : > { %558 = vmatprep.subr.bf16.mxu0 %v645_v0  ;;  %566 = vmatprep.mubr.msk.bf16.mxu0 %vm646_vm0, %v645_v0  ;;  %s551_s13 = sshll.u32 %s758_s9, 5  ;;  %s550_s14 = sshll.u32 %s758_s9, 3  ;;  %v330_v53 = vlaneseq }
   0xe   : > { %s192_s17 = scalar_lea.vmem %s751_s1, %s551_s13  ;;  %s186_s20 = scalar_lea.vmem %s750_s0, %s550_s14 }
   0xf   : > { %v212_v1 = vld [vmem:[%s192_s17 + $0x18] sm:$0xff]   ;;  %v210_v2 = vld [vmem:[%s192_s17 + $0x10] sm:$0xff]   ;;  %v208_v3 = vld [vmem:[%s192_s17 + $0x8] sm:$0xff]   ;;  %v700_v54 = vand.u32 127, %v330_v53  ;;  %s552_s21 = sshll.u32 %s758_s9, 4 }
  0x10   : > { %v290_v4 = vunpack.c.l.bf16 %v208_v3  ;;  %559 = vmatpush3.bf16.msra.mxu0 %v212_v1  ;;  %v291_v5 = vunpack.c.h.bf16 %v208_v3  ;;  %v206_v6 = vld [vmem:[%s192_s17] sm:$0xff]   ;;  %v292_v8 = vunpack.c.l.bf16 %v210_v2  ;;  %v293_v25 = vunpack.c.h.bf16 %v210_v2  ;;  %s201_s24 = scalar_lea.vmem %s752_s2, %s552_s21 }
  0x11   : > { %560 = vmatprep.subr.bf16.mxu0 %v645_v0  ;;  %v288_v7 = vunpack.c.l.bf16 %v206_v6  ;;  %v289_v10 = vunpack.c.h.bf16 %v206_v6  ;;  %v616_v23 = vld [vmem:[%s186_s20] sm:$0xff]   ;;  %v294_v26 = vunpack.c.l.bf16 %v212_v1  ;;  %v295_v27 = vunpack.c.h.bf16 %v212_v1 }
  0x12   : > { %v298_v9 = vmul.f32 %v290_v4, %v290_v4  ;;  %v299_v12 = vmul.f32 %v291_v5, %v291_v5  ;;  %v300_v15 = vmul.f32 %v292_v8, %v292_v8  ;;  %v301_v28 = vmul.f32 %v293_v25, %v293_v25 }
  0x13   : > { %v296_v11 = vmul.f32 %v288_v7, %v288_v7  ;;  %v297_v13 = vmul.f32 %v289_v10, %v289_v10  ;;  %v302_v29 = vmul.f32 %v294_v26, %v294_v26  ;;  %v303_v30 = vmul.f32 %v295_v27, %v295_v27 }
  0x14   : > { %561 = vmatpush3.bf16.msra.mxu0 %v210_v2  ;;  %v308_v16 = vsel %vm304_vm1, %v298_v9, 0.0  ;;  %v310_v19 = vsel %vm304_vm1, %v299_v12, 0.0  ;;  %v312_v21 = vsel %vm304_vm1, %v300_v15, 0.0  ;;  %v314_v31 = vsel %vm304_vm1, %v301_v28, 0.0 }
  0x15   : > { %562 = vmatprep.subr.bf16.mxu0 %v645_v0  ;;  %v305_v14 = vsel %vm304_vm1, %v296_v11, 0.0  ;;  %v306_v17 = vsel %vm304_vm1, %v297_v13, 0.0  ;;  %v316_v32 = vsel %vm304_vm1, %v302_v29, 0.0  ;;  %v318_v34 = vsel %vm304_vm1, %v303_v30, 0.0 }
  0x16   : > { %v307_v18 = vadd.f32 %v306_v17, %v305_v14  ;;  %v703_v55 = vcvt.s32.f32 %v700_v54  ;;  %vm351_vm9 = vcmp.eq.s32.totalorder %v700_v54, 0  ;;  %vm376_vm10 = vcmp.eq.s32.totalorder %v700_v54, 1 }
  0x17   : > { %vm401_vm15 = vcmp.eq.s32.totalorder %v700_v54, 2 }
  0x18   : > { %563 = vmatpush3.bf16.msra.mxu0 %v208_v3  ;;  %v309_v20 = vadd.f32 %v308_v16, %v307_v18 }
  0x19   : > { %564 = vmatprep.subr.bf16.mxu0 %v645_v0 }
  0x1a   : > { %v311_v22 = vadd.f32 %v310_v19, %v309_v20 }
  0x1c   : > { %565 = vmatpush3.bf16.msra.mxu0 %v206_v6  ;;  %v313_v24 = vadd.f32 %v312_v21, %v311_v22 }
  0x1e   : > { %v315_v33 = vadd.f32 %v314_v31, %v313_v24 }
  0x1f   : > { %567 = vmatmul.mubr.msk.bf16.vlgmr.msra.gmra.mxu0 %vm243_vm2, %v616_v23 }
  0x20   : > { %v317_v35 = vadd.f32 %v316_v32, %v315_v33 }
  0x22   : > { %v319_v36 = vadd.f32 %v318_v34, %v317_v35 }
  0x24   : > { %v320_v37 = vrot.slane %v319_v36, 4 }
  0x26   : > { %v321_v38 = vadd.f32 %v320_v37, %v319_v36 }
  0x28   : > { %v322_v39 = vrot.slane %v321_v38, 2 }
  0x2a   : > { %v323_v40 = vadd.f32 %v322_v39, %v321_v38 }
  0x2c   : > { %v324_v41 = vrot.slane %v323_v40, 1 }
  0x2e   : > { %v325_v42 = vadd.f32 %v324_v41, %v323_v40 }
  0xdf   : > { %v281_v43 = vpop.f32.mrf.mxu0 }
  0xe0   : > { %v326_v44 = vmul.f32 2.0, %v281_v43 }
  0xe1   : > { %v568_v45 = vpop.f32.mrf.mxu0 }
  0xe2   : > { %v328_v46 = vsub.f32 %v326_v44, %v325_v42 }
  0xe3   : > { %v284_v47 = vpop.f32.mrf.mxu0 }
  0xe4   : > { %v327_v48 = vmul.f32 2.0, %v284_v47  ;;  %v333_v49 = vsel %vm304_vm1, %v328_v46, -inf }
  0xe5   : > { %334 = vmax.xlane.f32.xlu0 %v333_v49  ;;  %v569_v50 = vpop.f32.mrf.mxu0 }
  0xe6   : > { %v329_v51 = vsub.f32 %v327_v48, %v325_v42 }
  0xe8   : > { %v336_v52 = vsel %vm304_vm1, %v329_v51, -inf }
  0xe9   : > { %337 = vmax.xlane.f32.xlu0 %v336_v52 }
 0x16e   : > { %v335_v56 = vpop.xlane.xlu0 %334 }
 0x16f   : > { %vm339_vm3 = vcmp.eq.f32.partialorder %v328_v46, %v335_v56 }
 0x170   : > { %v341_v57 = vsel %vm339_vm3, %v703_v55, 16.0 }
 0x171   : > { %v343_v58 = vsel %vm304_vm1, %v341_v57, inf }
 0x172   : > { %344 = vmin.xlane.f32.xlu1 %v343_v58  ;;  %v338_v59 = vpop.xlane.xlu0 %337 }
 0x173   : > { %vm340_vm4 = vcmp.eq.f32.partialorder %v329_v51, %v338_v59 }
 0x174   : > { %v342_v60 = vsel %vm340_vm4, %v703_v55, 16.0 }
 0x175   : > { %v346_v61 = vsel %vm304_vm1, %v342_v60, inf }
 0x176   : > { %347 = vmin.xlane.f32.xlu1 %v346_v61 }
 0x1fb   : > { %v345_v62 = vpop.xlane.xlu1 %344 }
 0x1fc   : > { %v570_v63 = vtrunc.f32 %v345_v62 }
 0x1fe   : > { %v571_v0 = vcvt.f32.s32 %v570_v63 }
 0x1ff   : > { %v348_v1 = vpop.xlane.xlu1 %347 }
 0x200   : > { %vm354_vm5 = vcmp.eq.s32.totalorder %v700_v54, %v571_v0  ;;  %v572_v2 = vtrunc.f32 %v348_v1  ;;  %v352_v17 = vsel %vm351_vm9, %v571_v0, 0 }
 0x201   : > { %v356_v3 = vsel %vm354_vm5, -inf, %v328_v46  ;;  %vm426_vm5 = vcmp.eq.s32.totalorder %v700_v54, 3 }
 0x202   : > { %v573_v4 = vcvt.f32.s32 %v572_v2  ;;  %v358_v5 = vsel %vm304_vm1, %v356_v3, -inf }
 0x203   : > { %359 = vmax.xlane.f32.xlu0 %v358_v5 }
 0x204   : > { %vm355_vm6 = vcmp.eq.s32.totalorder %v700_v54, %v573_v4  ;;  %v353_v24 = vsel %vm351_vm9, %v573_v4, 0 }
 0x205   : > { %v357_v6 = vsel %vm355_vm6, -inf, %v329_v51  ;;  %vm429_vm6 = vcmask 31744  }
 0x206   : > { %v361_v7 = vsel %vm304_vm1, %v357_v6, -inf }
 0x207   : > { %362 = vmax.xlane.f32.xlu1 %v361_v7 }
 0x28c   : > { %v360_v8 = vpop.xlane.xlu0 %359 }
 0x28d   : > { %vm364_vm7 = vcmp.eq.f32.partialorder %v356_v3, %v360_v8 }
 0x28e   : > { %v366_v9 = vsel %vm364_vm7, %v703_v55, 16.0 }
 0x28f   : > { %v368_v10 = vsel %vm304_vm1, %v366_v9, inf }
 0x290   : > { %v363_v11 = vpop.xlane.xlu1 %362  ;;  %369 = vmin.xlane.f32.xlu0 %v368_v10 }
 0x291   : > { %vm365_vm8 = vcmp.eq.f32.partialorder %v357_v6, %v363_v11 }
 0x292   : > { %v367_v12 = vsel %vm365_vm8, %v703_v55, 16.0 }
 0x293   : > { %v371_v13 = vsel %vm304_vm1, %v367_v12, inf }
 0x294   : > { %372 = vmin.xlane.f32.xlu1 %v371_v13 }
 0x319   : > { %v370_v14 = vpop.xlane.xlu0 %369 }
 0x31a   : > { %v574_v15 = vtrunc.f32 %v370_v14 }
 0x31c   : > { %v575_v16 = vcvt.f32.s32 %v574_v15 }
 0x31d   : > { %v373_v18 = vpop.xlane.xlu1 %372 }
 0x31e   : > { %v377_v19 = vsel %vm376_vm10, %v575_v16, %v352_v17  ;;  %vm379_vm11 = vcmp.eq.s32.totalorder %v700_v54, %v575_v16  ;;  %v576_v20 = vtrunc.f32 %v373_v18 }
 0x31f   : > { %v381_v21 = vsel %vm379_vm11, -inf, %v356_v3 }
 0x320   : > { %v577_v22 = vcvt.f32.s32 %v576_v20  ;;  %v383_v23 = vsel %vm304_vm1, %v381_v21, -inf }
 0x321   : > { %384 = vmax.xlane.f32.xlu0 %v383_v23 }
 0x322   : > { %v378_v25 = vsel %vm376_vm10, %v577_v22, %v353_v24  ;;  %vm380_vm12 = vcmp.eq.s32.totalorder %v700_v54, %v577_v22 }
 0x323   : > { %v382_v26 = vsel %vm380_vm12, -inf, %v357_v6 }
 0x324   : > { %v386_v27 = vsel %vm304_vm1, %v382_v26, -inf }
 0x325   : > { %387 = vmax.xlane.f32.xlu1 %v386_v27 }
 0x3aa   : > { %v385_v28 = vpop.xlane.xlu0 %384 }
 0x3ab   : > { %vm389_vm13 = vcmp.eq.f32.partialorder %v381_v21, %v385_v28 }
 0x3ac   : > { %v391_v29 = vsel %vm389_vm13, %v703_v55, 16.0 }
 0x3ad   : > { %v393_v30 = vsel %vm304_vm1, %v391_v29, inf }
 0x3ae   : > { %v388_v31 = vpop.xlane.xlu1 %387  ;;  %394 = vmin.xlane.f32.xlu0 %v393_v30 }
 0x3af   : > { %vm390_vm14 = vcmp.eq.f32.partialorder %v382_v26, %v388_v31 }
 0x3b0   : > { %v392_v32 = vsel %vm390_vm14, %v703_v55, 16.0 }
 0x3b1   : > { %v396_v33 = vsel %vm304_vm1, %v392_v32, inf }
 0x3b2   : > { %397 = vmin.xlane.f32.xlu1 %v396_v33 }
 0x437   : > { %v395_v34 = vpop.xlane.xlu0 %394 }
 0x438   : > { %v578_v35 = vtrunc.f32 %v395_v34 }
 0x43a   : > { %v579_v36 = vcvt.f32.s32 %v578_v35 }
 0x43b   : > { %v398_v37 = vpop.xlane.xlu1 %397 }
 0x43c   : > { %v402_v38 = vsel %vm401_vm15, %v579_v36, %v377_v19  ;;  %v580_v39 = vtrunc.f32 %v398_v37  ;;  %vm404_vm0 = vcmp.eq.s32.totalorder %v700_v54, %v579_v36 }
 0x43d   : > { %v406_v40 = vsel %vm404_vm0, -inf, %v381_v21 }
 0x43e   : > { %v581_v41 = vcvt.f32.s32 %v580_v39  ;;  %v408_v42 = vsel %vm304_vm1, %v406_v40, -inf }
 0x43f   : > { %409 = vmax.xlane.f32.xlu0 %v408_v42 }
 0x440   : > { %v403_v43 = vsel %vm401_vm15, %v581_v41, %v378_v25  ;;  %vm405_vm2 = vcmp.eq.s32.totalorder %v700_v54, %v581_v41 }
 0x441   : > { %v407_v44 = vsel %vm405_vm2, -inf, %v382_v26 }
 0x442   : > { %v411_v45 = vsel %vm304_vm1, %v407_v44, -inf }
 0x443   : > { %412 = vmax.xlane.f32.xlu1 %v411_v45 }
 0x4c8   : > { %v410_v46 = vpop.xlane.xlu0 %409 }
 0x4c9   : > { %vm414_vm3 = vcmp.eq.f32.partialorder %v406_v40, %v410_v46 }
 0x4ca   : > { %v416_v47 = vsel %vm414_vm3, %v703_v55, 16.0 }
 0x4cb   : > { %v418_v48 = vsel %vm304_vm1, %v416_v47, inf }
 0x4cc   : > { %v413_v49 = vpop.xlane.xlu1 %412  ;;  %419 = vmin.xlane.f32.xlu0 %v418_v48 }
 0x4cd   : > { %vm415_vm4 = vcmp.eq.f32.partialorder %v407_v44, %v413_v49 }
 0x4ce   : > { %v417_v50 = vsel %vm415_vm4, %v703_v55, 16.0 }
 0x4cf   : > { %v421_v51 = vsel %vm304_vm1, %v417_v50, inf }
 0x4d0   : > { %422 = vmin.xlane.f32.xlu1 %v421_v51 }
 0x555   : > { %v420_v52 = vpop.xlane.xlu0 %419 }
 0x556   : > { %v582_v53 = vtrunc.f32 %v420_v52 }
 0x558   : > { %v583_v56 = vcvt.f32.s32 %v582_v53 }
 0x559   : > { %v423_v57 = vpop.xlane.xlu1 %422 }
 0x55a   : > { %v427_v58 = vsel %vm426_vm5, %v583_v56, %v402_v38  ;;  %v584_v59 = vtrunc.f32 %v423_v57 }
 0x55b   : > { %430 = vst.msk [vmem:[%s201_s24] sm:$0xff] %vm429_vm6, %v427_v58 }
 0x55c   : > { %v585_v60 = vcvt.f32.s32 %v584_v59 }
 0x55e   : > { %v428_v55 = vsel %vm426_vm5, %v585_v60, %v403_v43 }
 0x55f   : > { %431 = vst.msk [vmem:[%s201_s24 + $0x8] sm:$0xff] %vm429_vm6, %v428_v55 }
 0x560 PF: > { %s12_s11 = sadd.s32 1, %s643_s11   ;;  %s753_s9 = smov %s639_s10 }
 0x561   : > { %p9_p5 = scmp.ge.s32.totalorder %s12_s11, 4   ;;  %s754_s10 = smov %s756_s12 }
 0x563   :  { %11 = sbr.rel (!%p9_p5) target bundleno = 2 (0x2), region = 61 }

// kernel: dgcnn_forward.17
= control target key start
LH: loop header
LB: loop body
LE: loop exit
PB: predicated region body
PF: predicated region fallthrough
CT: control target
= control target key end

     0   :  { %v487_v1 = vmov 0   ;;  %s633_s1 = inlined_call_operand.vmem [shape: bf16[128,512], index: 1, kind: input, shape index: {}]   ;;  %s634_s0 = inlined_call_operand.vmem [shape: bf16[32,128], index: 0, kind: input, shape index: {}]   ;;  %s635_s2 = inlined_call_operand.vmem [shape: bf16[32,512], index: 2, kind: output, shape index: {}]  }
   0x1   :  { %v437_v0 = vld [vmem:[%s633_s1 + $0xe4] ss:$16 sps:$4 sm:$0xff]   ;;  %252 = vmatprep.mubr.bf16.mxu0 %v487_v1  ;;  %305 = vmatprep.mubr.bf16.mxu1 %v487_v1  ;;  %v439_v2 = vld [vmem:[%s633_s1 + $0xec] ss:$16 sps:$4 sm:$0xff]   ;;  %v441_v3 = vld [vmem:[%s633_s1 + $0xe0] ss:$16 sps:$4 sm:$0xff]  }
   0x2   :  { %220 = vmatprep.subr.bf16.mxu0 %v437_v0  ;;  %v442_v4 = vld [vmem:[%s633_s1 + $0xe8] ss:$16 sps:$4 sm:$0xff]   ;;  %273 = vmatprep.subr.bf16.mxu1 %v439_v2  ;;  %v443_v5 = vld [vmem:[%s633_s1 + $0xc4] ss:$16 sps:$4 sm:$0xff]   ;;  %v445_v6 = vld [vmem:[%s633_s1 + $0xcc] ss:$16 sps:$4 sm:$0xff]  }
   0x3   :  { %221 = vmatpush1.bf16.msra.mxu0 %v441_v3  ;;  %274 = vmatpush1.bf16.msra.mxu1 %v442_v4  ;;  %v447_v7 = vld [vmem:[%s633_s1 + $0xc0] ss:$16 sps:$4 sm:$0xff]   ;;  %v448_v8 = vld [vmem:[%s633_s1 + $0xc8] ss:$16 sps:$4 sm:$0xff]   ;;  %v449_v9 = vld [vmem:[%s633_s1 + $0xa4] ss:$16 sps:$4 sm:$0xff]  }
   0x4   :  { %222 = vmatprep.subr.bf16.mxu0 %v443_v5  ;;  %275 = vmatprep.subr.bf16.mxu1 %v445_v6  ;;  %v451_v10 = vld [vmem:[%s633_s1 + $0xac] ss:$16 sps:$4 sm:$0xff]   ;;  %v453_v11 = vld [vmem:[%s633_s1 + $0xa0] ss:$16 sps:$4 sm:$0xff]   ;;  %v454_v12 = vld [vmem:[%s633_s1 + $0xa8] ss:$16 sps:$4 sm:$0xff]  }
   0x5   :  { %v455_v13 = vld [vmem:[%s633_s1 + $0x84] ss:$16 sps:$4 sm:$0xff]   ;;  %v457_v14 = vld [vmem:[%s633_s1 + $0x8c] ss:$16 sps:$4 sm:$0xff]   ;;  %v459_v15 = vld [vmem:[%s633_s1 + $0x80] ss:$16 sps:$4 sm:$0xff]  }
   0x6   :  { %v460_v16 = vld [vmem:[%s633_s1 + $0x88] ss:$16 sps:$4 sm:$0xff]   ;;  %v461_v17 = vld [vmem:[%s633_s1 + $0x64] ss:$16 sps:$4 sm:$0xff]   ;;  %v463_v18 = vld [vmem:[%s633_s1 + $0x6c] ss:$16 sps:$4 sm:$0xff]  }
   0x7   :  { %223 = vmatpush1.bf16.msra.mxu0 %v447_v7  ;;  %276 = vmatpush1.bf16.msra.mxu1 %v448_v8  ;;  %v465_v19 = vld [vmem:[%s633_s1 + $0x60] ss:$16 sps:$4 sm:$0xff]   ;;  %v466_v20 = vld [vmem:[%s633_s1 + $0x68] ss:$16 sps:$4 sm:$0xff]   ;;  %v467_v21 = vld [vmem:[%s633_s1 + $0x44] ss:$16 sps:$4 sm:$0xff]  }
   0x8   :  { %224 = vmatprep.subr.bf16.mxu0 %v449_v9  ;;  %277 = vmatprep.subr.bf16.mxu1 %v451_v10  ;;  %v469_v22 = vld [vmem:[%s633_s1 + $0x4c] ss:$16 sps:$4 sm:$0xff]   ;;  %v471_v23 = vld [vmem:[%s633_s1 + $0x40] ss:$16 sps:$4 sm:$0xff]   ;;  %v472_v24 = vld [vmem:[%s633_s1 + $0x48] ss:$16 sps:$4 sm:$0xff]  }
   0x9   :  { %v473_v25 = vld [vmem:[%s633_s1 + $0x24] ss:$16 sps:$4 sm:$0xff]   ;;  %v475_v26 = vld [vmem:[%s633_s1 + $0x2c] ss:$16 sps:$4 sm:$0xff]   ;;  %v477_v27 = vld [vmem:[%s633_s1 + $0x20] ss:$16 sps:$4 sm:$0xff]  }
   0xa   :  { %v478_v28 = vld [vmem:[%s633_s1 + $0x28] ss:$16 sps:$4 sm:$0xff]   ;;  %v479_v29 = vld [vmem:[%s633_s1 + $0x4] ss:$16 sps:$4 sm:$0xff]   ;;  %v481_v30 = vld [vmem:[%s633_s1 + $0xc] ss:$16 sps:$4 sm:$0xff]  }
   0xb   :  { %225 = vmatpush1.bf16.msra.mxu0 %v453_v11  ;;  %278 = vmatpush1.bf16.msra.mxu1 %v454_v12  ;;  %v483_v31 = vld [vmem:[%s633_s1] ss:$16 sps:$4 sm:$0xff]   ;;  %v484_v32 = vld [vmem:[%s633_s1 + $0x8] ss:$16 sps:$4 sm:$0xff]  }
   0xc   :  { %226 = vmatprep.subr.bf16.mxu0 %v455_v13  ;;  %279 = vmatprep.subr.bf16.mxu1 %v457_v14  ;;  %v485_v33 = vld [vmem:[%s634_s0] sm:$0xff]   ;;  %v486_v34 = vld [vmem:[%s634_s0 + $0x8] sm:$0xff]  }
   0xf   :  { %227 = vmatpush1.bf16.msra.mxu0 %v459_v15  ;;  %280 = vmatpush1.bf16.msra.mxu1 %v460_v16 }
  0x10   :  { %228 = vmatprep.subr.bf16.mxu0 %v461_v17  ;;  %281 = vmatprep.subr.bf16.mxu1 %v463_v18 }
  0x13   :  { %229 = vmatpush1.bf16.msra.mxu0 %v465_v19  ;;  %282 = vmatpush1.bf16.msra.mxu1 %v466_v20 }
  0x14   :  { %230 = vmatprep.subr.bf16.mxu0 %v467_v21  ;;  %283 = vmatprep.subr.bf16.mxu1 %v469_v22 }
  0x17   :  { %231 = vmatpush1.bf16.msra.mxu0 %v471_v23  ;;  %284 = vmatpush1.bf16.msra.mxu1 %v472_v24 }
  0x18   :  { %232 = vmatprep.subr.bf16.mxu0 %v473_v25  ;;  %285 = vmatprep.subr.bf16.mxu1 %v475_v26 }
  0x1b   :  { %233 = vmatpush1.bf16.msra.mxu0 %v477_v27  ;;  %286 = vmatpush1.bf16.msra.mxu1 %v478_v28 }
  0x1c   :  { %234 = vmatprep.subr.bf16.mxu0 %v479_v29  ;;  %287 = vmatprep.subr.bf16.mxu1 %v481_v30 }
  0x1f   :  { %235 = vmatpush1.bf16.msra.mxu0 %v483_v31  ;;  %288 = vmatpush1.bf16.msra.mxu1 %v484_v32 }
  0x22   :  { %253 = vmatmul.mubr.bf16.vlgmr.msra.gmra.mxu0 %v485_v33  ;;  %306 = vmatmul.mubr.bf16.vlgmr.msra.gmra.mxu1 %v485_v33 }
  0x23   :  { %262 = vmatprep.mubr.bf16.mxu0 %v487_v1  ;;  %315 = vmatprep.mubr.bf16.mxu1 %v487_v1 }
  0x2a   :  { %263 = vmatmul.mubr.bf16.gmra.mxu0 %v486_v34  ;;  %316 = vmatmul.mubr.bf16.gmra.mxu1 %v486_v34 }
  0xe2   :  { %v254_v35 = vpop.f32.mrf.mxu0  ;;  %v307_v36 = vpop.f32.mrf.mxu1 }
  0xe4   :  { %v256_v37 = vpop.f32.mrf.mxu0  ;;  %v309_v38 = vpop.f32.mrf.mxu1 }
  0xe5   :  { %v428_v39 = vpack.c.bf16 %v256_v37, %v254_v35  ;;  %v429_v40 = vpack.c.bf16 %v309_v38, %v307_v36 }
  0xe6   :  { %v258_v41 = vpop.f32.mrf.mxu0  ;;  %v311_v42 = vpop.f32.mrf.mxu1 }
  0xe7   :  { %374 = vst [vmem:[%s635_s2] sm:$0xff] %v428_v39  ;;  %375 = vst [vmem:[%s635_s2 + $0x8] sm:$0xff] %v429_v40 }
  0xe8   :  { %v260_v43 = vpop.f32.mrf.mxu0  ;;  %v313_v44 = vpop.f32.mrf.mxu1 }
  0xe9   :  { %v430_v45 = vpack.c.bf16 %v260_v43, %v258_v41  ;;  %v431_v46 = vpack.c.bf16 %v313_v44, %v311_v42 }
  0xea   :  { %v264_v47 = vpop.f32.mrf.mxu0  ;;  %v317_v48 = vpop.f32.mrf.mxu1 }
  0xeb   :  { %376 = vst [vmem:[%s635_s2 + $0x10] sm:$0xff] %v430_v45  ;;  %377 = vst [vmem:[%s635_s2 + $0x18] sm:$0xff] %v431_v46 }
  0xec   :  { %v266_v49 = vpop.f32.mrf.mxu0  ;;  %v319_v50 = vpop.f32.mrf.mxu1 }
  0xed   :  { %v432_v51 = vpack.c.bf16 %v266_v49, %v264_v47  ;;  %v433_v52 = vpack.c.bf16 %v319_v50, %v317_v48 }
  0xee   :  { %v268_v53 = vpop.f32.mrf.mxu0  ;;  %v321_v54 = vpop.f32.mrf.mxu1 }
  0xef   :  { %378 = vst [vmem:[%s635_s2 + $0x20] sm:$0xff] %v432_v51  ;;  %379 = vst [vmem:[%s635_s2 + $0x28] sm:$0xff] %v433_v52 }
  0xf0   :  { %v270_v55 = vpop.f32.mrf.mxu0  ;;  %v323_v56 = vpop.f32.mrf.mxu1 }
  0xf1   :  { %v434_v57 = vpack.c.bf16 %v270_v55, %v268_v53  ;;  %v435_v58 = vpack.c.bf16 %v323_v56, %v321_v54 }
  0xf3   :  { %380 = vst [vmem:[%s635_s2 + $0x30] sm:$0xff] %v434_v57  ;;  %381 = vst [vmem:[%s635_s2 + $0x38] sm:$0xff] %v435_v58 }

// kernel: dgcnn_forward.16
= control target key start
LH: loop header
LB: loop body
LE: loop exit
PB: predicated region body
PF: predicated region fallthrough
CT: control target
= control target key end

     0   :  { %s746_s9 = smov 0   ;;  %s748_s10 = smov 0   ;;  %s860_s0 = inlined_call_operand.vmem [shape: bf16[2,16,128], index: 0, kind: input, shape index: {}]   ;;  %s861_s1 = inlined_call_operand.vmem [shape: bf16[2,128,16], index: 1, kind: input, shape index: {}]   ;;  %s862_s2 = inlined_call_operand.vmem [shape: s32[2,16,4], index: 2, kind: output, shape index: {}]  }
   0x1   :  { %s750_s11 = smov 0  }
   0x2 LB: > { %s24_s12 = sadd.s32 1, %s723_s10  ;;  %p596_p0 = scmp.ge.s32.totalorder %s727_s11, 1  ;;  %s727_s11 = sphi %s750_s11, %s12_s11   ;;  %s723_s10 = sphi %s748_s10, %s864_s10   ;;  %s719_s9 = sphi %s746_s9, %s863_s9  }
   0x3   : > { %p26_p1 = scmp.ge.s32.totalorder %s24_s12, 2  ;;  %p143_p2 = scmp.lt.s32.totalorder %s727_s11, 3 }
   0x5   : > { %s866_s12 = smov (%p26_p1, %s24_s12), 0  ;;  %p144_p3 = pnand %p596_p0, %p143_p2 }
   0x6   : > { %p179_p4 = scmp.lt.s32.totalorder (!%p144_p3), %s719_s9, 1 }
   0x7   : > { %147 = sbr.rel (%p144_p3) target bundleno = 1392 (0x570), region = 28 }
   0xc   : > { %v729_v0 = vmov 0.0   ;;  %vm730_vm0 = vmmov 0   ;;  %s868_s9 = smov (!%p179_p4, %s719_s9), 1  ;;  %vm349_vm1 = vcmask 130048  }
   0xd   : > { %626 = vmatprep.subr.bf16.mxu0 %v729_v0  ;;  %642 = vmatprep.mubr.msk.bf16.mxu0 %vm730_vm0, %v729_v0  ;;  %s615_s13 = sshll.u32 %s868_s9, 6  ;;  %s614_s14 = sshll.u32 %s868_s9, 3 }
   0xe   : > { %s192_s17 = scalar_lea.vmem %s861_s1, %s615_s13  ;;  %s778_s20 = scalar_lea.vmem %s860_s0, %s614_s14 }
   0xf   : > { %v771_v1 = vld [vmem:[%s192_s17 + $0x38] sm:$0xff]   ;;  %v773_v2 = vld [vmem:[%s192_s17 + $0x30] sm:$0xff]   ;;  %v781_v3 = vld [vmem:[%s192_s17 + $0x28] sm:$0xff]   ;;  %s616_s21 = sshll.u32 %s868_s9, 4 }
  0x10   : > { %627 = vmatpush3.bf16.msra.mxu0 %v771_v1  ;;  %v214_v4 = vld [vmem:[%s192_s17 + $0x20] sm:$0xff]   ;;  %v208_v5 = vld [vmem:[%s192_s17 + $0x8] sm:$0xff]   ;;  %v212_v8 = vld [vmem:[%s192_s17 + $0x18] sm:$0xff]   ;;  %v327_v46 = vunpack.c.l.bf16 %v781_v3  ;;  %v328_v47 = vunpack.c.h.bf16 %v781_v3  ;;  %v329_v49 = vunpack.c.l.bf16 %v773_v2  ;;  %v330_v51 = vunpack.c.h.bf16 %v773_v2  ;;  %s201_s24 = scalar_lea.vmem %s862_s2, %s616_s21 }
  0x11   : > { %628 = vmatprep.subr.bf16.mxu0 %v729_v0  ;;  %v319_v6 = vunpack.c.l.bf16 %v208_v5  ;;  %v206_v7 = vld [vmem:[%s192_s17] sm:$0xff]   ;;  %v320_v9 = vunpack.c.h.bf16 %v208_v5  ;;  %v210_v11 = vld [vmem:[%s192_s17 + $0x10] sm:$0xff]   ;;  %v323_v20 = vunpack.c.l.bf16 %v212_v8  ;;  %v324_v25 = vunpack.c.h.bf16 %v212_v8 }
  0x12   : > { %v317_v10 = vunpack.c.l.bf16 %v206_v7  ;;  %v321_v12 = vunpack.c.l.bf16 %v210_v11  ;;  %v318_v14 = vunpack.c.h.bf16 %v206_v7  ;;  %v322_v16 = vunpack.c.h.bf16 %v210_v11  ;;  %v696_v43 = vld [vmem:[%s778_s20] sm:$0xff]  }
  0x13   : > { %v335_v13 = vmul.f32 %v319_v6, %v319_v6  ;;  %v336_v17 = vmul.f32 %v320_v9, %v320_v9  ;;  %v325_v29 = vunpack.c.l.bf16 %v214_v4  ;;  %v339_v30 = vmul.f32 %v323_v20, %v323_v20 }
  0x14   : > { %629 = vmatpush3.bf16.msra.mxu0 %v773_v2  ;;  %v333_v15 = vmul.f32 %v317_v10, %v317_v10  ;;  %v334_v18 = vmul.f32 %v318_v14, %v318_v14  ;;  %v337_v21 = vmul.f32 %v321_v12, %v321_v12  ;;  %v338_v26 = vmul.f32 %v322_v16, %v322_v16 }
  0x15   : > { %630 = vmatprep.subr.bf16.mxu0 %v729_v0  ;;  %v353_v22 = vsel %vm349_vm1, %v335_v13, 0.0  ;;  %v355_v27 = vsel %vm349_vm1, %v336_v17, 0.0  ;;  %v340_v33 = vmul.f32 %v324_v25, %v324_v25  ;;  %v341_v36 = vmul.f32 %v325_v29, %v325_v29 }
  0x16   : > { %v350_v19 = vsel %vm349_vm1, %v333_v15, 0.0  ;;  %v351_v23 = vsel %vm349_vm1, %v334_v18, 0.0  ;;  %v357_v31 = vsel %vm349_vm1, %v337_v21, 0.0  ;;  %v359_v34 = vsel %vm349_vm1, %v338_v26, 0.0 }
  0x17   : > { %v352_v24 = vadd.f32 %v351_v23, %v350_v19  ;;  %v361_v37 = vsel %vm349_vm1, %v339_v30, 0.0  ;;  %v363_v39 = vsel %vm349_vm1, %v340_v33, 0.0  ;;  %v365_v41 = vsel %vm349_vm1, %v341_v36, 0.0 }
  0x18   : > { %631 = vmatpush3.bf16.msra.mxu0 %v781_v3  ;;  %v326_v45 = vunpack.c.h.bf16 %v214_v4  ;;  %v343_v50 = vmul.f32 %v327_v46, %v327_v46  ;;  %v344_v52 = vmul.f32 %v328_v47, %v328_v47  ;;  %v331_v54 = vunpack.c.l.bf16 %v771_v1 }
  0x19   : > { %632 = vmatprep.subr.bf16.mxu0 %v729_v0  ;;  %v354_v28 = vadd.f32 %v353_v22, %v352_v24  ;;  %v345_v55 = vmul.f32 %v329_v49, %v329_v49  ;;  %v332_v58 = vunpack.c.h.bf16 %v771_v1  ;;  %v346_v59 = vmul.f32 %v330_v51, %v330_v51 }
  0x1a   : > { %v342_v48 = vmul.f32 %v326_v45, %v326_v45  ;;  %v369_v56 = vsel %vm349_vm1, %v343_v50, 0.0  ;;  %v371_v60 = vsel %vm349_vm1, %v344_v52, 0.0  ;;  %v347_v62 = vmul.f32 %v331_v54, %v331_v54 }
  0x1b   : > { %v356_v32 = vadd.f32 %v355_v27, %v354_v28  ;;  %v373_v63 = vsel %vm349_vm1, %v345_v55, 0.0  ;;  %v348_v2 = vmul.f32 %v332_v58, %v332_v58  ;;  %v375_v3 = vsel %vm349_vm1, %v346_v59, 0.0 }
  0x1c   : > { %633 = vmatpush3.bf16.msra.mxu0 %v214_v4  ;;  %v367_v53 = vsel %vm349_vm1, %v342_v48, 0.0  ;;  %v391_v25 = vlaneseq }
  0x1d   : > { %634 = vmatprep.subr.bf16.mxu0 %v729_v0  ;;  %v358_v35 = vadd.f32 %v357_v31, %v356_v32 }
  0x1e   : > { %v810_v26 = vand.u32 127, %v391_v25 }
  0x1f   : > { %v360_v38 = vadd.f32 %v359_v34, %v358_v35 }
  0x20   : > { %635 = vmatpush3.bf16.msra.mxu0 %v212_v8  ;;  %v813_v27 = vcvt.s32.f32 %v810_v26  ;;  %vm412_vm8 = vcmp.eq.s32.totalorder %v810_v26, 0  ;;  %vm437_vm9 = vcmp.eq.s32.totalorder %v810_v26, 1  ;;  %vm462_vm14 = vcmp.eq.s32.totalorder %v810_v26, 2 }
  0x21   : > { %636 = vmatprep.subr.bf16.mxu0 %v729_v0  ;;  %v362_v40 = vadd.f32 %v361_v37, %v360_v38 }
  0x23   : > { %v364_v42 = vadd.f32 %v363_v39, %v362_v40 }
  0x24   : > { %637 = vmatpush3.bf16.msra.mxu0 %v210_v11 }
  0x25   : > { %638 = vmatprep.subr.bf16.mxu0 %v729_v0  ;;  %v366_v44 = vadd.f32 %v365_v41, %v364_v42 }
  0x27   : > { %v368_v57 = vadd.f32 %v367_v53, %v366_v44 }
  0x28   : > { %639 = vmatpush3.bf16.msra.mxu0 %v208_v5  ;;  %v377_v5 = vsel %vm349_vm1, %v347_v62, 0.0 }
  0x29   : > { %640 = vmatprep.subr.bf16.mxu0 %v729_v0  ;;  %v370_v61 = vadd.f32 %v369_v56, %v368_v57 }
  0x2b   : > { %v372_v0 = vadd.f32 %v371_v60, %v370_v61 }
  0x2c   : > { %641 = vmatpush3.bf16.msra.mxu0 %v206_v7  ;;  %v379_v7 = vsel %vm349_vm1, %v348_v2, 0.0 }
  0x2d   : > { %v374_v4 = vadd.f32 %v373_v63, %v372_v0 }
  0x2f   : > { %643 = vmatmul.mubr.bf16.vlgmr.msra.gmra.mxu0 %v696_v43  ;;  %v376_v6 = vadd.f32 %v375_v3, %v374_v4 }
  0x31   : > { %v378_v8 = vadd.f32 %v377_v5, %v376_v6 }
  0x33   : > { %v380_v9 = vadd.f32 %v379_v7, %v378_v8 }
  0x35   : > { %v381_v1 = vrot.slane %v380_v9, 4 }
  0x37   : > { %v382_v10 = vadd.f32 %v381_v1, %v380_v9 }
  0x39   : > { %v383_v11 = vrot.slane %v382_v10, 2 }
  0x3b   : > { %v384_v12 = vadd.f32 %v383_v11, %v382_v10 }
  0x3d   : > { %v385_v13 = vrot.slane %v384_v12, 1 }
  0x3f   : > { %v386_v14 = vadd.f32 %v385_v13, %v384_v12 }
  0xef   : > { %v310_v15 = vpop.f32.mrf.mxu0 }
  0xf0   : > { %v387_v16 = vmul.f32 2.0, %v310_v15 }
  0xf1   : > { %v644_v17 = vpop.f32.mrf.mxu0 }
  0xf2   : > { %v389_v18 = vsub.f32 %v387_v16, %v386_v14 }
  0xf3   : > { %v313_v19 = vpop.f32.mrf.mxu0 }
  0xf4   : > { %v388_v20 = vmul.f32 2.0, %v313_v19  ;;  %v394_v21 = vsel %vm349_vm1, %v389_v18, -inf }
  0xf5   : > { %395 = vmax.xlane.f32.xlu0 %v394_v21  ;;  %v645_v22 = vpop.f32.mrf.mxu0 }
  0xf6   : > { %v390_v23 = vsub.f32 %v388_v20, %v386_v14 }
  0xf8   : > { %v397_v24 = vsel %vm349_vm1, %v390_v23, -inf }
  0xf9   : > { %398 = vmax.xlane.f32.xlu0 %v397_v24 }
 0x17e   : > { %v396_v28 = vpop.xlane.xlu0 %395 }
 0x17f   : > { %vm400_vm2 = vcmp.eq.f32.partialorder %v389_v18, %v396_v28 }
 0x180   : > { %v402_v29 = vsel %vm400_vm2, %v813_v27, 16.0 }
 0x181   : > { %v404_v30 = vsel %vm349_vm1, %v402_v29, inf }
 0x182   : > { %405 = vmin.xlane.f32.xlu1 %v404_v30  ;;  %v399_v31 = vpop.xlane.xlu0 %398 }
 0x183   : > { %vm401_vm3 = vcmp.eq.f32.partialorder %v390_v23, %v399_v31 }
 0x184   : > { %v403_v32 = vsel %vm401_vm3, %v813_v27, 16.0 }
 0x185   : > { %v407_v33 = vsel %vm349_vm1, %v403_v32, inf }
 0x186   : > { %408 = vmin.xlane.f32.xlu1 %v407_v33 }
 0x20b   : > { %v406_v34 = vpop.xlane.xlu1 %405 }
 0x20c   : > { %v646_v35 = vtrunc.f32 %v406_v34 }
 0x20e   : > { %v647_v36 = vcvt.f32.s32 %v646_v35 }
 0x20f   : > { %v409_v37 = vpop.xlane.xlu1 %408 }
 0x210   : > { %vm415_vm4 = vcmp.eq.s32.totalorder %v810_v26, %v647_v36  ;;  %v648_v38 = vtrunc.f32 %v409_v37  ;;  %v413_v53 = vsel %vm412_vm8, %v647_v36, 0 }
 0x211   : > { %v417_v39 = vsel %vm415_vm4, -inf, %v389_v18  ;;  %vm487_vm4 = vcmp.eq.s32.totalorder %v810_v26, 3 }
 0x212   : > { %v649_v40 = vcvt.f32.s32 %v648_v38  ;;  %v419_v41 = vsel %vm349_vm1, %v417_v39, -inf }
 0x213   : > { %420 = vmax.xlane.f32.xlu0 %v419_v41 }
 0x214   : > { %vm416_vm5 = vcmp.eq.s32.totalorder %v810_v26, %v649_v40  ;;  %v414_v60 = vsel %vm412_vm8, %v649_v40, 0 }
 0x215   : > { %v418_v42 = vsel %vm416_vm5, -inf, %v390_v23  ;;  %vm490_vm5 = vcmask 31744  }
 0x216   : > { %v422_v43 = vsel %vm349_vm1, %v418_v42, -inf }
 0x217   : > { %423 = vmax.xlane.f32.xlu1 %v422_v43 }
 0x29c   : > { %v421_v44 = vpop.xlane.xlu0 %420 }
 0x29d   : > { %vm425_vm6 = vcmp.eq.f32.partialorder %v417_v39, %v421_v44 }
 0x29e   : > { %v427_v45 = vsel %vm425_vm6, %v813_v27, 16.0 }
 0x29f   : > { %v429_v46 = vsel %vm349_vm1, %v427_v45, inf }
 0x2a0   : > { %v424_v47 = vpop.xlane.xlu1 %423  ;;  %430 = vmin.xlane.f32.xlu0 %v429_v46 }
 0x2a1   : > { %vm426_vm7 = vcmp.eq.f32.partialorder %v418_v42, %v424_v47 }
 0x2a2   : > { %v428_v48 = vsel %vm426_vm7, %v813_v27, 16.0 }
 0x2a3   : > { %v432_v49 = vsel %vm349_vm1, %v428_v48, inf }
 0x2a4   : > { %433 = vmin.xlane.f32.xlu1 %v432_v49 }
 0x329   : > { %v431_v50 = vpop.xlane.xlu0 %430 }
 0x32a   : > { %v650_v51 = vtrunc.f32 %v431_v50 }
 0x32c   : > { %v651_v52 = vcvt.f32.s32 %v650_v51 }
 0x32d   : > { %v434_v54 = vpop.xlane.xlu1 %433 }
 0x32e   : > { %v438_v55 = vsel %vm437_vm9, %v651_v52, %v413_v53  ;;  %vm440_vm10 = vcmp.eq.s32.totalorder %v810_v26, %v651_v52  ;;  %v652_v56 = vtrunc.f32 %v434_v54 }
 0x32f   : > { %v442_v57 = vsel %vm440_vm10, -inf, %v417_v39 }
 0x330   : > { %v653_v58 = vcvt.f32.s32 %v652_v56  ;;  %v444_v59 = vsel %vm349_vm1, %v442_v57, -inf }
 0x331   : > { %445 = vmax.xlane.f32.xlu0 %v444_v59 }
 0x332   : > { %v439_v61 = vsel %vm437_vm9, %v653_v58, %v414_v60  ;;  %vm441_vm11 = vcmp.eq.s32.totalorder %v810_v26, %v653_v58 }
 0x333   : > { %v443_v62 = vsel %vm441_vm11, -inf, %v418_v42 }
 0x334   : > { %v447_v63 = vsel %vm349_vm1, %v443_v62, -inf }
 0x335   : > { %448 = vmax.xlane.f32.xlu1 %v447_v63 }
 0x3ba   : > { %v446_v0 = vpop.xlane.xlu0 %445 }
 0x3bb   : > { %vm450_vm12 = vcmp.eq.f32.partialorder %v442_v57, %v446_v0 }
 0x3bc   : > { %v452_v2 = vsel %vm450_vm12, %v813_v27, 16.0 }
 0x3bd   : > { %v454_v3 = vsel %vm349_vm1, %v452_v2, inf }
 0x3be   : > { %v449_v4 = vpop.xlane.xlu1 %448  ;;  %455 = vmin.xlane.f32.xlu0 %v454_v3 }
 0x3bf   : > { %vm451_vm13 = vcmp.eq.f32.partialorder %v443_v62, %v449_v4 }
 0x3c0   : > { %v453_v5 = vsel %vm451_vm13, %v813_v27, 16.0 }
 0x3c1   : > { %v457_v6 = vsel %vm349_vm1, %v453_v5, inf }
 0x3c2   : > { %458 = vmin.xlane.f32.xlu1 %v457_v6 }
 0x447   : > { %v456_v7 = vpop.xlane.xlu0 %455 }
 0x448   : > { %v654_v8 = vtrunc.f32 %v456_v7 }
 0x44a   : > { %v655_v9 = vcvt.f32.s32 %v654_v8 }
 0x44b   : > { %v459_v1 = vpop.xlane.xlu1 %458 }
 0x44c   : > { %v463_v10 = vsel %vm462_vm14, %v655_v9, %v438_v55  ;;  %v656_v11 = vtrunc.f32 %v459_v1  ;;  %vm465_vm15 = vcmp.eq.s32.totalorder %v810_v26, %v655_v9 }
 0x44d   : > { %v467_v12 = vsel %vm465_vm15, -inf, %v442_v57 }
 0x44e   : > { %v657_v13 = vcvt.f32.s32 %v656_v11  ;;  %v469_v14 = vsel %vm349_vm1, %v467_v12, -inf }
 0x44f   : > { %470 = vmax.xlane.f32.xlu0 %v469_v14 }
 0x450   : > { %v464_v15 = vsel %vm462_vm14, %v657_v13, %v439_v61  ;;  %vm466_vm0 = vcmp.eq.s32.totalorder %v810_v26, %v657_v13 }
 0x451   : > { %v468_v16 = vsel %vm466_vm0, -inf, %v443_v62 }
 0x452   : > { %v472_v17 = vsel %vm349_vm1, %v468_v16, -inf }
 0x453   : > { %473 = vmax.xlane.f32.xlu1 %v472_v17 }
 0x4d8   : > { %v471_v18 = vpop.xlane.xlu0 %470 }
 0x4d9   : > { %vm475_vm2 = vcmp.eq.f32.partialorder %v467_v12, %v471_v18 }
 0x4da   : > { %v477_v19 = vsel %vm475_vm2, %v813_v27, 16.0 }
 0x4db   : > { %v479_v20 = vsel %vm349_vm1, %v477_v19, inf }
 0x4dc   : > { %v474_v21 = vpop.xlane.xlu1 %473  ;;  %480 = vmin.xlane.f32.xlu0 %v479_v20 }
 0x4dd   : > { %vm476_vm3 = vcmp.eq.f32.partialorder %v468_v16, %v474_v21 }
 0x4de   : > { %v478_v22 = vsel %vm476_vm3, %v813_v27, 16.0 }
 0x4df   : > { %v482_v23 = vsel %vm349_vm1, %v478_v22, inf }
 0x4e0   : > { %483 = vmin.xlane.f32.xlu1 %v482_v23 }
 0x565   : > { %v481_v24 = vpop.xlane.xlu0 %480 }
 0x566   : > { %v658_v25 = vtrunc.f32 %v481_v24 }
 0x568   : > { %v659_v28 = vcvt.f32.s32 %v658_v25 }
 0x569   : > { %v484_v29 = vpop.xlane.xlu1 %483 }
 0x56a   : > { %v488_v30 = vsel %vm487_vm4, %v659_v28, %v463_v10  ;;  %v660_v31 = vtrunc.f32 %v484_v29 }
 0x56b   : > { %491 = vst.msk [vmem:[%s201_s24] sm:$0xff] %vm490_vm5, %v488_v30 }
 0x56c   : > { %v661_v32 = vcvt.f32.s32 %v660_v31 }
 0x56e   : > { %v489_v27 = vsel %vm487_vm4, %v661_v32, %v464_v15 }
 0x56f   : > { %492 = vst.msk [vmem:[%s201_s24 + $0x8] sm:$0xff] %vm490_vm5, %v489_v27 }
 0x570 PF: > { %s12_s11 = sadd.s32 1, %s727_s11   ;;  %s863_s9 = smov %s723_s10 }
 0x571   : > { %p9_p5 = scmp.ge.s32.totalorder %s12_s11, 4   ;;  %s864_s10 = smov %s866_s12 }
 0x573   :  { %11 = sbr.rel (!%p9_p5) target bundleno = 2 (0x2), region = 61 }

// kernel: dgcnn_forward.18
= control target key start
LH: loop header
LB: loop body
LE: loop exit
PB: predicated region body
PF: predicated region fallthrough
CT: control target
= control target key end

     0   :  { %s1364_s24 = smov 0   ;;  %s1366_s25 = smov 0   ;;  %s1547_s0 = inlined_call_operand.vmem [shape: bf16[2,16,64], index: 0, kind: input, shape index: {}]   ;;  %s1548_s1 = inlined_call_operand.vmem [shape: bf16[2,16,64], index: 1, kind: input, shape index: {}]   ;;  %s1549_s2 = inlined_call_operand.vmem [shape: bf16[2,16,128], index: 2, kind: input, shape index: {}]   ;;  %s1550_s3 = inlined_call_operand.vmem [shape: bf16[2,16,256], index: 3, kind: input, shape index: {}]   ;;  %s1551_s4 = inlined_call_operand.vmem [shape: bf16[512,64], index: 4, kind: input, shape index: {}]   ;;  %s1552_s5 = inlined_call_operand.vmem [shape: f32[1,64], index: 5, kind: input, shape index: {}]   ;;  %s1553_s6 = inlined_call_operand.vmem [shape: f32[2,1,64], index: 6, kind: output, shape index: {0}]   ;;  %s1554_s7 = inlined_call_operand.vmem [shape: f32[2,1,64], index: 7, kind: output, shape index: {1}]  }
   0x1   :  { %s1368_s26 = smov 0  }
   0x2 LB: > { %s30_s27 = sadd.s32 1, %s1316_s25  ;;  %p1094_p0 = scmp.ge.s32.totalorder %s1320_s26, 1  ;;  %s1320_s26 = sphi %s1368_s26, %s18_s26   ;;  %s1316_s25 = sphi %s1366_s25, %s1556_s25   ;;  %s1312_s24 = sphi %s1364_s24, %s1555_s24  }
   0x3   : > { %p32_p1 = scmp.ge.s32.totalorder %s30_s27, 2  ;;  %p311_p2 = scmp.lt.s32.totalorder %s1320_s26, 3 }
   0x5   : > { %s1558_s27 = smov (%p32_p1, %s30_s27), 0  ;;  %p312_p3 = pnand %p1094_p0, %p311_p2 }
   0x6   : > { %p377_p4 = scmp.lt.s32.totalorder (!%p312_p3), %s1312_s24, 1 }
   0x7   : > { %315 = sbr.rel (%p312_p3) target bundleno = 296 (0x128), region = 44 }
   0xc   : > { %v1260_v0 = vld [vmem:[%s1551_s4 + $0x38] sm:$0xff]   ;;  %v1322_v1 = vmov 0.0   ;;  %v1262_v3 = vld [vmem:[%s1551_s4 + $0x30] sm:$0xff]   ;;  %vm1323_vm0 = vmmov 0   ;;  %s1560_s24 = smov (!%p377_p4, %s1312_s24), 1  ;;  %v1264_v5 = vld [vmem:[%s1551_s4 + $0x28] sm:$0xff]  }
   0xd   : > { %1190 = vmatprep.subr.bf16.mxu0 %v1322_v1  ;;  %1202 = vmatprep.subr.bf16.mxu1 %v1322_v1  ;;  %v1261_v2 = vld [vmem:[%s1551_s4 + $0x18] sm:$0xff]   ;;  %v1263_v4 = vld [vmem:[%s1551_s4 + $0x10] sm:$0xff]   ;;  %s1408_s15 = sshll.u32 %s1560_s24, 3  ;;  %v1265_v6 = vld [vmem:[%s1551_s4 + $0x8] sm:$0xff]   ;;  %vm473_vm1 = vcmask 523264   ;;  %s1148_s18 = sshll.u32 %s1560_s24, 4 }
   0xe   : > { %1191 = vmatpush3.bf16.msra.mxu0 %v1260_v0  ;;  %1198 = vmatprep.mubr.msk.bf16.mxu0 %vm1323_vm0, %v1322_v1  ;;  %s394_s20 = scalar_lea.vmem %s1548_s1, %s1408_s15  ;;  %s384_s23 = scalar_lea.vmem %s1547_s0, %s1408_s15  ;;  %v1266_v7 = vld [vmem:[%s1551_s4 + $0x20] sm:$0xff]   ;;  %v1270_v10 = vld [vmem:[%s1551_s4 + $0xf8] sm:$0xff]   ;;  %v1273_v14 = vld [vmem:[%s1551_s4 + $0xf0] sm:$0xff]   ;;  %vm926_vm4 = vcmask 516096  }
   0xf   : > { %1203 = vmatpush3.bf16.msra.mxu1 %v1261_v2  ;;  %1192 = vmatprep.subr.bf16.mxu0 %v1322_v1  ;;  %v1267_v8 = vld [vmem:[%s1551_s4] sm:$0xff]   ;;  %v1271_v12 = vld [vmem:[%s1551_s4 + $0x78] sm:$0xff]   ;;  %v1274_v15 = vld [vmem:[%s1551_s4 + $0x70] sm:$0xff]   ;;  %s415_s8 = scalar_lea.vmem %s1550_s3, %s1148_s18  ;;  %s404_s16 = scalar_lea.vmem %s1549_s2, %s1408_s15 }
  0x10   : > { %1204 = vmatprep.subr.bf16.mxu1 %v1322_v1  ;;  %1210 = vmatprep.mubr.msk.bf16.mxu1 %vm1323_vm0, %v1322_v1  ;;  %v1268_v9 = vld [vmem:[%s394_s20] sm:$0xff]   ;;  %v1272_v13 = vld [vmem:[%s1551_s4 + $0xb8] sm:$0xff]   ;;  %v1275_v16 = vld [vmem:[%s1551_s4 + $0xb0] sm:$0xff]   ;;  %s419_s13 = scalar_lea.vmem %s1553_s6, %s1560_s24  ;;  %s422_s17 = scalar_lea.vmem %s1554_s7, %s1560_s24 }
  0x11   : > { %v1269_v11 = vld [vmem:[%s384_s23] sm:$0xff]   ;;  %v1276_v17 = vld [vmem:[%s1551_s4 + $0xe8] sm:$0xff]   ;;  %v1282_v23 = vld [vmem:[%s1551_s4 + $0xd8] sm:$0xff]  }
  0x12   : > { %1193 = vmatpush3.bf16.msra.mxu0 %v1262_v3  ;;  %v1277_v18 = vld [vmem:[%s1551_s4 + $0x68] sm:$0xff]   ;;  %v1279_v20 = vld [vmem:[%s1551_s4 + $0xe0] sm:$0xff]   ;;  %v1283_v24 = vld [vmem:[%s1551_s4 + $0x58] sm:$0xff]  }
  0x13   : > { %1205 = vmatpush3.bf16.msra.mxu1 %v1263_v4  ;;  %1194 = vmatprep.subr.bf16.mxu0 %v1322_v1  ;;  %v1278_v19 = vld [vmem:[%s1551_s4 + $0xa8] sm:$0xff]   ;;  %v1280_v21 = vld [vmem:[%s1551_s4 + $0x60] sm:$0xff]   ;;  %v1284_v25 = vld [vmem:[%s1551_s4 + $0x98] sm:$0xff]  }
  0x14   : > { %1206 = vmatprep.subr.bf16.mxu1 %v1322_v1  ;;  %v1281_v22 = vld [vmem:[%s1551_s4 + $0xa0] sm:$0xff]   ;;  %v1285_v26 = vld [vmem:[%s1551_s4 + $0xd0] sm:$0xff]   ;;  %v1288_v30 = vld [vmem:[%s1551_s4 + $0xc8] sm:$0xff]  }
  0x15   : > { %v1286_v27 = vld [vmem:[%s1551_s4 + $0x50] sm:$0xff]   ;;  %v1296_v29 = vld [vmem:[%s415_s8 + $0x4] ss:$8 sps:$4 sm:$0xff]   ;;  %v1294_v37 = vld [vmem:[%s415_s8] ss:$8 sps:$4 sm:$0xff]  }
  0x16   : > { %1195 = vmatpush3.bf16.msra.mxu0 %v1264_v5  ;;  %v1287_v28 = vld [vmem:[%s1551_s4 + $0x90] sm:$0xff]   ;;  %v1289_v31 = vld [vmem:[%s1551_s4 + $0x48] sm:$0xff]   ;;  %v1291_v33 = vld [vmem:[%s1551_s4 + $0xc0] sm:$0xff]  }
  0x17   : > { %1207 = vmatpush3.bf16.msra.mxu1 %v1265_v6  ;;  %1196 = vmatprep.subr.bf16.mxu0 %v1322_v1  ;;  %v1290_v32 = vld [vmem:[%s1551_s4 + $0x88] sm:$0xff]   ;;  %v1292_v34 = vld [vmem:[%s1551_s4 + $0x40] sm:$0xff]  }
  0x18   : > { %1208 = vmatprep.subr.bf16.mxu1 %v1322_v1  ;;  %v1293_v35 = vld [vmem:[%s1551_s4 + $0x80] sm:$0xff]  }
  0x19   : > { %v1297_v36 = vld [vmem:[%s404_s16] sm:$0xff]  }
  0x1a   : > { %1197 = vmatpush3.bf16.msra.mxu0 %v1266_v7  ;;  %v1142_v54 = vld [vmem:[%s1552_s5] ss:$0 sm:$0xff] }
  0x1b   : > { %1209 = vmatpush3.bf16.msra.mxu1 %v1267_v8  ;;  %1214 = vmatprep.subr.bf16.mxu0 %v1322_v1 }
  0x1c   : > { %1168 = vmatprep.subr.bf16.mxu1 %v1270_v10 }
  0x1d   : > { %1199 = vmatmul.mubr.msk.bf16.vlgmr.msra.gmra.mxu0 %vm473_vm1, %v1268_v9 }
  0x1e   : > { %1211 = vmatmul.mubr.msk.bf16.vlgmr.msra.gmra.mxu1 %vm473_vm1, %v1269_v11  ;;  %1215 = vmatpush3.bf16.msra.mxu0 %v1271_v12 }
  0x1f   : > { %1169 = vmatpush3.bf16.msra.mxu1 %v1272_v13  ;;  %1216 = vmatprep.subr.bf16.mxu0 %v1322_v1 }
  0x20   : > { %1170 = vmatprep.subr.bf16.mxu1 %v1273_v14  ;;  %1230 = vmatprep.mubr.msk.bf16.mxu0 %vm1323_vm0, %v1322_v1 }
  0x21   : > { %878 = vmatprep.mubr.bf16.mxu1 %v1296_v29 }
  0x22   : > { %1217 = vmatpush3.bf16.msra.mxu0 %v1274_v15 }
  0x23   : > { %1171 = vmatpush3.bf16.msra.mxu1 %v1275_v16  ;;  %1218 = vmatprep.subr.bf16.mxu0 %v1322_v1 }
  0x24   : > { %1172 = vmatprep.subr.bf16.mxu1 %v1276_v17 }
  0x26   : > { %1219 = vmatpush3.bf16.msra.mxu0 %v1277_v18 }
  0x27   : > { %1173 = vmatpush3.bf16.msra.mxu1 %v1278_v19  ;;  %1220 = vmatprep.subr.bf16.mxu0 %v1322_v1 }
  0x28   : > { %1174 = vmatprep.subr.bf16.mxu1 %v1279_v20 }
  0x2a   : > { %1221 = vmatpush3.bf16.msra.mxu0 %v1280_v21 }
  0x2b   : > { %1175 = vmatpush3.bf16.msra.mxu1 %v1281_v22  ;;  %1222 = vmatprep.subr.bf16.mxu0 %v1322_v1 }
  0x2c   : > { %1176 = vmatprep.subr.bf16.mxu1 %v1282_v23 }
  0x2e   : > { %1223 = vmatpush3.bf16.msra.mxu0 %v1283_v24 }
  0x2f   : > { %1177 = vmatpush3.bf16.msra.mxu1 %v1284_v25  ;;  %1224 = vmatprep.subr.bf16.mxu0 %v1322_v1 }
  0x30   : > { %1178 = vmatprep.subr.bf16.mxu1 %v1285_v26 }
  0x32   : > { %1225 = vmatpush3.bf16.msra.mxu0 %v1286_v27 }
  0x33   : > { %1179 = vmatpush3.bf16.msra.mxu1 %v1287_v28  ;;  %1226 = vmatprep.subr.bf16.mxu0 %v1322_v1 }
  0x34   : > { %1180 = vmatprep.subr.bf16.mxu1 %v1288_v30 }
  0x36   : > { %1227 = vmatpush3.bf16.msra.mxu0 %v1289_v31 }
  0x37   : > { %1181 = vmatpush3.bf16.msra.mxu1 %v1290_v32  ;;  %1228 = vmatprep.subr.bf16.mxu0 %v1322_v1 }
  0x38   : > { %1182 = vmatprep.subr.bf16.mxu1 %v1291_v33 }
  0x3a   : > { %1229 = vmatpush3.bf16.msra.mxu0 %v1292_v34 }
  0x3b   : > { %1183 = vmatpush3.bf16.msra.mxu1 %v1293_v35 }
  0x3d   : > { %1231 = vmatmul.mubr.bf16.vlgmr.msra.gmra.mxu0 %v1297_v36 }
  0x3e   : > { %879 = vmatmul.mubr.bf16.vlgmr.msra.gmra.mxu1 %v1294_v37 }
  0xdd   : > { %v511_v38 = vpop.f32.mrf.mxu0 }
  0xde   : > { %v584_v39 = vpop.f32.mrf.mxu1 }
  0xdf   : > { %v1200_v40 = vpop.f32.mrf.mxu0  ;;  %v585_v48 = vadd.f32 %v584_v39, %v511_v38 }
  0xe0   : > { %v1212_v41 = vpop.f32.mrf.mxu1 }
  0xe1   : > { %v514_v42 = vpop.f32.mrf.mxu0 }
  0xe2   : > { %v587_v43 = vpop.f32.mrf.mxu1 }
  0xe3   : > { %v1201_v44 = vpop.f32.mrf.mxu0  ;;  %v588_v56 = vadd.f32 %v587_v43, %v514_v42 }
  0xe4   : > { %v1213_v45 = vpop.f32.mrf.mxu1 }
  0xfd   : > { %v697_v46 = vpop.f32.mrf.mxu0 }
  0xfe   : > { %v1184_v47 = vpop.f32.mrf.mxu1  ;;  %v704_v51 = vadd.f32 %v697_v46, %v585_v48 }
  0xff   : > { %v1232_v49 = vpop.f32.mrf.mxu0 }
 0x100   : > { %v1185_v50 = vpop.f32.mrf.mxu1 }
 0x101   : > { %v1186_v52 = vadd.f32 %v1185_v50, %v1184_v47  ;;  %v700_v53 = vpop.f32.mrf.mxu0 }
 0x102   : > { %v1187_v55 = vpop.f32.mrf.mxu1  ;;  %v705_v61 = vadd.f32 %v700_v53, %v588_v56 }
 0x103   : > { %v887_v57 = vadd.f32 %v1186_v52, %v704_v51  ;;  %v1233_v58 = vpop.f32.mrf.mxu0 }
 0x104   : > { %v1188_v59 = vpop.f32.mrf.mxu1 }
 0x105   : > { %v896_v60 = vadd.f32 %v1142_v54, %v887_v57  ;;  %v1189_v62 = vadd.f32 %v1188_v59, %v1187_v55 }
 0x107   : > { %v900_v63 = vmul.f32 0.2, %v896_v60  ;;  %v888_v0 = vadd.f32 %v1189_v62, %v705_v61  ;;  %vm898_vm2 = vcmp.ge.f32.partialorder %v896_v60, 0.0 }
 0x109   : > { %v897_v1 = vadd.f32 %v1142_v54, %v888_v0  ;;  %v902_v2 = vsel %vm898_vm2, %v896_v60, %v900_v63 }
 0x10a   : > { %v904_v5 = vsel %vm473_vm1, %v902_v2, -inf  ;;  %v913_v6 = vsel %vm473_vm1, %v902_v2, 0.0 }
 0x10b   : > { %vm899_vm3 = vcmp.ge.f32.partialorder %v897_v1, 0.0  ;;  %v901_v3 = vmul.f32 0.2, %v897_v1 }
 0x10d   : > { %v903_v4 = vsel %vm899_vm3, %v897_v1, %v901_v3 }
 0x10e   : > { %v905_v7 = vsel %vm473_vm1, %v903_v4, -inf  ;;  %v914_v8 = vsel %vm473_vm1, %v903_v4, 0.0 }
 0x10f   : > { %v906_v9 = vmax.f32 %v904_v5, %v905_v7  ;;  %v915_v10 = vadd.f32 %v914_v8, %v913_v6 }
 0x111   : > { %v907_v11 = vrot.slane %v906_v9, 4  ;;  %v916_v12 = vrot.slane %v915_v10, 4 }
 0x113   : > { %v908_v13 = vmax.f32 %v906_v9, %v907_v11  ;;  %v917_v14 = vadd.f32 %v916_v12, %v915_v10 }
 0x115   : > { %v909_v15 = vrot.slane %v908_v13, 2  ;;  %v918_v16 = vrot.slane %v917_v14, 2 }
 0x117   : > { %v910_v17 = vmax.f32 %v908_v13, %v909_v15  ;;  %v919_v18 = vadd.f32 %v918_v16, %v917_v14 }
 0x119   : > { %v911_v19 = vrot.slane %v910_v17, 1  ;;  %v920_v20 = vrot.slane %v919_v18, 1 }
 0x11b   : > { %v912_v21 = vmax.f32 %v910_v17, %v911_v19  ;;  %v921_v22 = vadd.f32 %v920_v20, %v919_v18 }
 0x11d   : > { %927 = vst.msk [vmem:[%s419_s13] sm:$0x1] %vm926_vm4, %v912_v21  ;;  %928 = vst.msk [vmem:[%s422_s17] sm:$0x1] %vm926_vm4, %v921_v22 }
 0x124   : > { %v943_v23 = vld [vmem:[%s422_s17] sm:$0x1] }
 0x125   : > { %v944_v24 = vmul.f32 0.0625, %v943_v23 }
 0x127   : > { %946 = vst.msk [vmem:[%s422_s17] sm:$0x1] %vm926_vm4, %v944_v24 }
 0x128 PF: > { %s18_s26 = sadd.s32 1, %s1320_s26   ;;  %s1555_s24 = smov %s1316_s25 }
 0x129   : > { %p15_p5 = scmp.ge.s32.totalorder %s18_s26, 4   ;;  %s1556_s25 = smov %s1558_s27 }
 0x12b   :  { %17 = sbr.rel (!%p15_p5) target bundleno = 2 (0x2), region = 107 }

// kernel: dgcnn_forward.19
= control target key start
LH: loop header
LB: loop body
LE: loop exit
PB: predicated region body
PF: predicated region fallthrough
CT: control target
= control target key end

     0   :  { %s1484_s0 = inlined_call_operand.vmem [shape: f32[2,128], index: 0, kind: input, shape index: {}]   ;;  %s1485_s1 = inlined_call_operand.vmem [shape: f32[128,512], index: 1, kind: input, shape index: {}]   ;;  %s1486_s2 = inlined_call_operand.vmem [shape: f32[1,512], index: 2, kind: input, shape index: {}]   ;;  %s1487_s3 = inlined_call_operand.vmem [shape: f32[512,256], index: 3, kind: input, shape index: {}]   ;;  %s1488_s4 = inlined_call_operand.vmem [shape: f32[1,256], index: 4, kind: input, shape index: {}]   ;;  %s1489_s5 = inlined_call_operand.vmem [shape: f32[256,40], index: 5, kind: input, shape index: {}]   ;;  %s1490_s6 = inlined_call_operand.vmem [shape: f32[1,40], index: 6, kind: input, shape index: {}]   ;;  %s1491_s7 = inlined_call_operand.hbm [shape: f32[2,40], index: 7, kind: output, shape index: {}]  }
   0x1   :  { %v89_v0 = vld [vmem:[%s1485_s1 + $0x1e8] sm:$0xff]  ;;  %v91_v1 = vld [vmem:[%s1485_s1 + $0x1f8] sm:$0xff]  ;;  %v88_v2 = vld [vmem:[%s1485_s1 + $0x1e0] sm:$0xff] }
   0x2   :  { %114 = vmatprep.subr.mxu0 %v89_v0  ;;  %185 = vmatprep.subr.mxu1 %v91_v1  ;;  %v90_v3 = vld [vmem:[%s1485_s1 + $0x1f0] sm:$0xff]  ;;  %v85_v4 = vld [vmem:[%s1485_s1 + $0x1c8] sm:$0xff]  ;;  %v87_v5 = vld [vmem:[%s1485_s1 + $0x1d8] sm:$0xff]  ;;  %v741_v1 = vmov 0.0  }
   0x3   :  { %115 = vmatpush1.msra.mxu0 %v88_v2  ;;  %186 = vmatpush1.msra.mxu1 %v90_v3  ;;  %v84_v6 = vld [vmem:[%s1485_s1 + $0x1c0] sm:$0xff]  ;;  %v86_v7 = vld [vmem:[%s1485_s1 + $0x1d0] sm:$0xff]  ;;  %v81_v8 = vld [vmem:[%s1485_s1 + $0x1a8] sm:$0xff] }
   0x4   :  { %116 = vmatprep.subr.mxu0 %v85_v4  ;;  %187 = vmatprep.subr.mxu1 %v87_v5  ;;  %v83_v9 = vld [vmem:[%s1485_s1 + $0x1b8] sm:$0xff]  ;;  %v80_v10 = vld [vmem:[%s1485_s1 + $0x1a0] sm:$0xff]  ;;  %v82_v11 = vld [vmem:[%s1485_s1 + $0x1b0] sm:$0xff] }
   0x5   :  { %117 = vmatpush1.msra.mxu0 %v84_v6  ;;  %188 = vmatpush1.msra.mxu1 %v86_v7  ;;  %v77_v12 = vld [vmem:[%s1485_s1 + $0x188] sm:$0xff]  ;;  %v79_v13 = vld [vmem:[%s1485_s1 + $0x198] sm:$0xff]  ;;  %v76_v14 = vld [vmem:[%s1485_s1 + $0x180] sm:$0xff] }
   0x6   :  { %118 = vmatprep.subr.mxu0 %v81_v8  ;;  %189 = vmatprep.subr.mxu1 %v83_v9  ;;  %v78_v15 = vld [vmem:[%s1485_s1 + $0x190] sm:$0xff]  ;;  %v73_v16 = vld [vmem:[%s1485_s1 + $0x168] sm:$0xff]  ;;  %v75_v17 = vld [vmem:[%s1485_s1 + $0x178] sm:$0xff] }
   0x7   :  { %119 = vmatpush1.msra.mxu0 %v80_v10  ;;  %190 = vmatpush1.msra.mxu1 %v82_v11  ;;  %v72_v18 = vld [vmem:[%s1485_s1 + $0x160] sm:$0xff]  ;;  %v74_v19 = vld [vmem:[%s1485_s1 + $0x170] sm:$0xff]  ;;  %v69_v20 = vld [vmem:[%s1485_s1 + $0x148] sm:$0xff] }
   0x8   :  { %120 = vmatprep.subr.mxu0 %v77_v12  ;;  %191 = vmatprep.subr.mxu1 %v79_v13  ;;  %v71_v21 = vld [vmem:[%s1485_s1 + $0x158] sm:$0xff]  ;;  %v68_v22 = vld [vmem:[%s1485_s1 + $0x140] sm:$0xff]  ;;  %v70_v23 = vld [vmem:[%s1485_s1 + $0x150] sm:$0xff] }
   0x9   :  { %121 = vmatpush1.msra.mxu0 %v76_v14  ;;  %192 = vmatpush1.msra.mxu1 %v78_v15  ;;  %v65_v24 = vld [vmem:[%s1485_s1 + $0x128] sm:$0xff]  ;;  %v67_v25 = vld [vmem:[%s1485_s1 + $0x138] sm:$0xff]  ;;  %v64_v26 = vld [vmem:[%s1485_s1 + $0x120] sm:$0xff] }
   0xa   :  { %122 = vmatprep.subr.mxu0 %v73_v16  ;;  %193 = vmatprep.subr.mxu1 %v75_v17  ;;  %v66_v27 = vld [vmem:[%s1485_s1 + $0x130] sm:$0xff]  ;;  %v61_v28 = vld [vmem:[%s1485_s1 + $0x108] sm:$0xff]  ;;  %v63_v29 = vld [vmem:[%s1485_s1 + $0x118] sm:$0xff] }
   0xb   :  { %123 = vmatpush1.msra.mxu0 %v72_v18  ;;  %194 = vmatpush1.msra.mxu1 %v74_v19  ;;  %v60_v30 = vld [vmem:[%s1485_s1 + $0x100] sm:$0xff]  ;;  %v62_v31 = vld [vmem:[%s1485_s1 + $0x110] sm:$0xff]  ;;  %v57_v32 = vld [vmem:[%s1485_s1 + $0xe8] sm:$0xff] }
   0xc   :  { %124 = vmatprep.subr.mxu0 %v69_v20  ;;  %195 = vmatprep.subr.mxu1 %v71_v21  ;;  %v59_v33 = vld [vmem:[%s1485_s1 + $0xf8] sm:$0xff]  ;;  %v56_v34 = vld [vmem:[%s1485_s1 + $0xe0] sm:$0xff]  ;;  %v58_v35 = vld [vmem:[%s1485_s1 + $0xf0] sm:$0xff] }
   0xd   :  { %125 = vmatpush1.msra.mxu0 %v68_v22  ;;  %196 = vmatpush1.msra.mxu1 %v70_v23  ;;  %v53_v36 = vld [vmem:[%s1485_s1 + $0xc8] sm:$0xff]  ;;  %v55_v37 = vld [vmem:[%s1485_s1 + $0xd8] sm:$0xff]  ;;  %v52_v38 = vld [vmem:[%s1485_s1 + $0xc0] sm:$0xff] }
   0xe   :  { %126 = vmatprep.subr.mxu0 %v65_v24  ;;  %197 = vmatprep.subr.mxu1 %v67_v25  ;;  %v54_v39 = vld [vmem:[%s1485_s1 + $0xd0] sm:$0xff]  ;;  %v49_v40 = vld [vmem:[%s1485_s1 + $0xa8] sm:$0xff]  ;;  %v51_v41 = vld [vmem:[%s1485_s1 + $0xb8] sm:$0xff] }
   0xf   :  { %127 = vmatpush1.msra.mxu0 %v64_v26  ;;  %198 = vmatpush1.msra.mxu1 %v66_v27  ;;  %v48_v42 = vld [vmem:[%s1485_s1 + $0xa0] sm:$0xff]  ;;  %v50_v43 = vld [vmem:[%s1485_s1 + $0xb0] sm:$0xff]  ;;  %v45_v44 = vld [vmem:[%s1485_s1 + $0x88] sm:$0xff] }
  0x10   :  { %128 = vmatprep.subr.mxu0 %v61_v28  ;;  %199 = vmatprep.subr.mxu1 %v63_v29  ;;  %v47_v45 = vld [vmem:[%s1485_s1 + $0x98] sm:$0xff]  ;;  %v44_v46 = vld [vmem:[%s1485_s1 + $0x80] sm:$0xff]  ;;  %v46_v47 = vld [vmem:[%s1485_s1 + $0x90] sm:$0xff] }
  0x11   :  { %129 = vmatpush1.msra.mxu0 %v60_v30  ;;  %200 = vmatpush1.msra.mxu1 %v62_v31  ;;  %v41_v48 = vld [vmem:[%s1485_s1 + $0x68] sm:$0xff]  ;;  %v43_v49 = vld [vmem:[%s1485_s1 + $0x78] sm:$0xff]  ;;  %v40_v50 = vld [vmem:[%s1485_s1 + $0x60] sm:$0xff] }
  0x12   :  { %130 = vmatprep.subr.mxu0 %v57_v32  ;;  %201 = vmatprep.subr.mxu1 %v59_v33  ;;  %v42_v51 = vld [vmem:[%s1485_s1 + $0x70] sm:$0xff]  ;;  %v37_v52 = vld [vmem:[%s1485_s1 + $0x48] sm:$0xff]  ;;  %v39_v53 = vld [vmem:[%s1485_s1 + $0x58] sm:$0xff] }
  0x13   :  { %131 = vmatpush1.msra.mxu0 %v56_v34  ;;  %202 = vmatpush1.msra.mxu1 %v58_v35  ;;  %v36_v54 = vld [vmem:[%s1485_s1 + $0x40] sm:$0xff]  ;;  %v38_v55 = vld [vmem:[%s1485_s1 + $0x50] sm:$0xff]  ;;  %v33_v56 = vld [vmem:[%s1485_s1 + $0x28] sm:$0xff] }
  0x14   :  { %132 = vmatprep.subr.mxu0 %v53_v36  ;;  %203 = vmatprep.subr.mxu1 %v55_v37  ;;  %v35_v57 = vld [vmem:[%s1485_s1 + $0x38] sm:$0xff]  ;;  %v32_v58 = vld [vmem:[%s1485_s1 + $0x20] sm:$0xff]  ;;  %v34_v59 = vld [vmem:[%s1485_s1 + $0x30] sm:$0xff] }
  0x15   :  { %133 = vmatpush1.msra.mxu0 %v52_v38  ;;  %204 = vmatpush1.msra.mxu1 %v54_v39  ;;  %v29_v60 = vld [vmem:[%s1485_s1 + $0x8] sm:$0xff]  ;;  %v31_v61 = vld [vmem:[%s1485_s1 + $0x18] sm:$0xff]  ;;  %v28_v62 = vld [vmem:[%s1485_s1] sm:$0xff] }
  0x16   :  { %134 = vmatprep.subr.mxu0 %v49_v40  ;;  %205 = vmatprep.subr.mxu1 %v51_v41  ;;  %v30_v63 = vld [vmem:[%s1485_s1 + $0x10] sm:$0xff]  ;;  %v27_v0 = vld [vmem:[%s1484_s0] sm:$0x3]  ;;  %v299_v2 = vld [vmem:[%s1487_s3 + $0xf8] sm:$0xff] }
  0x17   :  { %135 = vmatpush1.msra.mxu0 %v48_v42  ;;  %206 = vmatpush1.msra.mxu1 %v50_v43  ;;  %v363_v3 = vld [vmem:[%s1487_s3 + $0x2f8] sm:$0xff]  ;;  %v298_v4 = vld [vmem:[%s1487_s3 + $0xf0] sm:$0xff]  ;;  %v297_v6 = vld [vmem:[%s1487_s3 + $0xe8] sm:$0xff] }
  0x18   :  { %136 = vmatprep.subr.mxu0 %v45_v44  ;;  %207 = vmatprep.subr.mxu1 %v47_v45  ;;  %v362_v5 = vld [vmem:[%s1487_s3 + $0x2f0] sm:$0xff]  ;;  %v361_v7 = vld [vmem:[%s1487_s3 + $0x2e8] sm:$0xff]  ;;  %v296_v8 = vld [vmem:[%s1487_s3 + $0xe0] sm:$0xff] }
  0x19   :  { %137 = vmatpush1.msra.mxu0 %v44_v46  ;;  %208 = vmatpush1.msra.mxu1 %v46_v47  ;;  %v360_v9 = vld [vmem:[%s1487_s3 + $0x2e0] sm:$0xff]  ;;  %v295_v10 = vld [vmem:[%s1487_s3 + $0xd8] sm:$0xff]  ;;  %v294_v12 = vld [vmem:[%s1487_s3 + $0xd0] sm:$0xff] }
  0x1a   :  { %138 = vmatprep.subr.mxu0 %v41_v48  ;;  %209 = vmatprep.subr.mxu1 %v43_v49  ;;  %v359_v11 = vld [vmem:[%s1487_s3 + $0x2d8] sm:$0xff]  ;;  %v358_v13 = vld [vmem:[%s1487_s3 + $0x2d0] sm:$0xff]  ;;  %v293_v14 = vld [vmem:[%s1487_s3 + $0xc8] sm:$0xff] }
  0x1b   :  { %139 = vmatpush1.msra.mxu0 %v40_v50  ;;  %210 = vmatpush1.msra.mxu1 %v42_v51  ;;  %v357_v15 = vld [vmem:[%s1487_s3 + $0x2c8] sm:$0xff]  ;;  %v292_v16 = vld [vmem:[%s1487_s3 + $0xc0] sm:$0xff]  ;;  %v291_v18 = vld [vmem:[%s1487_s3 + $0xb8] sm:$0xff] }
  0x1c   :  { %140 = vmatprep.subr.mxu0 %v37_v52  ;;  %211 = vmatprep.subr.mxu1 %v39_v53  ;;  %v356_v17 = vld [vmem:[%s1487_s3 + $0x2c0] sm:$0xff]  ;;  %v355_v19 = vld [vmem:[%s1487_s3 + $0x2b8] sm:$0xff]  ;;  %v290_v20 = vld [vmem:[%s1487_s3 + $0xb0] sm:$0xff] }
  0x1d   :  { %141 = vmatpush1.msra.mxu0 %v36_v54  ;;  %212 = vmatpush1.msra.mxu1 %v38_v55  ;;  %v354_v21 = vld [vmem:[%s1487_s3 + $0x2b0] sm:$0xff]  ;;  %v289_v22 = vld [vmem:[%s1487_s3 + $0xa8] sm:$0xff]  ;;  %v288_v24 = vld [vmem:[%s1487_s3 + $0xa0] sm:$0xff] }
  0x1e   :  { %142 = vmatprep.subr.mxu0 %v33_v56  ;;  %213 = vmatprep.subr.mxu1 %v35_v57  ;;  %v353_v23 = vld [vmem:[%s1487_s3 + $0x2a8] sm:$0xff]  ;;  %v352_v25 = vld [vmem:[%s1487_s3 + $0x2a0] sm:$0xff]  ;;  %v287_v26 = vld [vmem:[%s1487_s3 + $0x98] sm:$0xff] }
  0x1f   :  { %143 = vmatpush1.msra.mxu0 %v32_v58  ;;  %214 = vmatpush1.msra.mxu1 %v34_v59  ;;  %v351_v27 = vld [vmem:[%s1487_s3 + $0x298] sm:$0xff]  ;;  %v286_v28 = vld [vmem:[%s1487_s3 + $0x90] sm:$0xff]  ;;  %v285_v30 = vld [vmem:[%s1487_s3 + $0x88] sm:$0xff] }
  0x20   :  { %144 = vmatprep.subr.mxu0 %v29_v60  ;;  %215 = vmatprep.subr.mxu1 %v31_v61  ;;  %v350_v29 = vld [vmem:[%s1487_s3 + $0x290] sm:$0xff]  ;;  %v349_v31 = vld [vmem:[%s1487_s3 + $0x288] sm:$0xff]  ;;  %v284_v32 = vld [vmem:[%s1487_s3 + $0x80] sm:$0xff] }
  0x21   :  { %145 = vmatpush1.msra.mxu0 %v28_v62  ;;  %178 = vmatprep.mubr.f32.mxu0 %v741_v1  ;;  %v348_v33 = vld [vmem:[%s1487_s3 + $0x280] sm:$0xff]  ;;  %v283_v34 = vld [vmem:[%s1487_s3 + $0x78] sm:$0xff]  ;;  %v282_v36 = vld [vmem:[%s1487_s3 + $0x70] sm:$0xff] }
  0x22   :  { %216 = vmatpush1.msra.mxu1 %v30_v63  ;;  %249 = vmatprep.mubr.f32.mxu1 %v741_v1  ;;  %v347_v35 = vld [vmem:[%s1487_s3 + $0x278] sm:$0xff]  ;;  %v346_v37 = vld [vmem:[%s1487_s3 + $0x270] sm:$0xff]  ;;  %v281_v38 = vld [vmem:[%s1487_s3 + $0x68] sm:$0xff] }
  0x23   :  { %179 = vmatmul.mubr.f32.vlgmr.msra.gmra.mxu0 %v27_v0  ;;  %250 = vmatmul.mubr.f32.vlgmr.msra.gmra.mxu1 %v27_v0  ;;  %v345_v39 = vld [vmem:[%s1487_s3 + $0x268] sm:$0xff]  ;;  %v280_v40 = vld [vmem:[%s1487_s3 + $0x60] sm:$0xff]  ;;  %v279_v42 = vld [vmem:[%s1487_s3 + $0x58] sm:$0xff] }
  0x24   :  { %408 = vmatprep.subr.mxu0 %v299_v2  ;;  %479 = vmatprep.subr.mxu1 %v363_v3  ;;  %v344_v41 = vld [vmem:[%s1487_s3 + $0x260] sm:$0xff]  ;;  %v343_v43 = vld [vmem:[%s1487_s3 + $0x258] sm:$0xff]  ;;  %v278_v44 = vld [vmem:[%s1487_s3 + $0x50] sm:$0xff] }
  0x25   :  { %409 = vmatpush1.msra.mxu0 %v298_v4  ;;  %480 = vmatpush1.msra.mxu1 %v362_v5  ;;  %v342_v45 = vld [vmem:[%s1487_s3 + $0x250] sm:$0xff]  ;;  %v277_v46 = vld [vmem:[%s1487_s3 + $0x48] sm:$0xff]  ;;  %v276_v48 = vld [vmem:[%s1487_s3 + $0x40] sm:$0xff] }
  0x26   :  { %410 = vmatprep.subr.mxu0 %v297_v6  ;;  %481 = vmatprep.subr.mxu1 %v361_v7  ;;  %v341_v47 = vld [vmem:[%s1487_s3 + $0x248] sm:$0xff]  ;;  %v340_v49 = vld [vmem:[%s1487_s3 + $0x240] sm:$0xff]  ;;  %v275_v50 = vld [vmem:[%s1487_s3 + $0x38] sm:$0xff] }
  0x27   :  { %411 = vmatpush1.msra.mxu0 %v296_v8  ;;  %482 = vmatpush1.msra.mxu1 %v360_v9  ;;  %v339_v51 = vld [vmem:[%s1487_s3 + $0x238] sm:$0xff]  ;;  %v274_v52 = vld [vmem:[%s1487_s3 + $0x30] sm:$0xff]  ;;  %v273_v54 = vld [vmem:[%s1487_s3 + $0x28] sm:$0xff] }
  0x28   :  { %412 = vmatprep.subr.mxu0 %v295_v10  ;;  %483 = vmatprep.subr.mxu1 %v359_v11  ;;  %v338_v53 = vld [vmem:[%s1487_s3 + $0x230] sm:$0xff]  ;;  %v337_v55 = vld [vmem:[%s1487_s3 + $0x228] sm:$0xff] }
  0x29   :  { %413 = vmatpush1.msra.mxu0 %v294_v12  ;;  %484 = vmatpush1.msra.mxu1 %v358_v13 }
  0x2a   :  { %414 = vmatprep.subr.mxu0 %v293_v14  ;;  %485 = vmatprep.subr.mxu1 %v357_v15 }
  0x2b   :  { %415 = vmatpush1.msra.mxu0 %v292_v16  ;;  %486 = vmatpush1.msra.mxu1 %v356_v17 }
  0x2c   :  { %416 = vmatprep.subr.mxu0 %v291_v18  ;;  %487 = vmatprep.subr.mxu1 %v355_v19 }
  0x2d   :  { %417 = vmatpush1.msra.mxu0 %v290_v20  ;;  %488 = vmatpush1.msra.mxu1 %v354_v21 }
  0x2e   :  { %418 = vmatprep.subr.mxu0 %v289_v22  ;;  %489 = vmatprep.subr.mxu1 %v353_v23 }
  0x2f   :  { %419 = vmatpush1.msra.mxu0 %v288_v24  ;;  %490 = vmatpush1.msra.mxu1 %v352_v25 }
  0x30   :  { %420 = vmatprep.subr.mxu0 %v287_v26  ;;  %491 = vmatprep.subr.mxu1 %v351_v27 }
  0x31   :  { %421 = vmatpush1.msra.mxu0 %v286_v28  ;;  %492 = vmatpush1.msra.mxu1 %v350_v29 }
  0x32   :  { %422 = vmatprep.subr.mxu0 %v285_v30  ;;  %493 = vmatprep.subr.mxu1 %v349_v31 }
  0x33   :  { %423 = vmatpush1.msra.mxu0 %v284_v32  ;;  %494 = vmatpush1.msra.mxu1 %v348_v33 }
  0x34   :  { %424 = vmatprep.subr.mxu0 %v283_v34  ;;  %495 = vmatprep.subr.mxu1 %v347_v35 }
  0x35   :  { %425 = vmatpush1.msra.mxu0 %v282_v36  ;;  %496 = vmatpush1.msra.mxu1 %v346_v37 }
  0x36   :  { %426 = vmatprep.subr.mxu0 %v281_v38  ;;  %497 = vmatprep.subr.mxu1 %v345_v39 }
  0x37   :  { %427 = vmatpush1.msra.mxu0 %v280_v40  ;;  %498 = vmatpush1.msra.mxu1 %v344_v41 }
  0x38   :  { %428 = vmatprep.subr.mxu0 %v279_v42  ;;  %499 = vmatprep.subr.mxu1 %v343_v43 }
  0x39   :  { %429 = vmatpush1.msra.mxu0 %v278_v44  ;;  %500 = vmatpush1.msra.mxu1 %v342_v45 }
  0x3a   :  { %430 = vmatprep.subr.mxu0 %v277_v46  ;;  %501 = vmatprep.subr.mxu1 %v341_v47 }
  0x3b   :  { %431 = vmatpush1.msra.mxu0 %v276_v48  ;;  %502 = vmatpush1.msra.mxu1 %v340_v49 }
  0x3c   :  { %12 = vsyncpa [#allocation3], 0  ;;  %432 = vmatprep.subr.mxu0 %v275_v50  ;;  %503 = vmatprep.subr.mxu1 %v339_v51  ;;  %v272_v56 = vld [vmem:[%s1487_s3 + $0x20] sm:$0xff]  ;;  %v271_v58 = vld [vmem:[%s1487_s3 + $0x18] sm:$0xff]  ;;  %s742_s9 = smov [#allocation2]   ;;  %vm665_vm6 = vcmask 320512  }
  0x3d   :  { %v336_v57 = vld [vmem:[%s1487_s3 + $0x220] sm:$0xff]  ;;  %433 = vmatpush1.msra.mxu0 %v274_v52  ;;  %504 = vmatpush1.msra.mxu1 %v338_v53  ;;  %v335_v59 = vld [vmem:[%s1487_s3 + $0x218] sm:$0xff]  ;;  %v270_v60 = vld [vmem:[%s1487_s3 + $0x10] sm:$0xff]  ;;  %s673_s10 = sshll.u32 %s742_s9, 4  ;;  %s674_s10 = int_to_ptr.vmem [resolvable:$true] %s673_s10 }
  0x3e   :  { %434 = vmatprep.subr.mxu0 %v273_v54  ;;  %505 = vmatprep.subr.mxu1 %v337_v55  ;;  %v334_v61 = vld [vmem:[%s1487_s3 + $0x210] sm:$0xff]  ;;  %v269_v62 = vld [vmem:[%s1487_s3 + $0x8] sm:$0xff]  ;;  %v268_v0 = vld [vmem:[%s1487_s3] sm:$0xff]  ;;  %s719_s11 = scalar_lea.vmem %s674_s10, 32  ;;  %p724_p1 = scmp.lt.s32.totalorder %s674_s10, %s674_s10 }
  0x3f   :  { %435 = vmatpush1.msra.mxu0 %v272_v56  ;;  %506 = vmatpush1.msra.mxu1 %v336_v57  ;;  %v333_v63 = vld [vmem:[%s1487_s3 + $0x208] sm:$0xff]  ;;  %v332_v1 = vld [vmem:[%s1487_s3 + $0x200] sm:$0xff]  ;;  %v331_v2 = vld [vmem:[%s1487_s3 + $0x1f8] sm:$0xff]  ;;  %p720_p0 = scmp.ne.s32.totalorder %s674_s10, %s719_s11  ;;  %p725_p2 = scmp.lt.s32.totalorder %s719_s11, %s719_s11 }
  0x40   :  { %436 = vmatprep.subr.mxu0 %v271_v58  ;;  %507 = vmatprep.subr.mxu1 %v335_v59  ;;  %v395_v3 = vld [vmem:[%s1487_s3 + $0x3f8] sm:$0xff]  ;;  %v330_v4 = vld [vmem:[%s1487_s3 + $0x1f0] sm:$0xff]  ;;  %v329_v6 = vld [vmem:[%s1487_s3 + $0x1e8] sm:$0xff] }
  0x41   :  { %437 = vmatpush1.msra.mxu0 %v270_v60  ;;  %508 = vmatpush1.msra.mxu1 %v334_v61  ;;  %v394_v5 = vld [vmem:[%s1487_s3 + $0x3f0] sm:$0xff]  ;;  %v393_v7 = vld [vmem:[%s1487_s3 + $0x3e8] sm:$0xff]  ;;  %v328_v8 = vld [vmem:[%s1487_s3 + $0x1e0] sm:$0xff]  ;;  %p726_p3 = por %p725_p2, %p724_p1 }
  0x42   :  { %438 = vmatprep.subr.mxu0 %v269_v62  ;;  %509 = vmatprep.subr.mxu1 %v333_v63  ;;  %v392_v9 = vld [vmem:[%s1487_s3 + $0x3e0] sm:$0xff]  ;;  %v327_v10 = vld [vmem:[%s1487_s3 + $0x1d8] sm:$0xff]  ;;  %v326_v12 = vld [vmem:[%s1487_s3 + $0x1d0] sm:$0xff] }
  0x43   :  { %439 = vmatpush1.msra.mxu0 %v268_v0  ;;  %510 = vmatpush1.msra.mxu1 %v332_v1  ;;  %v391_v11 = vld [vmem:[%s1487_s3 + $0x3d8] sm:$0xff]  ;;  %v390_v13 = vld [vmem:[%s1487_s3 + $0x3d0] sm:$0xff]  ;;  %v325_v14 = vld [vmem:[%s1487_s3 + $0x1c8] sm:$0xff]  ;;  %p727_p4 = pnand %p726_p3, %p720_p0 }
  0x44   :  { %440 = vmatprep.subr.mxu0 %v331_v2  ;;  %511 = vmatprep.subr.mxu1 %v395_v3  ;;  %v389_v15 = vld [vmem:[%s1487_s3 + $0x3c8] sm:$0xff]  ;;  %v324_v16 = vld [vmem:[%s1487_s3 + $0x1c0] sm:$0xff]  ;;  %v323_v18 = vld [vmem:[%s1487_s3 + $0x1b8] sm:$0xff]  ;;  %v94_v3 = vlaneseq }
  0x45   :  { %441 = vmatpush2.msra.mxu0 %v330_v4  ;;  %512 = vmatpush2.msra.mxu1 %v394_v5  ;;  %v388_v17 = vld [vmem:[%s1487_s3 + $0x3c0] sm:$0xff]  ;;  %v387_v19 = vld [vmem:[%s1487_s3 + $0x3b8] sm:$0xff]  ;;  %v322_v20 = vld [vmem:[%s1487_s3 + $0x1b0] sm:$0xff] }
  0x46   :  { %442 = vmatprep.subr.mxu0 %v329_v6  ;;  %513 = vmatprep.subr.mxu1 %v393_v7  ;;  %v386_v21 = vld [vmem:[%s1487_s3 + $0x3b0] sm:$0xff]  ;;  %v321_v22 = vld [vmem:[%s1487_s3 + $0x1a8] sm:$0xff]  ;;  %v320_v24 = vld [vmem:[%s1487_s3 + $0x1a0] sm:$0xff]  ;;  %v1365_v4 = vshrl.u32 %v94_v3, 7 }
  0x47   :  { %443 = vmatpush2.msra.mxu0 %v328_v8  ;;  %514 = vmatpush2.msra.mxu1 %v392_v9  ;;  %v385_v23 = vld [vmem:[%s1487_s3 + $0x3a8] sm:$0xff]  ;;  %v384_v25 = vld [vmem:[%s1487_s3 + $0x3a0] sm:$0xff]  ;;  %v319_v26 = vld [vmem:[%s1487_s3 + $0x198] sm:$0xff] }
  0x48   :  { %444 = vmatprep.subr.mxu0 %v327_v10  ;;  %515 = vmatprep.subr.mxu1 %v391_v11  ;;  %v383_v27 = vld [vmem:[%s1487_s3 + $0x398] sm:$0xff]  ;;  %v318_v28 = vld [vmem:[%s1487_s3 + $0x190] sm:$0xff]  ;;  %v317_v30 = vld [vmem:[%s1487_s3 + $0x188] sm:$0xff]  ;;  %v96_v5 = vsub.s32 0, %v1365_v4  ;;  %v104_v6 = vsub.s32 2, %v1365_v4  ;;  %v100_v8 = vsub.s32 1, %v1365_v4 }
  0x49   :  { %445 = vmatpush2.msra.mxu0 %v326_v12  ;;  %516 = vmatpush2.msra.mxu1 %v390_v13  ;;  %v382_v29 = vld [vmem:[%s1487_s3 + $0x390] sm:$0xff]  ;;  %v381_v31 = vld [vmem:[%s1487_s3 + $0x388] sm:$0xff]  ;;  %v316_v32 = vld [vmem:[%s1487_s3 + $0x180] sm:$0xff]  ;;  %v108_v9 = vsub.s32 3, %v1365_v4 }
  0x4a   :  { %446 = vmatprep.subr.mxu0 %v325_v14  ;;  %517 = vmatprep.subr.mxu1 %v389_v15  ;;  %v380_v33 = vld [vmem:[%s1487_s3 + $0x380] sm:$0xff]  ;;  %v315_v34 = vld [vmem:[%s1487_s3 + $0x178] sm:$0xff]  ;;  %v314_v36 = vld [vmem:[%s1487_s3 + $0x170] sm:$0xff] }
  0x4b   :  { %447 = vmatpush2.msra.mxu0 %v324_v16  ;;  %518 = vmatpush2.msra.mxu1 %v388_v17  ;;  %v379_v35 = vld [vmem:[%s1487_s3 + $0x378] sm:$0xff]  ;;  %v378_v37 = vld [vmem:[%s1487_s3 + $0x370] sm:$0xff]  ;;  %v313_v38 = vld [vmem:[%s1487_s3 + $0x168] sm:$0xff] }
  0x4c   :  { %448 = vmatprep.subr.mxu0 %v323_v18  ;;  %519 = vmatprep.subr.mxu1 %v387_v19  ;;  %v377_v39 = vld [vmem:[%s1487_s3 + $0x368] sm:$0xff]  ;;  %v312_v40 = vld [vmem:[%s1487_s3 + $0x160] sm:$0xff]  ;;  %v311_v42 = vld [vmem:[%s1487_s3 + $0x158] sm:$0xff] }
  0x4d   :  { %449 = vmatpush2.msra.mxu0 %v322_v20  ;;  %520 = vmatpush2.msra.mxu1 %v386_v21  ;;  %v376_v41 = vld [vmem:[%s1487_s3 + $0x360] sm:$0xff]  ;;  %v375_v43 = vld [vmem:[%s1487_s3 + $0x358] sm:$0xff]  ;;  %v310_v44 = vld [vmem:[%s1487_s3 + $0x150] sm:$0xff] }
  0x4e   :  { %450 = vmatprep.subr.mxu0 %v321_v22  ;;  %521 = vmatprep.subr.mxu1 %v385_v23  ;;  %v374_v45 = vld [vmem:[%s1487_s3 + $0x350] sm:$0xff]  ;;  %v309_v46 = vld [vmem:[%s1487_s3 + $0x148] sm:$0xff]  ;;  %v308_v48 = vld [vmem:[%s1487_s3 + $0x140] sm:$0xff] }
  0x4f   :  { %451 = vmatpush2.msra.mxu0 %v320_v24  ;;  %522 = vmatpush2.msra.mxu1 %v384_v25  ;;  %v373_v47 = vld [vmem:[%s1487_s3 + $0x348] sm:$0xff]  ;;  %v372_v49 = vld [vmem:[%s1487_s3 + $0x340] sm:$0xff]  ;;  %v307_v50 = vld [vmem:[%s1487_s3 + $0x138] sm:$0xff] }
  0x50   :  { %452 = vmatprep.subr.mxu0 %v319_v26  ;;  %523 = vmatprep.subr.mxu1 %v383_v27  ;;  %v371_v51 = vld [vmem:[%s1487_s3 + $0x338] sm:$0xff]  ;;  %v306_v52 = vld [vmem:[%s1487_s3 + $0x130] sm:$0xff]  ;;  %v305_v54 = vld [vmem:[%s1487_s3 + $0x128] sm:$0xff] }
  0x51   :  { %453 = vmatpush2.msra.mxu0 %v318_v28  ;;  %524 = vmatpush2.msra.mxu1 %v382_v29  ;;  %v370_v53 = vld [vmem:[%s1487_s3 + $0x330] sm:$0xff]  ;;  %v369_v55 = vld [vmem:[%s1487_s3 + $0x328] sm:$0xff]  ;;  %v304_v56 = vld [vmem:[%s1487_s3 + $0x120] sm:$0xff] }
  0x52   :  { %454 = vmatprep.subr.mxu0 %v317_v30  ;;  %525 = vmatprep.subr.mxu1 %v381_v31  ;;  %v368_v57 = vld [vmem:[%s1487_s3 + $0x320] sm:$0xff]  ;;  %v303_v58 = vld [vmem:[%s1487_s3 + $0x118] sm:$0xff]  ;;  %v302_v60 = vld [vmem:[%s1487_s3 + $0x110] sm:$0xff] }
  0x53   :  { %455 = vmatpush2.msra.mxu0 %v316_v32  ;;  %526 = vmatpush2.msra.mxu1 %v380_v33  ;;  %v367_v59 = vld [vmem:[%s1487_s3 + $0x318] sm:$0xff]  ;;  %v366_v61 = vld [vmem:[%s1487_s3 + $0x310] sm:$0xff]  ;;  %v301_v62 = vld [vmem:[%s1487_s3 + $0x108] sm:$0xff] }
  0x54   :  { %456 = vmatprep.subr.mxu0 %v315_v34  ;;  %527 = vmatprep.subr.mxu1 %v379_v35  ;;  %v365_v63 = vld [vmem:[%s1487_s3 + $0x308] sm:$0xff]  ;;  %v300_v0 = vld [vmem:[%s1487_s3 + $0x100] sm:$0xff]  ;;  %v587_v2 = vld [vmem:[%s1489_s5 + $0xf8] sm:$0xff] }
  0x55   :  { %457 = vmatpush2.msra.mxu0 %v314_v36  ;;  %528 = vmatpush2.msra.mxu1 %v378_v37  ;;  %v364_v1 = vld [vmem:[%s1487_s3 + $0x300] sm:$0xff]  ;;  %v571_v28 = vld [vmem:[%s1489_s5 + $0x78] sm:$0xff]  ;;  %v586_v31 = vld [vmem:[%s1489_s5 + $0xf0] sm:$0xff] }
  0x56   :  { %458 = vmatprep.subr.mxu0 %v313_v38  ;;  %529 = vmatprep.subr.mxu1 %v377_v39  ;;  %v92_v7 = vld [vmem:[%s1486_s2] sm:$0xf]  ;;  %v570_v32 = vld [vmem:[%s1489_s5 + $0x70] sm:$0xff]  ;;  %v585_v33 = vld [vmem:[%s1489_s5 + $0xe8] sm:$0xff] }
  0x57   :  { %459 = vmatpush2.msra.mxu0 %v312_v40  ;;  %530 = vmatpush2.msra.mxu1 %v376_v41  ;;  %v97_v10 = vrot.slane %v92_v7, %v96_v5  ;;  %v105_v11 = vrot.slane %v92_v7, %v104_v6  ;;  %v101_v14 = vrot.slane %v92_v7, %v100_v8  ;;  %v569_v34 = vld [vmem:[%s1489_s5 + $0x68] sm:$0xff]  ;;  %v584_v35 = vld [vmem:[%s1489_s5 + $0xe0] sm:$0xff]  ;;  %v583_v37 = vld [vmem:[%s1489_s5 + $0xd8] sm:$0xff] }
  0x58   :  { %460 = vmatprep.subr.mxu0 %v311_v42  ;;  %531 = vmatprep.subr.mxu1 %v375_v43  ;;  %v109_v15 = vrot.slane %v92_v7, %v108_v9  ;;  %v568_v36 = vld [vmem:[%s1489_s5 + $0x60] sm:$0xff]  ;;  %v567_v38 = vld [vmem:[%s1489_s5 + $0x58] sm:$0xff]  ;;  %v582_v39 = vld [vmem:[%s1489_s5 + $0xd0] sm:$0xff] }
  0x59   :  { %461 = vmatpush2.msra.mxu0 %v310_v44  ;;  %532 = vmatpush2.msra.mxu1 %v374_v45  ;;  %v566_v40 = vld [vmem:[%s1489_s5 + $0x50] sm:$0xff]  ;;  %v581_v41 = vld [vmem:[%s1489_s5 + $0xc8] sm:$0xff]  ;;  %v580_v43 = vld [vmem:[%s1489_s5 + $0xc0] sm:$0xff] }
  0x5a   :  { %462 = vmatprep.subr.mxu0 %v309_v46  ;;  %533 = vmatprep.subr.mxu1 %v373_v47  ;;  %v565_v42 = vld [vmem:[%s1489_s5 + $0x48] sm:$0xff]  ;;  %v564_v44 = vld [vmem:[%s1489_s5 + $0x40] sm:$0xff]  ;;  %v579_v45 = vld [vmem:[%s1489_s5 + $0xb8] sm:$0xff] }
  0x5b   :  { %463 = vmatpush2.msra.mxu0 %v308_v48  ;;  %534 = vmatpush2.msra.mxu1 %v372_v49  ;;  %v563_v46 = vld [vmem:[%s1489_s5 + $0x38] sm:$0xff]  ;;  %v578_v47 = vld [vmem:[%s1489_s5 + $0xb0] sm:$0xff]  ;;  %v577_v49 = vld [vmem:[%s1489_s5 + $0xa8] sm:$0xff] }
  0x5c   :  { %464 = vmatprep.subr.mxu0 %v307_v50  ;;  %535 = vmatprep.subr.mxu1 %v371_v51  ;;  %v562_v48 = vld [vmem:[%s1489_s5 + $0x30] sm:$0xff]  ;;  %v561_v50 = vld [vmem:[%s1489_s5 + $0x28] sm:$0xff]  ;;  %v576_v51 = vld [vmem:[%s1489_s5 + $0xa0] sm:$0xff] }
  0x5d   :  { %465 = vmatpush2.msra.mxu0 %v306_v52  ;;  %536 = vmatpush2.msra.mxu1 %v370_v53  ;;  %v560_v52 = vld [vmem:[%s1489_s5 + $0x20] sm:$0xff]  ;;  %v575_v53 = vld [vmem:[%s1489_s5 + $0x98] sm:$0xff] }
  0x5e   :  { %466 = vmatprep.subr.mxu0 %v305_v54  ;;  %537 = vmatprep.subr.mxu1 %v369_v55  ;;  %v559_v54 = vld [vmem:[%s1489_s5 + $0x18] sm:$0xff]  ;;  %v574_v55 = vld [vmem:[%s1489_s5 + $0x90] sm:$0xff]  ;;  %v681_v4 = vld [vmem:[%s1490_s6] ss:$0 sm:$0xff] }
  0x5f   :  { %467 = vmatpush2.msra.mxu0 %v304_v56  ;;  %538 = vmatpush2.msra.mxu1 %v368_v57  ;;  %v558_v56 = vld [vmem:[%s1489_s5 + $0x10] sm:$0xff]  ;;  %v573_v57 = vld [vmem:[%s1489_s5 + $0x88] sm:$0xff] }
  0x60   :  { %468 = vmatprep.subr.mxu0 %v303_v58  ;;  %539 = vmatprep.subr.mxu1 %v367_v59  ;;  %v557_v58 = vld [vmem:[%s1489_s5 + $0x8] sm:$0xff]  ;;  %v572_v59 = vld [vmem:[%s1489_s5 + $0x80] sm:$0xff] }
  0x61   :  { %469 = vmatpush2.msra.mxu0 %v302_v60  ;;  %540 = vmatpush2.msra.mxu1 %v366_v61  ;;  %v556_v60 = vld [vmem:[%s1489_s5] sm:$0xff] }
  0x62   :  { %470 = vmatprep.subr.mxu0 %v301_v62  ;;  %541 = vmatprep.subr.mxu1 %v365_v63  ;;  %v396_v61 = vld [vmem:[%s1488_s4] sm:$0x3] }
  0x63   :  { %471 = vmatpush2.msra.mxu0 %v300_v0  ;;  %542 = vmatpush2.msra.mxu1 %v364_v1  ;;  %v401_v62 = vrot.slane %v396_v61, %v96_v5  ;;  %v405_v63 = vrot.slane %v396_v61, %v100_v8 }
  0x64   :  { %682 = vmatprep.subr.mxu0 %v587_v2 }
  0xe3   :  { %v180_v12 = vpop.f32.mrf.mxu0  ;;  %v251_v13 = vpop.f32.mrf.mxu1 }
  0xe4   :  { %v181_v16 = vadd.f32 %v180_v12, %v97_v10  ;;  %v252_v17 = vadd.f32 %v251_v13, %v105_v11 }
  0xe5   :  { %v182_v18 = vpop.f32.mrf.mxu0  ;;  %v253_v19 = vpop.f32.mrf.mxu1 }
  0xe6   :  { %v183_v20 = vadd.f32 %v182_v18, %v101_v14  ;;  %v254_v21 = vadd.f32 %v253_v19, %v109_v15  ;;  %vm256_vm0 = vcmp.ge.f32.partialorder %v181_v16, 0.0  ;;  %v260_v22 = vmul.f32 0.2, %v181_v16 }
  0xe7   :  { %vm258_vm1 = vcmp.ge.f32.partialorder %v252_v17, 0.0  ;;  %v262_v23 = vmul.f32 0.2, %v252_v17 }
  0xe8   :  { %v261_v24 = vmul.f32 0.2, %v183_v20  ;;  %v263_v25 = vmul.f32 0.2, %v254_v21  ;;  %vm257_vm2 = vcmp.ge.f32.partialorder %v183_v20, 0.0  ;;  %vm259_vm3 = vcmp.ge.f32.partialorder %v254_v21, 0.0 }
  0xe9   :  { %v264_v29 = vsel %vm256_vm0, %v181_v16, %v260_v22  ;;  %v266_v30 = vsel %vm258_vm1, %v252_v17, %v262_v23 }
  0xea   :  { %v265_v26 = vsel %vm257_vm2, %v183_v20, %v261_v24  ;;  %v267_v27 = vsel %vm259_vm3, %v254_v21, %v263_v25 }
  0xeb   :  { %472 = vmatprep.mubr.f32.mxu0 %v265_v26  ;;  %543 = vmatprep.mubr.f32.mxu1 %v267_v27 }
  0xec   :  { %473 = vmatmul.mubr.f32.vlgmr.msra.gmra.mxu0 %v264_v29  ;;  %544 = vmatmul.mubr.f32.vlgmr.msra.gmra.mxu1 %v266_v30 }
  0xed   :  { %683 = vmatpush3.msra.mxu0 %v571_v28 }
  0xee   :  { %684 = vmatprep.subr.mxu0 %v586_v31 }
  0xef   :  { %685 = vmatpush3.msra.mxu0 %v570_v32 }
  0xf0   :  { %686 = vmatprep.subr.mxu0 %v585_v33 }
  0xf1   :  { %687 = vmatpush3.msra.mxu0 %v569_v34 }
  0xf2   :  { %688 = vmatprep.subr.mxu0 %v584_v35 }
  0xf3   :  { %689 = vmatpush3.msra.mxu0 %v568_v36 }
  0xf4   :  { %690 = vmatprep.subr.mxu0 %v583_v37 }
  0xf5   :  { %691 = vmatpush3.msra.mxu0 %v567_v38 }
  0xf6   :  { %692 = vmatprep.subr.mxu0 %v582_v39 }
  0xf7   :  { %693 = vmatpush3.msra.mxu0 %v566_v40 }
  0xf8   :  { %694 = vmatprep.subr.mxu0 %v581_v41 }
  0xf9   :  { %695 = vmatpush3.msra.mxu0 %v565_v42 }
  0xfa   :  { %696 = vmatprep.subr.mxu0 %v580_v43 }
  0xfb   :  { %697 = vmatpush3.msra.mxu0 %v564_v44 }
  0xfc   :  { %698 = vmatprep.subr.mxu0 %v579_v45 }
  0xfd   :  { %699 = vmatpush3.msra.mxu0 %v563_v46 }
  0xfe   :  { %700 = vmatprep.subr.mxu0 %v578_v47 }
  0xff   :  { %701 = vmatpush3.msra.mxu0 %v562_v48 }
 0x100   :  { %702 = vmatprep.subr.mxu0 %v577_v49 }
 0x101   :  { %703 = vmatpush3.msra.mxu0 %v561_v50 }
 0x102   :  { %704 = vmatprep.subr.mxu0 %v576_v51 }
 0x103   :  { %705 = vmatpush3.msra.mxu0 %v560_v52 }
 0x104   :  { %706 = vmatprep.subr.mxu0 %v575_v53 }
 0x105   :  { %707 = vmatpush3.msra.mxu0 %v559_v54 }
 0x106   :  { %708 = vmatprep.subr.mxu0 %v574_v55 }
 0x107   :  { %709 = vmatpush3.msra.mxu0 %v558_v56 }
 0x108   :  { %710 = vmatprep.subr.mxu0 %v573_v57 }
 0x109   :  { %711 = vmatpush3.msra.mxu0 %v557_v58 }
 0x10a   :  { %712 = vmatprep.subr.mxu0 %v572_v59 }
 0x10b   :  { %713 = vmatpush3.msra.mxu0 %v556_v60 }
 0x1ac   :  { %v474_v0 = vpop.f32.mrf.mxu0  ;;  %v545_v1 = vpop.f32.mrf.mxu1 }
 0x1ad   :  { %v475_v2 = vadd.f32 %v474_v0, %v401_v62 }
 0x1ae   :  { %v476_v3 = vpop.f32.mrf.mxu0  ;;  %v547_v9 = vpop.f32.mrf.mxu1 }
 0x1af   :  { %v546_v6 = vadd.f32 %v545_v1, %v475_v2  ;;  %v477_v7 = vadd.f32 %v476_v3, %v405_v63 }
 0x1b1   :  { %v548_v10 = vadd.f32 %v547_v9, %v477_v7  ;;  %v552_v11 = vmul.f32 0.2, %v546_v6  ;;  %vm550_vm4 = vcmp.ge.f32.partialorder %v546_v6, 0.0 }
 0x1b3   :  { %v553_v12 = vmul.f32 0.2, %v548_v10  ;;  %vm551_vm5 = vcmp.ge.f32.partialorder %v548_v10, 0.0  ;;  %v554_v14 = vsel %vm550_vm4, %v546_v6, %v552_v11 }
 0x1b5   :  { %v555_v13 = vsel %vm551_vm5, %v548_v10, %v553_v12 }
 0x1b6   :  { %659 = vmatprep.mubr.f32.mxu0 %v555_v13 }
 0x1b7   :  { %660 = vmatmul.mubr.f32.vlgmr.msra.gmra.mxu0 %v554_v14 }
 0x277   :  { %v714_v5 = vpop.f32.mrf.mxu0 }
 0x279   :  { %v715_v8 = vpop.f32.mrf.mxu0 }
 0x27a   :  { %v716_v15 = vadd.f32 %v715_v8, %v714_v5 }
 0x27c   :  { %v662_v16 = vadd.f32 %v716_v15, %v681_v4 }
 0x27e   :  { %666 = vst.msk [vmem:[#allocation2] sm:$0x3] %vm665_vm6, %v662_v16 }
 0x27f   :  { %730 = shalt.err (!%p727_p4)
}
 0x280   :  { %676 = dma.vmem_to_hbm [thread:$0]  %s674_s10, 32, %s1491_s7, [#allocation3]  }
 0x281   :  { %739 = dma.done.wait [#allocation3], 32  }
 0x282   :  { %740 = vsyncadd [#allocation3], 4294967264 }
 0x283   :  { %680 = vsyncpa [#allocation3], 1 }

</bundles_post_ra>
